<compile_context>
chip_gen: v7x
topology: tpu7x:2x2x1
jax: 0.10.0
libtpu: 0.0.40
codegen_flags: <defaults>
</compile_context>

<pallas_src>
import jax
import jax.numpy as jnp
from jax import lax
from jax.experimental import pallas as pl
from jax.experimental.pallas import tpu as pltpu

EPS = 1e-5


# ----------------------------- Pallas kernel ---------------------------------
def _make_kernel(H, W, Cin, D, H2, W2, stride, has_proj, lane_pack):
    """Builds the per-batch-element kernel body, specialized on static config."""

    def kernel(*refs):
        if has_proj:
            (x_ref, bn1s_ref, bn1b_ref, w1_ref, alpha_ref, w2_ref,
             bn2s_ref, bn2b_ref, sew1_ref, sew2_ref,
             scw_ref, scs_ref, scb_ref, out_ref, pad1, pad2) = refs
        else:
            (x_ref, bn1s_ref, bn1b_ref, w1_ref, alpha_ref, w2_ref,
             bn2s_ref, bn2b_ref, sew1_ref, sew2_ref,
             out_ref, pad1, pad2) = refs

        f32 = jnp.float32
        bf16 = jnp.bfloat16

        # ---- zero only the 1-px halo (interior is fully overwritten below) ----
        pad1[0:1, :, :] = jnp.zeros((1, W + 2, Cin), f32)
        pad1[H + 1:H + 2, :, :] = jnp.zeros((1, W + 2, Cin), f32)
        pad1[:, 0:1, :] = jnp.zeros((H + 2, 1, Cin), f32)
        pad1[:, W + 1:W + 2, :] = jnp.zeros((H + 2, 1, Cin), f32)
        pad2[0:1, :, :] = jnp.zeros((1, W + 2, D), f32)
        pad2[H + 1:H + 2, :, :] = jnp.zeros((1, W + 2, D), f32)
        pad2[:, 0:1, :] = jnp.zeros((H + 2, 1, D), f32)
        pad2[:, W + 1:W + 2, :] = jnp.zeros((H + 2, 1, D), f32)

        # ---------------- residual branch ----------------
        x2 = x_ref[...].reshape(H * W, Cin)                    # (HW, Cin) f32

        # BatchNorm2d(in_channel), folded to per-channel scale/bias
        y2 = x2 * bn1s_ref[...] + bn1b_ref[...]
        pad1[1:H + 1, 1:W + 1, :] = y2.reshape(H, W, Cin)

        # 3x3 conv, stride 1, pad 1 : in_channel -> depth  (bf16 MXU, f32 acc)
        acc1 = jnp.zeros((H * W, D), f32)
        for dh in range(3):
            for dw in range(3):
                patch = pad1[dh:dh + H, dw:dw + W, :].reshape(H * W, Cin)
                acc1 = acc1 + jnp.dot(patch.astype(bf16), w1_ref[dh * 3 + dw],
                                      preferred_element_type=f32)

        # PReLU(depth), per-channel alpha (f32)
        act = jnp.where(acc1 > 0, acc1, acc1 * alpha_ref[...])
        pad2[1:H + 1, 1:W + 1, :] = act.reshape(H, W, D)

        # 3x3 conv, stride s, pad 1 : depth -> depth, computed only at the
        # strided output positions (strided taps, no full-res conv + subsample)
        acc2 = jnp.zeros((H2 * W2, D), f32)
        for dh in range(3):
            for dw in range(3):
                if stride == 1:
                    patch = pad2[dh:dh + H2, dw:dw + W2, :]
                else:
                    patch = pad2[pl.ds(dh, H2, stride), pl.ds(dw, W2, stride), :]
                patch = patch.reshape(H2 * W2, D)
                acc2 = acc2 + jnp.dot(patch.astype(bf16), w2_ref[dh * 3 + dw],
                                      preferred_element_type=f32)

        # BatchNorm2d(depth)
        res = acc2 * bn2s_ref[...] + bn2b_ref[...]

        # SEModule(depth, 16)  (f32)
        m = jnp.mean(res, axis=0, keepdims=True)               # (1, D) avg pool
        h = jnp.maximum(jnp.dot(m, sew1_ref[...], preferred_element_type=f32), 0.0)
        g = jnp.dot(h, sew2_ref[...], preferred_element_type=f32)
        gate = 1.0 / (1.0 + jnp.exp(-g))                       # sigmoid
        res = res * gate

        # ---------------- shortcut branch ----------------
        if stride == 1:
            xs = x2                                            # (HW, Cin)
        else:
            xs = x_ref[:, pl.ds(0, H2, stride), pl.ds(0, W2, stride), :]
            xs = xs.reshape(H2 * W2, Cin)
        if has_proj:
            # 1x1 conv stride s + folded BN
            sc = jnp.dot(xs.astype(bf16), scw_ref[...], preferred_element_type=f32)
            sc = sc * scs_ref[...] + scb_ref[...]
        else:
            # MaxPool2d(1, stride) == strided identity
            sc = xs

        out = res + sc                                         # (H2*W2, D) f32

        if lane_pack:
            # Pack to a lane-dense (H2, W2*D) slab (last dim multiple of 128)
            # using only trivially-lowered ops: a sublane-aligned reshape and a
            # minor-dim concatenate.  Element order matches (h, w*D + d).
            o3 = out.reshape(H2, W2, D)
            o2 = jnp.concatenate([o3[:, w, :] for w in range(W2)], axis=-1)
            out_ref[...] = o2.reshape(1, H2, W2 * D)
        else:
            out_ref[...] = out.reshape(1, H2, W2, D)

    return kernel


# ------------------------------- wrapper --------------------------------------
def _fold_bn(gamma, beta, mean, var):
    scale = gamma / jnp.sqrt(var + EPS)
    bias = beta - mean * scale
    return scale, bias


def bottleneck_irse_forward(x_nchw, params, stride):
    N, Cin, H, W = x_nchw.shape
    D = params["conv1_w"].shape[0]
    Dr = params["se_fc1_w"].shape[0]
    H2 = (H - 1) // stride + 1
    W2 = (W - 1) // stride + 1
    has_proj = (Cin != D)
    lane_pack = ((W2 * D) % 128 == 0) and (W2 % 8 == 0)

    x = jnp.transpose(x_nchw, (0, 2, 3, 1)).astype(jnp.float32)       # NHWC

    bn1s, bn1b = _fold_bn(params["bn1_gamma"], params["bn1_beta"],
                          params["bn1_mean"], params["bn1_var"])
    bn2s, bn2b = _fold_bn(params["bn2_gamma"], params["bn2_beta"],
                          params["bn2_mean"], params["bn2_var"])

    # conv weights as (tap, Cin, Cout), pre-cast to bf16 for the MXU
    w1 = jnp.transpose(params["conv1_w"], (2, 3, 1, 0)).reshape(9, Cin, D)
    w2 = jnp.transpose(params["conv2_w"], (2, 3, 1, 0)).reshape(9, D, D)
    w1 = w1.astype(jnp.bfloat16)
    w2 = w2.astype(jnp.bfloat16)
    sew1 = params["se_fc1_w"].reshape(Dr, D).T                        # (D, Dr)
    sew2 = params["se_fc2_w"].reshape(D, Dr).T                        # (Dr, D)

    args = [x,
            bn1s.reshape(1, Cin), bn1b.reshape(1, Cin),
            w1, params["prelu_alpha"].reshape(1, D), w2,
            bn2s.reshape(1, D), bn2b.reshape(1, D),
            sew1, sew2]

    def full(shape):
        return pl.BlockSpec(shape, lambda n: (0,) * len(shape))

    in_specs = [
        pl.BlockSpec((1, H, W, Cin), lambda n: (n, 0, 0, 0)),
        full((1, Cin)), full((1, Cin)),
        full((9, Cin, D)), full((1, D)), full((9, D, D)),
        full((1, D)), full((1, D)),
        full((D, Dr)), full((Dr, D)),
    ]

    if has_proj:
        scw = params["sc_conv_w"].reshape(D, Cin).T.astype(jnp.bfloat16)   # (Cin, D)
        scs, scb = _fold_bn(params["sc_bn_gamma"], params["sc_bn_beta"],
                            params["sc_bn_mean"], params["sc_bn_var"])
        args += [scw, scs.reshape(1, D), scb.reshape(1, D)]
        in_specs += [full((Cin, D)), full((1, D)), full((1, D))]

    if lane_pack:
        out_shape = jax.ShapeDtypeStruct((N, H2, W2 * D), jnp.float32)
        out_spec = pl.BlockSpec((1, H2, W2 * D), lambda n: (n, 0, 0))
    else:
        out_shape = jax.ShapeDtypeStruct((N, H2, W2, D), jnp.float32)
        out_spec = pl.BlockSpec((1, H2, W2, D), lambda n: (n, 0, 0, 0))

    kernel = _make_kernel(H, W, Cin, D, H2, W2, stride, has_proj, lane_pack)

    out = pl.pallas_call(
        kernel,
        out_shape=out_shape,
        grid=(N,),
        in_specs=in_specs,
        out_specs=out_spec,
        scratch_shapes=[pltpu.VMEM((H + 2, W + 2, Cin), jnp.float32),
                        pltpu.VMEM((H + 2, W + 2, D), jnp.float32)],
        compiler_params=pltpu.CompilerParams(
            dimension_semantics=("parallel",),        # batch axis -> megacore
            vmem_limit_bytes=32 * 1024 * 1024),
    )(*args)

    if lane_pack:
        out = out.reshape(N, H2, W2, D)
    return jnp.transpose(out, (0, 3, 1, 2))                           # NCHW


# ------------------------ deterministic parameter init ------------------------
def init_params(key, in_channel, depth, reduction=16):
    dr = depth // reduction
    ks = jax.random.split(key, 17)

    def nrm(k, shape, scale=0.1):
        return scale * jax.random.normal(k, shape, jnp.float32)

    p = {
        "bn1_gamma": 1.0 + 0.1 * jax.random.normal(ks[0], (in_channel,), jnp.float32),
        "bn1_beta":  nrm(ks[1], (in_channel,)),
        "bn1_mean":  nrm(ks[2], (in_channel,)),
        "bn1_var":   jax.random.uniform(ks[3], (in_channel,), jnp.float32, 0.5, 1.5),
        "conv1_w":   nrm(ks[4], (depth, in_channel, 3, 3)),
        "prelu_alpha": jnp.full((depth,), 0.25, jnp.float32),
        "conv2_w":   nrm(ks[5], (depth, depth, 3, 3)),
        "bn2_gamma": 1.0 + 0.1 * jax.random.normal(ks[6], (depth,), jnp.float32),
        "bn2_beta":  nrm(ks[7], (depth,)),
        "bn2_mean":  nrm(ks[8], (depth,)),
        "bn2_var":   jax.random.uniform(ks[9], (depth,), jnp.float32, 0.5, 1.5),
        "se_fc1_w":  nrm(ks[10], (dr, depth, 1, 1)),
        "se_fc2_w":  nrm(ks[11], (depth, dr, 1, 1)),
    }
    if in_channel != depth:
        p.update({
            "sc_conv_w":   nrm(ks[12], (depth, in_channel, 1, 1)),
            "sc_bn_gamma": 1.0 + 0.1 * jax.random.normal(ks[13], (depth,), jnp.float32),
            "sc_bn_beta":  nrm(ks[14], (depth,)),
            "sc_bn_mean":  nrm(ks[15], (depth,)),
            "sc_bn_var":   jax.random.uniform(ks[16], (depth,), jnp.float32, 0.5, 1.5),
        })
    return p


# ------------------------------ pure-JAX reference -----------------------------
def reference_forward(x, p, stride, mxu_bf16=True):
    """Reference. mxu_bf16=True matches the kernel's bf16-operand / f32-acc convs."""

    def bn(v, g, b, m, var):
        return ((v - m[None, :, None, None]) / jnp.sqrt(var + EPS)[None, :, None, None]
                * g[None, :, None, None] + b[None, :, None, None])

    def conv(v, w, s, pad, cast=True):
        if mxu_bf16 and cast:
            v = v.astype(jnp.bfloat16)
            w = w.astype(jnp.bfloat16)
            prec = None
        else:
            prec = lax.Precision.HIGHEST
        return lax.conv_general_dilated(
            v, w, (s, s), ((pad, pad), (pad, pad)),
            dimension_numbers=("NCHW", "OIHW", "NCHW"),
            preferred_element_type=jnp.float32, precision=prec)

    Cin = x.shape[1]
    D = p["conv1_w"].shape[0]
    y = bn(x, p["bn1_gamma"], p["bn1_beta"], p["bn1_mean"], p["bn1_var"])
    y = conv(y, p["conv1_w"], 1, 1)
    y = jnp.where(y > 0, y, p["prelu_alpha"][None, :, None, None] * y)
    y = conv(y, p["conv2_w"], stride, 1)
    y = bn(y, p["bn2_gamma"], p["bn2_beta"], p["bn2_mean"], p["bn2_var"])
    m = jnp.mean(y, axis=(2, 3), keepdims=True)
    h = jnp.maximum(conv(m, p["se_fc1_w"], 1, 0, cast=False), 0.0)
    g = conv(h, p["se_fc2_w"], 1, 0, cast=False)
    y = y * jax.nn.sigmoid(g)
    if Cin == D:
        sc = x[:, :, ::stride, ::stride]
    else:
        sc = conv(x, p["sc_conv_w"], stride, 0)
        sc = bn(sc, p["sc_bn_gamma"], p["sc_bn_beta"],
                p["sc_bn_mean"], p["sc_bn_var"])
    return y + sc


# ----------------------------------- main --------------------------------------
if __name__ == "__main__":
    key = jax.random.PRNGKey(0)
    k_x1, k_p1, k_x2, k_p2 = jax.random.split(key, 4)

    # case 1: in_channel != depth (projection shortcut), stride 2
    N, Cin, D, H, W, stride = 2, 16, 32, 16, 16, 2
    x1 = jax.random.normal(k_x1, (N, Cin, H, W), jnp.float32)
    p1 = init_params(k_p1, Cin, D)
    out1 = jax.block_until_ready(bottleneck_irse_forward(x1, p1, stride))
    ref1 = reference_forward(x1, p1, stride, mxu_bf16=True)
    err1 = float(jnp.max(jnp.abs(out1 - ref1)))
    assert out1.shape == (N, D, (H - 1) // stride + 1, (W - 1) // stride + 1), out1.shape
    assert err1 < 2e-3, f"case1 max abs error vs matched ref {err1}"
    err1_f32 = float(jnp.max(jnp.abs(out1 - reference_forward(x1, p1, stride,
                                                              mxu_bf16=False))))
    assert err1_f32 < 0.25, f"case1 max abs error vs f32 ref {err1_f32}"

    # case 2: in_channel == depth (MaxPool2d(1, stride) identity shortcut), stride 1
    N2, C2, H_2, W_2, stride2 = 2, 32, 16, 16, 1
    x2 = jax.random.normal(k_x2, (N2, C2, H_2, W_2), jnp.float32)
    p2 = init_params(k_p2, C2, C2)
    out2 = jax.block_until_ready(bottleneck_irse_forward(x2, p2, stride2))
    ref2 = reference_forward(x2, p2, stride2, mxu_bf16=True)
    err2 = float(jnp.max(jnp.abs(out2 - ref2)))
    assert out2.shape == (N2, C2, H_2, W_2), out2.shape
    assert err2 < 2e-3, f"case2 max abs error vs matched ref {err2}"

    print("KERNEL_OK")
</pallas_src>

<mosaic_0001>
module attributes {stable_mosaic.version = 11 : i64} {
  func.func @kernel(%arg0: i32, %arg1: memref<1x16x16x16xf32, #tpu.memory_space<vmem>>, %arg2: memref<1x16xf32, #tpu.memory_space<vmem>>, %arg3: memref<1x16xf32, #tpu.memory_space<vmem>>, %arg4: memref<9x16x32xbf16, #tpu.memory_space<vmem>>, %arg5: memref<1x32xf32, #tpu.memory_space<vmem>>, %arg6: memref<9x32x32xbf16, #tpu.memory_space<vmem>>, %arg7: memref<1x32xf32, #tpu.memory_space<vmem>>, %arg8: memref<1x32xf32, #tpu.memory_space<vmem>>, %arg9: memref<32x2xf32, #tpu.memory_space<vmem>>, %arg10: memref<2x32xf32, #tpu.memory_space<vmem>>, %arg11: memref<16x32xbf16, #tpu.memory_space<vmem>>, %arg12: memref<1x32xf32, #tpu.memory_space<vmem>>, %arg13: memref<1x32xf32, #tpu.memory_space<vmem>>, %arg14: memref<1x8x256xf32, #tpu.memory_space<vmem>>, %arg15: memref<18x18x16xf32, #tpu.memory_space<vmem>>, %arg16: memref<18x18x32xf32, #tpu.memory_space<vmem>>) attributes {dimension_semantics = [#tpu.dimension_semantics<parallel>], iteration_bounds = array<i64: 2>, scalar_prefetch = 0 : i64, scratch_operands = 2 : i64, tpu.core_type = #tpu.core_type<tc>, window_params = [{transform_indices = @transform_0, window_bounds = array<i64: 1, 16, 16, 16>}, {pipeline_mode = #tpu.pipeline_mode<synchronous>, transform_indices = @transform_1, window_bounds = array<i64: 1, 16>}, {pipeline_mode = #tpu.pipeline_mode<synchronous>, transform_indices = @transform_2, window_bounds = array<i64: 1, 16>}, {pipeline_mode = #tpu.pipeline_mode<synchronous>, transform_indices = @transform_3, window_bounds = array<i64: 9, 16, 32>}, {pipeline_mode = #tpu.pipeline_mode<synchronous>, transform_indices = @transform_4, window_bounds = array<i64: 1, 32>}, {pipeline_mode = #tpu.pipeline_mode<synchronous>, transform_indices = @transform_5, window_bounds = array<i64: 9, 32, 32>}, {pipeline_mode = #tpu.pipeline_mode<synchronous>, transform_indices = @transform_6, window_bounds = array<i64: 1, 32>}, {pipeline_mode = #tpu.pipeline_mode<synchronous>, transform_indices = @transform_7, window_bounds = array<i64: 1, 32>}, {pipeline_mode = #tpu.pipeline_mode<synchronous>, transform_indices = @transform_8, window_bounds = array<i64: 32, 2>}, {pipeline_mode = #tpu.pipeline_mode<synchronous>, transform_indices = @transform_9, window_bounds = array<i64: 2, 32>}, {pipeline_mode = #tpu.pipeline_mode<synchronous>, transform_indices = @transform_10, window_bounds = array<i64: 16, 32>}, {pipeline_mode = #tpu.pipeline_mode<synchronous>, transform_indices = @transform_11, window_bounds = array<i64: 1, 32>}, {pipeline_mode = #tpu.pipeline_mode<synchronous>, transform_indices = @transform_12, window_bounds = array<i64: 1, 32>}, {transform_indices = @transform_13, window_bounds = array<i64: 1, 8, 256>}]} {
    %cst = arith.constant 0.000000e+00 : f32
    %0 = vector.broadcast %cst : f32 to vector<1x18x16xf32>
    %c0 = arith.constant 0 : index
    %c0_0 = arith.constant 0 : index
    %c0_1 = arith.constant 0 : index
    %1 = vector.load %arg15[%c0, %c0_0, %c0_1] : memref<18x18x16xf32, #tpu.memory_space<vmem>>, vector<1x18x16xf32>
    tpu.vector_store %arg15[%c0, %c0_0, %c0_1], %0 {strides = array<i32>} : memref<18x18x16xf32, #tpu.memory_space<vmem>>, vector<1x18x16xf32>,
    %cst_2 = arith.constant 0.000000e+00 : f32
    %2 = vector.broadcast %cst_2 : f32 to vector<1x18x16xf32>
    %c17 = arith.constant 17 : index
    %c0_3 = arith.constant 0 : index
    %c0_4 = arith.constant 0 : index
    %3 = vector.load %arg15[%c17, %c0_3, %c0_4] : memref<18x18x16xf32, #tpu.memory_space<vmem>>, vector<1x18x16xf32>
    tpu.vector_store %arg15[%c17, %c0_3, %c0_4], %2 {strides = array<i32>} : memref<18x18x16xf32, #tpu.memory_space<vmem>>, vector<1x18x16xf32>,
    %cst_5 = arith.constant 0.000000e+00 : f32
    %4 = vector.broadcast %cst_5 : f32 to vector<18x1x16xf32>
    %c0_6 = arith.constant 0 : index
    %c0_7 = arith.constant 0 : index
    %c0_8 = arith.constant 0 : index
    %5 = vector.load %arg15[%c0_6, %c0_7, %c0_8] : memref<18x18x16xf32, #tpu.memory_space<vmem>>, vector<18x1x16xf32>
    tpu.vector_store %arg15[%c0_6, %c0_7, %c0_8], %4 {strides = array<i32>} : memref<18x18x16xf32, #tpu.memory_space<vmem>>, vector<18x1x16xf32>,
    %cst_9 = arith.constant 0.000000e+00 : f32
    %6 = vector.broadcast %cst_9 : f32 to vector<18x1x16xf32>
    %c0_10 = arith.constant 0 : index
    %c17_11 = arith.constant 17 : index
    %c0_12 = arith.constant 0 : index
    %7 = vector.load %arg15[%c0_10, %c17_11, %c0_12] : memref<18x18x16xf32, #tpu.memory_space<vmem>>, vector<18x1x16xf32>
    tpu.vector_store %arg15[%c0_10, %c17_11, %c0_12], %6 {strides = array<i32>} : memref<18x18x16xf32, #tpu.memory_space<vmem>>, vector<18x1x16xf32>,
    %cst_13 = arith.constant 0.000000e+00 : f32
    %8 = vector.broadcast %cst_13 : f32 to vector<1x18x32xf32>
    %c0_14 = arith.constant 0 : index
    %c0_15 = arith.constant 0 : index
    %c0_16 = arith.constant 0 : index
    %9 = vector.load %arg16[%c0_14, %c0_15, %c0_16] : memref<18x18x32xf32, #tpu.memory_space<vmem>>, vector<1x18x32xf32>
    tpu.vector_store %arg16[%c0_14, %c0_15, %c0_16], %8 {strides = array<i32>} : memref<18x18x32xf32, #tpu.memory_space<vmem>>, vector<1x18x32xf32>,
    %cst_17 = arith.constant 0.000000e+00 : f32
    %10 = vector.broadcast %cst_17 : f32 to vector<1x18x32xf32>
    %c17_18 = arith.constant 17 : index
    %c0_19 = arith.constant 0 : index
    %c0_20 = arith.constant 0 : index
    %11 = vector.load %arg16[%c17_18, %c0_19, %c0_20] : memref<18x18x32xf32, #tpu.memory_space<vmem>>, vector<1x18x32xf32>
    tpu.vector_store %arg16[%c17_18, %c0_19, %c0_20], %10 {strides = array<i32>} : memref<18x18x32xf32, #tpu.memory_space<vmem>>, vector<1x18x32xf32>,
    %cst_21 = arith.constant 0.000000e+00 : f32
    %12 = vector.broadcast %cst_21 : f32 to vector<18x1x32xf32>
    %c0_22 = arith.constant 0 : index
    %c0_23 = arith.constant 0 : index
    %c0_24 = arith.constant 0 : index
    %13 = vector.load %arg16[%c0_22, %c0_23, %c0_24] : memref<18x18x32xf32, #tpu.memory_space<vmem>>, vector<18x1x32xf32>
    tpu.vector_store %arg16[%c0_22, %c0_23, %c0_24], %12 {strides = array<i32>} : memref<18x18x32xf32, #tpu.memory_space<vmem>>, vector<18x1x32xf32>,
    %cst_25 = arith.constant 0.000000e+00 : f32
    %14 = vector.broadcast %cst_25 : f32 to vector<18x1x32xf32>
    %c0_26 = arith.constant 0 : index
    %c17_27 = arith.constant 17 : index
    %c0_28 = arith.constant 0 : index
    %15 = vector.load %arg16[%c0_26, %c17_27, %c0_28] : memref<18x18x32xf32, #tpu.memory_space<vmem>>, vector<18x1x32xf32>
    tpu.vector_store %arg16[%c0_26, %c17_27, %c0_28], %14 {strides = array<i32>} : memref<18x18x32xf32, #tpu.memory_space<vmem>>, vector<18x1x32xf32>,
    %c0_29 = arith.constant 0 : index
    %c0_30 = arith.constant 0 : index
    %c0_31 = arith.constant 0 : index
    %c0_32 = arith.constant 0 : index
    %16 = vector.load %arg1[%c0_29, %c0_30, %c0_31, %c0_32] : memref<1x16x16x16xf32, #tpu.memory_space<vmem>>, vector<1x16x16x16xf32>
    %17 = vector.shape_cast %16 : vector<1x16x16x16xf32> to vector<256x16xf32>
    %c0_33 = arith.constant 0 : index
    %c0_34 = arith.constant 0 : index
    %18 = vector.load %arg2[%c0_33, %c0_34] : memref<1x16xf32, #tpu.memory_space<vmem>>, vector<1x16xf32>
    %19 = vector.broadcast %18 : vector<1x16xf32> to vector<256x16xf32>
    %20 = arith.mulf %17, %19 : vector<256x16xf32>
    %c0_35 = arith.constant 0 : index
    %c0_36 = arith.constant 0 : index
    %21 = vector.load %arg3[%c0_35, %c0_36] : memref<1x16xf32, #tpu.memory_space<vmem>>, vector<1x16xf32>
    %22 = vector.broadcast %21 : vector<1x16xf32> to vector<256x16xf32>
    %23 = arith.addf %20, %22 : vector<256x16xf32>
    %24 = vector.shape_cast %23 : vector<256x16xf32> to vector<16x16x16xf32>
    %c1 = arith.constant 1 : index
    %c1_37 = arith.constant 1 : index
    %c0_38 = arith.constant 0 : index
    %25 = vector.load %arg15[%c1, %c1_37, %c0_38] : memref<18x18x16xf32, #tpu.memory_space<vmem>>, vector<16x16x16xf32>
    tpu.vector_store %arg15[%c1, %c1_37, %c0_38], %24 {strides = array<i32>} : memref<18x18x16xf32, #tpu.memory_space<vmem>>, vector<16x16x16xf32>,
    %cst_39 = arith.constant 0.000000e+00 : f32
    %26 = vector.broadcast %cst_39 : f32 to vector<256x32xf32>
    %c0_40 = arith.constant 0 : index
    %c0_41 = arith.constant 0 : index
    %c0_42 = arith.constant 0 : index
    %27 = vector.load %arg15[%c0_40, %c0_41, %c0_42] : memref<18x18x16xf32, #tpu.memory_space<vmem>>, vector<16x16x16xf32>
    %28 = vector.shape_cast %27 : vector<16x16x16xf32> to vector<256x16xf32>
    %29 = arith.truncf %28 : vector<256x16xf32> to vector<256x16xbf16>
    %c0_43 = arith.constant 0 : index
    %c0_44 = arith.constant 0 : index
    %c0_45 = arith.constant 0 : index
    %30 = vector.load %arg4[%c0_43, %c0_44, %c0_45] : memref<9x16x32xbf16, #tpu.memory_space<vmem>>, vector<1x16x32xbf16>
    %31 = vector.shape_cast %30 : vector<1x16x32xbf16> to vector<16x32xbf16>
    %cst_46 = arith.constant dense<0.000000e+00> : vector<256x32xf32>
    %32 = tpu.matmul %29, %31, %cst_46 {dimension_numbers = #tpu.dot_dimension_numbers<[1], [0], [0], [1], [0, 0, 1, 1], [], []>} : vector<256x16xbf16>, vector<16x32xbf16>, vector<256x32xf32> -> vector<256x32xf32>
    %33 = arith.addf %26, %32 : vector<256x32xf32>
    %c0_47 = arith.constant 0 : index
    %c1_48 = arith.constant 1 : index
    %c0_49 = arith.constant 0 : index
    %34 = vector.load %arg15[%c0_47, %c1_48, %c0_49] : memref<18x18x16xf32, #tpu.memory_space<vmem>>, vector<16x16x16xf32>
    %35 = vector.shape_cast %34 : vector<16x16x16xf32> to vector<256x16xf32>
    %36 = arith.truncf %35 : vector<256x16xf32> to vector<256x16xbf16>
    %c1_50 = arith.constant 1 : index
    %c0_51 = arith.constant 0 : index
    %c0_52 = arith.constant 0 : index
    %37 = vector.load %arg4[%c1_50, %c0_51, %c0_52] : memref<9x16x32xbf16, #tpu.memory_space<vmem>>, vector<1x16x32xbf16>
    %38 = vector.shape_cast %37 : vector<1x16x32xbf16> to vector<16x32xbf16>
    %cst_53 = arith.constant dense<0.000000e+00> : vector<256x32xf32>
    %39 = tpu.matmul %36, %38, %cst_53 {dimension_numbers = #tpu.dot_dimension_numbers<[1], [0], [0], [1], [0, 0, 1, 1], [], []>} : vector<256x16xbf16>, vector<16x32xbf16>, vector<256x32xf32> -> vector<256x32xf32>
    %40 = arith.addf %33, %39 : vector<256x32xf32>
    %c0_54 = arith.constant 0 : index
    %c2 = arith.constant 2 : index
    %c0_55 = arith.constant 0 : index
    %41 = vector.load %arg15[%c0_54, %c2, %c0_55] : memref<18x18x16xf32, #tpu.memory_space<vmem>>, vector<16x16x16xf32>
    %42 = vector.shape_cast %41 : vector<16x16x16xf32> to vector<256x16xf32>
    %43 = arith.truncf %42 : vector<256x16xf32> to vector<256x16xbf16>
    %c2_56 = arith.constant 2 : index
    %c0_57 = arith.constant 0 : index
    %c0_58 = arith.constant 0 : index
    %44 = vector.load %arg4[%c2_56, %c0_57, %c0_58] : memref<9x16x32xbf16, #tpu.memory_space<vmem>>, vector<1x16x32xbf16>
    %45 = vector.shape_cast %44 : vector<1x16x32xbf16> to vector<16x32xbf16>
    %cst_59 = arith.constant dense<0.000000e+00> : vector<256x32xf32>
    %46 = tpu.matmul %43, %45, %cst_59 {dimension_numbers = #tpu.dot_dimension_numbers<[1], [0], [0], [1], [0, 0, 1, 1], [], []>} : vector<256x16xbf16>, vector<16x32xbf16>, vector<256x32xf32> -> vector<256x32xf32>
    %47 = arith.addf %40, %46 : vector<256x32xf32>
    %c1_60 = arith.constant 1 : index
    %c0_61 = arith.constant 0 : index
    %c0_62 = arith.constant 0 : index
    %48 = vector.load %arg15[%c1_60, %c0_61, %c0_62] : memref<18x18x16xf32, #tpu.memory_space<vmem>>, vector<16x16x16xf32>
    %49 = vector.shape_cast %48 : vector<16x16x16xf32> to vector<256x16xf32>
    %50 = arith.truncf %49 : vector<256x16xf32> to vector<256x16xbf16>
    %c3 = arith.constant 3 : index
    %c0_63 = arith.constant 0 : index
    %c0_64 = arith.constant 0 : index
    %51 = vector.load %arg4[%c3, %c0_63, %c0_64] : memref<9x16x32xbf16, #tpu.memory_space<vmem>>, vector<1x16x32xbf16>
    %52 = vector.shape_cast %51 : vector<1x16x32xbf16> to vector<16x32xbf16>
    %cst_65 = arith.constant dense<0.000000e+00> : vector<256x32xf32>
    %53 = tpu.matmul %50, %52, %cst_65 {dimension_numbers = #tpu.dot_dimension_numbers<[1], [0], [0], [1], [0, 0, 1, 1], [], []>} : vector<256x16xbf16>, vector<16x32xbf16>, vector<256x32xf32> -> vector<256x32xf32>
    %54 = arith.addf %47, %53 : vector<256x32xf32>
    %c1_66 = arith.constant 1 : index
    %c1_67 = arith.constant 1 : index
    %c0_68 = arith.constant 0 : index
    %55 = vector.load %arg15[%c1_66, %c1_67, %c0_68] : memref<18x18x16xf32, #tpu.memory_space<vmem>>, vector<16x16x16xf32>
    %56 = vector.shape_cast %55 : vector<16x16x16xf32> to vector<256x16xf32>
    %57 = arith.truncf %56 : vector<256x16xf32> to vector<256x16xbf16>
    %c4 = arith.constant 4 : index
    %c0_69 = arith.constant 0 : index
    %c0_70 = arith.constant 0 : index
    %58 = vector.load %arg4[%c4, %c0_69, %c0_70] : memref<9x16x32xbf16, #tpu.memory_space<vmem>>, vector<1x16x32xbf16>
    %59 = vector.shape_cast %58 : vector<1x16x32xbf16> to vector<16x32xbf16>
    %cst_71 = arith.constant dense<0.000000e+00> : vector<256x32xf32>
    %60 = tpu.matmul %57, %59, %cst_71 {dimension_numbers = #tpu.dot_dimension_numbers<[1], [0], [0], [1], [0, 0, 1, 1], [], []>} : vector<256x16xbf16>, vector<16x32xbf16>, vector<256x32xf32> -> vector<256x32xf32>
    %61 = arith.addf %54, %60 : vector<256x32xf32>
    %c1_72 = arith.constant 1 : index
    %c2_73 = arith.constant 2 : index
    %c0_74 = arith.constant 0 : index
    %62 = vector.load %arg15[%c1_72, %c2_73, %c0_74] : memref<18x18x16xf32, #tpu.memory_space<vmem>>, vector<16x16x16xf32>
    %63 = vector.shape_cast %62 : vector<16x16x16xf32> to vector<256x16xf32>
    %64 = arith.truncf %63 : vector<256x16xf32> to vector<256x16xbf16>
    %c5 = arith.constant 5 : index
    %c0_75 = arith.constant 0 : index
    %c0_76 = arith.constant 0 : index
    %65 = vector.load %arg4[%c5, %c0_75, %c0_76] : memref<9x16x32xbf16, #tpu.memory_space<vmem>>, vector<1x16x32xbf16>
    %66 = vector.shape_cast %65 : vector<1x16x32xbf16> to vector<16x32xbf16>
    %cst_77 = arith.constant dense<0.000000e+00> : vector<256x32xf32>
    %67 = tpu.matmul %64, %66, %cst_77 {dimension_numbers = #tpu.dot_dimension_numbers<[1], [0], [0], [1], [0, 0, 1, 1], [], []>} : vector<256x16xbf16>, vector<16x32xbf16>, vector<256x32xf32> -> vector<256x32xf32>
    %68 = arith.addf %61, %67 : vector<256x32xf32>
    %c2_78 = arith.constant 2 : index
    %c0_79 = arith.constant 0 : index
    %c0_80 = arith.constant 0 : index
    %69 = vector.load %arg15[%c2_78, %c0_79, %c0_80] : memref<18x18x16xf32, #tpu.memory_space<vmem>>, vector<16x16x16xf32>
    %70 = vector.shape_cast %69 : vector<16x16x16xf32> to vector<256x16xf32>
    %71 = arith.truncf %70 : vector<256x16xf32> to vector<256x16xbf16>
    %c6 = arith.constant 6 : index
    %c0_81 = arith.constant 0 : index
    %c0_82 = arith.constant 0 : index
    %72 = vector.load %arg4[%c6, %c0_81, %c0_82] : memref<9x16x32xbf16, #tpu.memory_space<vmem>>, vector<1x16x32xbf16>
    %73 = vector.shape_cast %72 : vector<1x16x32xbf16> to vector<16x32xbf16>
    %cst_83 = arith.constant dense<0.000000e+00> : vector<256x32xf32>
    %74 = tpu.matmul %71, %73, %cst_83 {dimension_numbers = #tpu.dot_dimension_numbers<[1], [0], [0], [1], [0, 0, 1, 1], [], []>} : vector<256x16xbf16>, vector<16x32xbf16>, vector<256x32xf32> -> vector<256x32xf32>
    %75 = arith.addf %68, %74 : vector<256x32xf32>
    %c2_84 = arith.constant 2 : index
    %c1_85 = arith.constant 1 : index
    %c0_86 = arith.constant 0 : index
    %76 = vector.load %arg15[%c2_84, %c1_85, %c0_86] : memref<18x18x16xf32, #tpu.memory_space<vmem>>, vector<16x16x16xf32>
    %77 = vector.shape_cast %76 : vector<16x16x16xf32> to vector<256x16xf32>
    %78 = arith.truncf %77 : vector<256x16xf32> to vector<256x16xbf16>
    %c7 = arith.constant 7 : index
    %c0_87 = arith.constant 0 : index
    %c0_88 = arith.constant 0 : index
    %79 = vector.load %arg4[%c7, %c0_87, %c0_88] : memref<9x16x32xbf16, #tpu.memory_space<vmem>>, vector<1x16x32xbf16>
    %80 = vector.shape_cast %79 : vector<1x16x32xbf16> to vector<16x32xbf16>
    %cst_89 = arith.constant dense<0.000000e+00> : vector<256x32xf32>
    %81 = tpu.matmul %78, %80, %cst_89 {dimension_numbers = #tpu.dot_dimension_numbers<[1], [0], [0], [1], [0, 0, 1, 1], [], []>} : vector<256x16xbf16>, vector<16x32xbf16>, vector<256x32xf32> -> vector<256x32xf32>
    %82 = arith.addf %75, %81 : vector<256x32xf32>
    %c2_90 = arith.constant 2 : index
    %c2_91 = arith.constant 2 : index
    %c0_92 = arith.constant 0 : index
    %83 = vector.load %arg15[%c2_90, %c2_91, %c0_92] : memref<18x18x16xf32, #tpu.memory_space<vmem>>, vector<16x16x16xf32>
    %84 = vector.shape_cast %83 : vector<16x16x16xf32> to vector<256x16xf32>
    %85 = arith.truncf %84 : vector<256x16xf32> to vector<256x16xbf16>
    %c8 = arith.constant 8 : index
    %c0_93 = arith.constant 0 : index
    %c0_94 = arith.constant 0 : index
    %86 = vector.load %arg4[%c8, %c0_93, %c0_94] : memref<9x16x32xbf16, #tpu.memory_space<vmem>>, vector<1x16x32xbf16>
    %87 = vector.shape_cast %86 : vector<1x16x32xbf16> to vector<16x32xbf16>
    %cst_95 = arith.constant dense<0.000000e+00> : vector<256x32xf32>
    %88 = tpu.matmul %85, %87, %cst_95 {dimension_numbers = #tpu.dot_dimension_numbers<[1], [0], [0], [1], [0, 0, 1, 1], [], []>} : vector<256x16xbf16>, vector<16x32xbf16>, vector<256x32xf32> -> vector<256x32xf32>
    %89 = arith.addf %82, %88 : vector<256x32xf32>
    %cst_96 = arith.constant 0.000000e+00 : f32
    %90 = vector.broadcast %cst_96 : f32 to vector<256x32xf32>
    %91 = arith.cmpf ogt, %89, %90 : vector<256x32xf32>
    %c0_97 = arith.constant 0 : index
    %c0_98 = arith.constant 0 : index
    %92 = vector.load %arg5[%c0_97, %c0_98] : memref<1x32xf32, #tpu.memory_space<vmem>>, vector<1x32xf32>
    %93 = vector.broadcast %92 : vector<1x32xf32> to vector<256x32xf32>
    %94 = arith.mulf %89, %93 : vector<256x32xf32>
    %95 = arith.select %91, %89, %94 : vector<256x32xi1>, vector<256x32xf32>
    %96 = vector.shape_cast %95 : vector<256x32xf32> to vector<16x16x32xf32>
    %c1_99 = arith.constant 1 : index
    %c1_100 = arith.constant 1 : index
    %c0_101 = arith.constant 0 : index
    %97 = vector.load %arg16[%c1_99, %c1_100, %c0_101] : memref<18x18x32xf32, #tpu.memory_space<vmem>>, vector<16x16x32xf32>
    tpu.vector_store %arg16[%c1_99, %c1_100, %c0_101], %96 {strides = array<i32>} : memref<18x18x32xf32, #tpu.memory_space<vmem>>, vector<16x16x32xf32>,
    %cst_102 = arith.constant 0.000000e+00 : f32
    %98 = vector.broadcast %cst_102 : f32 to vector<64x32xf32>
    %c0_103 = arith.constant 0 : index
    %c0_104 = arith.constant 0 : index
    %c0_105 = arith.constant 0 : index
    %99 = tpu.strided_load %arg16[%c0_103, %c0_104, %c0_105] {strides = array<i32: 2, 2, 1>} : memref<18x18x32xf32, #tpu.memory_space<vmem>>, vector<8x8x32xf32>
    %100 = vector.shape_cast %99 : vector<8x8x32xf32> to vector<64x32xf32>
    %101 = arith.truncf %100 : vector<64x32xf32> to vector<64x32xbf16>
    %c0_106 = arith.constant 0 : index
    %c0_107 = arith.constant 0 : index
    %c0_108 = arith.constant 0 : index
    %102 = vector.load %arg6[%c0_106, %c0_107, %c0_108] : memref<9x32x32xbf16, #tpu.memory_space<vmem>>, vector<1x32x32xbf16>
    %103 = vector.shape_cast %102 : vector<1x32x32xbf16> to vector<32x32xbf16>
    %cst_109 = arith.constant dense<0.000000e+00> : vector<64x32xf32>
    %104 = tpu.matmul %101, %103, %cst_109 {dimension_numbers = #tpu.dot_dimension_numbers<[1], [0], [0], [1], [0, 0, 1, 1], [], []>} : vector<64x32xbf16>, vector<32x32xbf16>, vector<64x32xf32> -> vector<64x32xf32>
    %105 = arith.addf %98, %104 : vector<64x32xf32>
    %c0_110 = arith.constant 0 : index
    %c1_111 = arith.constant 1 : index
    %c0_112 = arith.constant 0 : index
    %106 = tpu.strided_load %arg16[%c0_110, %c1_111, %c0_112] {strides = array<i32: 2, 2, 1>} : memref<18x18x32xf32, #tpu.memory_space<vmem>>, vector<8x8x32xf32>
    %107 = vector.shape_cast %106 : vector<8x8x32xf32> to vector<64x32xf32>
    %108 = arith.truncf %107 : vector<64x32xf32> to vector<64x32xbf16>
    %c1_113 = arith.constant 1 : index
    %c0_114 = arith.constant 0 : index
    %c0_115 = arith.constant 0 : index
    %109 = vector.load %arg6[%c1_113, %c0_114, %c0_115] : memref<9x32x32xbf16, #tpu.memory_space<vmem>>, vector<1x32x32xbf16>
    %110 = vector.shape_cast %109 : vector<1x32x32xbf16> to vector<32x32xbf16>
    %cst_116 = arith.constant dense<0.000000e+00> : vector<64x32xf32>
    %111 = tpu.matmul %108, %110, %cst_116 {dimension_numbers = #tpu.dot_dimension_numbers<[1], [0], [0], [1], [0, 0, 1, 1], [], []>} : vector<64x32xbf16>, vector<32x32xbf16>, vector<64x32xf32> -> vector<64x32xf32>
    %112 = arith.addf %105, %111 : vector<64x32xf32>
    %c0_117 = arith.constant 0 : index
    %c2_118 = arith.constant 2 : index
    %c0_119 = arith.constant 0 : index
    %113 = tpu.strided_load %arg16[%c0_117, %c2_118, %c0_119] {strides = array<i32: 2, 2, 1>} : memref<18x18x32xf32, #tpu.memory_space<vmem>>, vector<8x8x32xf32>
    %114 = vector.shape_cast %113 : vector<8x8x32xf32> to vector<64x32xf32>
    %115 = arith.truncf %114 : vector<64x32xf32> to vector<64x32xbf16>
    %c2_120 = arith.constant 2 : index
    %c0_121 = arith.constant 0 : index
    %c0_122 = arith.constant 0 : index
    %116 = vector.load %arg6[%c2_120, %c0_121, %c0_122] : memref<9x32x32xbf16, #tpu.memory_space<vmem>>, vector<1x32x32xbf16>
    %117 = vector.shape_cast %116 : vector<1x32x32xbf16> to vector<32x32xbf16>
    %cst_123 = arith.constant dense<0.000000e+00> : vector<64x32xf32>
    %118 = tpu.matmul %115, %117, %cst_123 {dimension_numbers = #tpu.dot_dimension_numbers<[1], [0], [0], [1], [0, 0, 1, 1], [], []>} : vector<64x32xbf16>, vector<32x32xbf16>, vector<64x32xf32> -> vector<64x32xf32>
    %119 = arith.addf %112, %118 : vector<64x32xf32>
    %c1_124 = arith.constant 1 : index
    %c0_125 = arith.constant 0 : index
    %c0_126 = arith.constant 0 : index
    %120 = tpu.strided_load %arg16[%c1_124, %c0_125, %c0_126] {strides = array<i32: 2, 2, 1>} : memref<18x18x32xf32, #tpu.memory_space<vmem>>, vector<8x8x32xf32>
    %121 = vector.shape_cast %120 : vector<8x8x32xf32> to vector<64x32xf32>
    %122 = arith.truncf %121 : vector<64x32xf32> to vector<64x32xbf16>
    %c3_127 = arith.constant 3 : index
    %c0_128 = arith.constant 0 : index
    %c0_129 = arith.constant 0 : index
    %123 = vector.load %arg6[%c3_127, %c0_128, %c0_129] : memref<9x32x32xbf16, #tpu.memory_space<vmem>>, vector<1x32x32xbf16>
    %124 = vector.shape_cast %123 : vector<1x32x32xbf16> to vector<32x32xbf16>
    %cst_130 = arith.constant dense<0.000000e+00> : vector<64x32xf32>
    %125 = tpu.matmul %122, %124, %cst_130 {dimension_numbers = #tpu.dot_dimension_numbers<[1], [0], [0], [1], [0, 0, 1, 1], [], []>} : vector<64x32xbf16>, vector<32x32xbf16>, vector<64x32xf32> -> vector<64x32xf32>
    %126 = arith.addf %119, %125 : vector<64x32xf32>
    %c1_131 = arith.constant 1 : index
    %c1_132 = arith.constant 1 : index
    %c0_133 = arith.constant 0 : index
    %127 = tpu.strided_load %arg16[%c1_131, %c1_132, %c0_133] {strides = array<i32: 2, 2, 1>} : memref<18x18x32xf32, #tpu.memory_space<vmem>>, vector<8x8x32xf32>
    %128 = vector.shape_cast %127 : vector<8x8x32xf32> to vector<64x32xf32>
    %129 = arith.truncf %128 : vector<64x32xf32> to vector<64x32xbf16>
    %c4_134 = arith.constant 4 : index
    %c0_135 = arith.constant 0 : index
    %c0_136 = arith.constant 0 : index
    %130 = vector.load %arg6[%c4_134, %c0_135, %c0_136] : memref<9x32x32xbf16, #tpu.memory_space<vmem>>, vector<1x32x32xbf16>
    %131 = vector.shape_cast %130 : vector<1x32x32xbf16> to vector<32x32xbf16>
    %cst_137 = arith.constant dense<0.000000e+00> : vector<64x32xf32>
    %132 = tpu.matmul %129, %131, %cst_137 {dimension_numbers = #tpu.dot_dimension_numbers<[1], [0], [0], [1], [0, 0, 1, 1], [], []>} : vector<64x32xbf16>, vector<32x32xbf16>, vector<64x32xf32> -> vector<64x32xf32>
    %133 = arith.addf %126, %132 : vector<64x32xf32>
    %c1_138 = arith.constant 1 : index
    %c2_139 = arith.constant 2 : index
    %c0_140 = arith.constant 0 : index
    %134 = tpu.strided_load %arg16[%c1_138, %c2_139, %c0_140] {strides = array<i32: 2, 2, 1>} : memref<18x18x32xf32, #tpu.memory_space<vmem>>, vector<8x8x32xf32>
    %135 = vector.shape_cast %134 : vector<8x8x32xf32> to vector<64x32xf32>
    %136 = arith.truncf %135 : vector<64x32xf32> to vector<64x32xbf16>
    %c5_141 = arith.constant 5 : index
    %c0_142 = arith.constant 0 : index
    %c0_143 = arith.constant 0 : index
    %137 = vector.load %arg6[%c5_141, %c0_142, %c0_143] : memref<9x32x32xbf16, #tpu.memory_space<vmem>>, vector<1x32x32xbf16>
    %138 = vector.shape_cast %137 : vector<1x32x32xbf16> to vector<32x32xbf16>
    %cst_144 = arith.constant dense<0.000000e+00> : vector<64x32xf32>
    %139 = tpu.matmul %136, %138, %cst_144 {dimension_numbers = #tpu.dot_dimension_numbers<[1], [0], [0], [1], [0, 0, 1, 1], [], []>} : vector<64x32xbf16>, vector<32x32xbf16>, vector<64x32xf32> -> vector<64x32xf32>
    %140 = arith.addf %133, %139 : vector<64x32xf32>
    %c2_145 = arith.constant 2 : index
    %c0_146 = arith.constant 0 : index
    %c0_147 = arith.constant 0 : index
    %141 = tpu.strided_load %arg16[%c2_145, %c0_146, %c0_147] {strides = array<i32: 2, 2, 1>} : memref<18x18x32xf32, #tpu.memory_space<vmem>>, vector<8x8x32xf32>
    %142 = vector.shape_cast %141 : vector<8x8x32xf32> to vector<64x32xf32>
    %143 = arith.truncf %142 : vector<64x32xf32> to vector<64x32xbf16>
    %c6_148 = arith.constant 6 : index
    %c0_149 = arith.constant 0 : index
    %c0_150 = arith.constant 0 : index
    %144 = vector.load %arg6[%c6_148, %c0_149, %c0_150] : memref<9x32x32xbf16, #tpu.memory_space<vmem>>, vector<1x32x32xbf16>
    %145 = vector.shape_cast %144 : vector<1x32x32xbf16> to vector<32x32xbf16>
    %cst_151 = arith.constant dense<0.000000e+00> : vector<64x32xf32>
    %146 = tpu.matmul %143, %145, %cst_151 {dimension_numbers = #tpu.dot_dimension_numbers<[1], [0], [0], [1], [0, 0, 1, 1], [], []>} : vector<64x32xbf16>, vector<32x32xbf16>, vector<64x32xf32> -> vector<64x32xf32>
    %147 = arith.addf %140, %146 : vector<64x32xf32>
    %c2_152 = arith.constant 2 : index
    %c1_153 = arith.constant 1 : index
    %c0_154 = arith.constant 0 : index
    %148 = tpu.strided_load %arg16[%c2_152, %c1_153, %c0_154] {strides = array<i32: 2, 2, 1>} : memref<18x18x32xf32, #tpu.memory_space<vmem>>, vector<8x8x32xf32>
    %149 = vector.shape_cast %148 : vector<8x8x32xf32> to vector<64x32xf32>
    %150 = arith.truncf %149 : vector<64x32xf32> to vector<64x32xbf16>
    %c7_155 = arith.constant 7 : index
    %c0_156 = arith.constant 0 : index
    %c0_157 = arith.constant 0 : index
    %151 = vector.load %arg6[%c7_155, %c0_156, %c0_157] : memref<9x32x32xbf16, #tpu.memory_space<vmem>>, vector<1x32x32xbf16>
    %152 = vector.shape_cast %151 : vector<1x32x32xbf16> to vector<32x32xbf16>
    %cst_158 = arith.constant dense<0.000000e+00> : vector<64x32xf32>
    %153 = tpu.matmul %150, %152, %cst_158 {dimension_numbers = #tpu.dot_dimension_numbers<[1], [0], [0], [1], [0, 0, 1, 1], [], []>} : vector<64x32xbf16>, vector<32x32xbf16>, vector<64x32xf32> -> vector<64x32xf32>
    %154 = arith.addf %147, %153 : vector<64x32xf32>
    %c2_159 = arith.constant 2 : index
    %c2_160 = arith.constant 2 : index
    %c0_161 = arith.constant 0 : index
    %155 = tpu.strided_load %arg16[%c2_159, %c2_160, %c0_161] {strides = array<i32: 2, 2, 1>} : memref<18x18x32xf32, #tpu.memory_space<vmem>>, vector<8x8x32xf32>
    %156 = vector.shape_cast %155 : vector<8x8x32xf32> to vector<64x32xf32>
    %157 = arith.truncf %156 : vector<64x32xf32> to vector<64x32xbf16>
    %c8_162 = arith.constant 8 : index
    %c0_163 = arith.constant 0 : index
    %c0_164 = arith.constant 0 : index
    %158 = vector.load %arg6[%c8_162, %c0_163, %c0_164] : memref<9x32x32xbf16, #tpu.memory_space<vmem>>, vector<1x32x32xbf16>
    %159 = vector.shape_cast %158 : vector<1x32x32xbf16> to vector<32x32xbf16>
    %cst_165 = arith.constant dense<0.000000e+00> : vector<64x32xf32>
    %160 = tpu.matmul %157, %159, %cst_165 {dimension_numbers = #tpu.dot_dimension_numbers<[1], [0], [0], [1], [0, 0, 1, 1], [], []>} : vector<64x32xbf16>, vector<32x32xbf16>, vector<64x32xf32> -> vector<64x32xf32>
    %161 = arith.addf %154, %160 : vector<64x32xf32>
    %c0_166 = arith.constant 0 : index
    %c0_167 = arith.constant 0 : index
    %162 = vector.load %arg7[%c0_166, %c0_167] : memref<1x32xf32, #tpu.memory_space<vmem>>, vector<1x32xf32>
    %163 = vector.broadcast %162 : vector<1x32xf32> to vector<64x32xf32>
    %164 = arith.mulf %161, %163 : vector<64x32xf32>
    %c0_168 = arith.constant 0 : index
    %c0_169 = arith.constant 0 : index
    %165 = vector.load %arg8[%c0_168, %c0_169] : memref<1x32xf32, #tpu.memory_space<vmem>>, vector<1x32xf32>
    %166 = vector.broadcast %165 : vector<1x32xf32> to vector<64x32xf32>
    %167 = arith.addf %164, %166 : vector<64x32xf32>
    %cst_170 = arith.constant dense<0.000000e+00> : vector<32xf32>
    %168 = vector.multi_reduction <add>, %167, %cst_170 [0] : vector<64x32xf32> to vector<32xf32>
    %169 = vector.shape_cast %168 : vector<32xf32> to vector<1x32xf32>
    %cst_171 = arith.constant 6.400000e+01 : f32
    %170 = vector.broadcast %cst_171 : f32 to vector<1x32xf32>
    %171 = arith.divf %169, %170 : vector<1x32xf32>
    %c0_172 = arith.constant 0 : index
    %c0_173 = arith.constant 0 : index
    %172 = vector.load %arg9[%c0_172, %c0_173] : memref<32x2xf32, #tpu.memory_space<vmem>>, vector<32x2xf32>
    %cst_174 = arith.constant dense<0.000000e+00> : vector<1x2xf32>
    %173 = tpu.matmul %171, %172, %cst_174 {dimension_numbers = #tpu.dot_dimension_numbers<[1], [0], [0], [1], [0, 0, 1, 1], [], []>} : vector<1x32xf32>, vector<32x2xf32>, vector<1x2xf32> -> vector<1x2xf32>
    %cst_175 = arith.constant 0.000000e+00 : f32
    %174 = vector.broadcast %cst_175 : f32 to vector<1x2xf32>
    %175 = arith.maximumf %173, %174 : vector<1x2xf32>
    %c0_176 = arith.constant 0 : index
    %c0_177 = arith.constant 0 : index
    %176 = vector.load %arg10[%c0_176, %c0_177] : memref<2x32xf32, #tpu.memory_space<vmem>>, vector<2x32xf32>
    %cst_178 = arith.constant dense<0.000000e+00> : vector<1x32xf32>
    %177 = tpu.matmul %175, %176, %cst_178 {dimension_numbers = #tpu.dot_dimension_numbers<[1], [0], [0], [1], [0, 0, 1, 1], [], []>} : vector<1x2xf32>, vector<2x32xf32>, vector<1x32xf32> -> vector<1x32xf32>
    %cst_179 = arith.constant 0.000000e+00 : f32
    %178 = vector.broadcast %cst_179 : f32 to vector<1x32xf32>
    %179 = arith.subf %178, %177 : vector<1x32xf32>
    %180 = math.exp %179 : vector<1x32xf32>
    %cst_180 = arith.constant 1.000000e+00 : f32
    %181 = vector.broadcast %cst_180 : f32 to vector<1x32xf32>
    %182 = arith.addf %181, %180 : vector<1x32xf32>
    %cst_181 = arith.constant 1.000000e+00 : f32
    %183 = vector.broadcast %cst_181 : f32 to vector<1x32xf32>
    %184 = arith.divf %183, %182 : vector<1x32xf32>
    %185 = vector.broadcast %184 : vector<1x32xf32> to vector<64x32xf32>
    %186 = arith.mulf %167, %185 : vector<64x32xf32>
    %c0_182 = arith.constant 0 : index
    %c0_183 = arith.constant 0 : index
    %c0_184 = arith.constant 0 : index
    %c0_185 = arith.constant 0 : index
    %187 = tpu.strided_load %arg1[%c0_182, %c0_183, %c0_184, %c0_185] {strides = array<i32: 1, 2, 2, 1>} : memref<1x16x16x16xf32, #tpu.memory_space<vmem>>, vector<1x8x8x16xf32>
    %188 = vector.shape_cast %187 : vector<1x8x8x16xf32> to vector<64x16xf32>
    %189 = arith.truncf %188 : vector<64x16xf32> to vector<64x16xbf16>
    %c0_186 = arith.constant 0 : index
    %c0_187 = arith.constant 0 : index
    %190 = vector.load %arg11[%c0_186, %c0_187] : memref<16x32xbf16, #tpu.memory_space<vmem>>, vector<16x32xbf16>
    %cst_188 = arith.constant dense<0.000000e+00> : vector<64x32xf32>
    %191 = tpu.matmul %189, %190, %cst_188 {dimension_numbers = #tpu.dot_dimension_numbers<[1], [0], [0], [1], [0, 0, 1, 1], [], []>} : vector<64x16xbf16>, vector<16x32xbf16>, vector<64x32xf32> -> vector<64x32xf32>
    %c0_189 = arith.constant 0 : index
    %c0_190 = arith.constant 0 : index
    %192 = vector.load %arg12[%c0_189, %c0_190] : memref<1x32xf32, #tpu.memory_space<vmem>>, vector<1x32xf32>
    %193 = vector.broadcast %192 : vector<1x32xf32> to vector<64x32xf32>
    %194 = arith.mulf %191, %193 : vector<64x32xf32>
    %c0_191 = arith.constant 0 : index
    %c0_192 = arith.constant 0 : index
    %195 = vector.load %arg13[%c0_191, %c0_192] : memref<1x32xf32, #tpu.memory_space<vmem>>, vector<1x32xf32>
    %196 = vector.broadcast %195 : vector<1x32xf32> to vector<64x32xf32>
    %197 = arith.addf %194, %196 : vector<64x32xf32>
    %198 = arith.addf %186, %197 : vector<64x32xf32>
    %199 = vector.shape_cast %198 : vector<64x32xf32> to vector<8x8x32xf32>
    %200 = vector.extract_strided_slice %199 {offsets = [0, 0, 0], sizes = [8, 1, 32], strides = [1, 1, 1]} : vector<8x8x32xf32> to vector<8x1x32xf32>
    %201 = vector.shape_cast %200 : vector<8x1x32xf32> to vector<8x32xf32>
    %202 = vector.extract_strided_slice %199 {offsets = [0, 1, 0], sizes = [8, 1, 32], strides = [1, 1, 1]} : vector<8x8x32xf32> to vector<8x1x32xf32>
    %203 = vector.shape_cast %202 : vector<8x1x32xf32> to vector<8x32xf32>
    %204 = vector.extract_strided_slice %199 {offsets = [0, 2, 0], sizes = [8, 1, 32], strides = [1, 1, 1]} : vector<8x8x32xf32> to vector<8x1x32xf32>
    %205 = vector.shape_cast %204 : vector<8x1x32xf32> to vector<8x32xf32>
    %206 = vector.extract_strided_slice %199 {offsets = [0, 3, 0], sizes = [8, 1, 32], strides = [1, 1, 1]} : vector<8x8x32xf32> to vector<8x1x32xf32>
    %207 = vector.shape_cast %206 : vector<8x1x32xf32> to vector<8x32xf32>
    %208 = vector.extract_strided_slice %199 {offsets = [0, 4, 0], sizes = [8, 1, 32], strides = [1, 1, 1]} : vector<8x8x32xf32> to vector<8x1x32xf32>
    %209 = vector.shape_cast %208 : vector<8x1x32xf32> to vector<8x32xf32>
    %210 = vector.extract_strided_slice %199 {offsets = [0, 5, 0], sizes = [8, 1, 32], strides = [1, 1, 1]} : vector<8x8x32xf32> to vector<8x1x32xf32>
    %211 = vector.shape_cast %210 : vector<8x1x32xf32> to vector<8x32xf32>
    %212 = vector.extract_strided_slice %199 {offsets = [0, 6, 0], sizes = [8, 1, 32], strides = [1, 1, 1]} : vector<8x8x32xf32> to vector<8x1x32xf32>
    %213 = vector.shape_cast %212 : vector<8x1x32xf32> to vector<8x32xf32>
    %214 = vector.extract_strided_slice %199 {offsets = [0, 7, 0], sizes = [8, 1, 32], strides = [1, 1, 1]} : vector<8x8x32xf32> to vector<8x1x32xf32>
    %215 = vector.shape_cast %214 : vector<8x1x32xf32> to vector<8x32xf32>
    %216 = tpu.concatenate %201, %203, %205, %207, %209, %211, %213, %215 in 1 : vector<8x32xf32>, vector<8x32xf32>, vector<8x32xf32>, vector<8x32xf32>, vector<8x32xf32>, vector<8x32xf32>, vector<8x32xf32>, vector<8x32xf32> -> vector<8x256xf32>
    %217 = vector.shape_cast %216 : vector<8x256xf32> to vector<1x8x256xf32>
    %c0_193 = arith.constant 0 : index
    %c0_194 = arith.constant 0 : index
    %c0_195 = arith.constant 0 : index
    %218 = vector.load %arg14[%c0_193, %c0_194, %c0_195] : memref<1x8x256xf32, #tpu.memory_space<vmem>>, vector<1x8x256xf32>
    tpu.vector_store %arg14[%c0_193, %c0_194, %c0_195], %217 {strides = array<i32>} : memref<1x8x256xf32, #tpu.memory_space<vmem>>, vector<1x8x256xf32>,
    return
  }
  func.func @transform_0(%arg0: i32) -> (i32, i32, i32, i32) {
    %c0_i32 = arith.constant 0 : i32
    %c0_i32_0 = arith.constant 0 : i32
    %c0_i32_1 = arith.constant 0 : i32
    %c0_i32_2 = arith.constant 0 : i32
    return %arg0, %c0_i32, %c0_i32_0, %c0_i32_1 : i32, i32, i32, i32
  }
  func.func @transform_1(%arg0: i32) -> (i32, i32) {
    %c0_i32 = arith.constant 0 : i32
    %c0_i32_0 = arith.constant 0 : i32
    %c0_i32_1 = arith.constant 0 : i32
    return %c0_i32, %c0_i32_0 : i32, i32
  }
  func.func @transform_2(%arg0: i32) -> (i32, i32) {
    %c0_i32 = arith.constant 0 : i32
    %c0_i32_0 = arith.constant 0 : i32
    %c0_i32_1 = arith.constant 0 : i32
    return %c0_i32, %c0_i32_0 : i32, i32
  }
  func.func @transform_3(%arg0: i32) -> (i32, i32, i32) {
    %c0_i32 = arith.constant 0 : i32
    %c0_i32_0 = arith.constant 0 : i32
    %c0_i32_1 = arith.constant 0 : i32
    %c0_i32_2 = arith.constant 0 : i32
    return %c0_i32, %c0_i32_0, %c0_i32_1 : i32, i32, i32
  }
  func.func @transform_4(%arg0: i32) -> (i32, i32) {
    %c0_i32 = arith.constant 0 : i32
    %c0_i32_0 = arith.constant 0 : i32
    %c0_i32_1 = arith.constant 0 : i32
    return %c0_i32, %c0_i32_0 : i32, i32
  }
  func.func @transform_5(%arg0: i32) -> (i32, i32, i32) {
    %c0_i32 = arith.constant 0 : i32
    %c0_i32_0 = arith.constant 0 : i32
    %c0_i32_1 = arith.constant 0 : i32
    %c0_i32_2 = arith.constant 0 : i32
    return %c0_i32, %c0_i32_0, %c0_i32_1 : i32, i32, i32
  }
  func.func @transform_6(%arg0: i32) -> (i32, i32) {
    %c0_i32 = arith.constant 0 : i32
    %c0_i32_0 = arith.constant 0 : i32
    %c0_i32_1 = arith.constant 0 : i32
    return %c0_i32, %c0_i32_0 : i32, i32
  }
  func.func @transform_7(%arg0: i32) -> (i32, i32) {
    %c0_i32 = arith.constant 0 : i32
    %c0_i32_0 = arith.constant 0 : i32
    %c0_i32_1 = arith.constant 0 : i32
    return %c0_i32, %c0_i32_0 : i32, i32
  }
  func.func @transform_8(%arg0: i32) -> (i32, i32) {
    %c0_i32 = arith.constant 0 : i32
    %c0_i32_0 = arith.constant 0 : i32
    %c0_i32_1 = arith.constant 0 : i32
    return %c0_i32, %c0_i32_0 : i32, i32
  }
  func.func @transform_9(%arg0: i32) -> (i32, i32) {
    %c0_i32 = arith.constant 0 : i32
    %c0_i32_0 = arith.constant 0 : i32
    %c0_i32_1 = arith.constant 0 : i32
    return %c0_i32, %c0_i32_0 : i32, i32
  }
  func.func @transform_10(%arg0: i32) -> (i32, i32) {
    %c0_i32 = arith.constant 0 : i32
    %c0_i32_0 = arith.constant 0 : i32
    %c0_i32_1 = arith.constant 0 : i32
    return %c0_i32, %c0_i32_0 : i32, i32
  }
  func.func @transform_11(%arg0: i32) -> (i32, i32) {
    %c0_i32 = arith.constant 0 : i32
    %c0_i32_0 = arith.constant 0 : i32
    %c0_i32_1 = arith.constant 0 : i32
    return %c0_i32, %c0_i32_0 : i32, i32
  }
  func.func @transform_12(%arg0: i32) -> (i32, i32) {
    %c0_i32 = arith.constant 0 : i32
    %c0_i32_0 = arith.constant 0 : i32
    %c0_i32_1 = arith.constant 0 : i32
    return %c0_i32, %c0_i32_0 : i32, i32
  }
  func.func @transform_13(%arg0: i32) -> (i32, i32, i32) {
    %c0_i32 = arith.constant 0 : i32
    %c0_i32_0 = arith.constant 0 : i32
    %c0_i32_1 = arith.constant 0 : i32
    return %arg0, %c0_i32, %c0_i32_0 : i32, i32, i32
  }
}

</mosaic_0001>

<bundles_post_ra>
// kernel: tpu_custom_call.1
= control target key start
LH: loop header
LB: loop body
LE: loop exit
PB: predicated region body
PF: predicated region fallthrough
CT: control target
= control target key end

     0   :  { %s8141_s0 = inlined_call_operand.hbm [shape: f32[2,16,16,16], index: 0, kind: input, shape index: {}]   ;;  %s8142_s1 = inlined_call_operand.vmem [shape: f32[1,16], index: 1, kind: input, shape index: {}]   ;;  %s8143_s2 = inlined_call_operand.vmem [shape: f32[1,16], index: 2, kind: input, shape index: {}]   ;;  %s8144_s3 = inlined_call_operand.hbm [shape: bf16[9,16,32], index: 3, kind: input, shape index: {}]   ;;  %s8145_s4 = inlined_call_operand.vmem [shape: f32[1,32], index: 4, kind: input, shape index: {}]   ;;  %s8146_s5 = inlined_call_operand.hbm [shape: bf16[9,32,32], index: 5, kind: input, shape index: {}]   ;;  %s8147_s6 = inlined_call_operand.vmem [shape: f32[1,32], index: 6, kind: input, shape index: {}]   ;;  %s8148_s7 = inlined_call_operand.vmem [shape: f32[1,32], index: 7, kind: input, shape index: {}]   ;;  %s8149_s8 = inlined_call_operand.vmem [shape: f32[32,2], index: 8, kind: input, shape index: {}]   ;;  %s8150_s9 = inlined_call_operand.vmem [shape: f32[2,32], index: 9, kind: input, shape index: {}]   ;;  %s8151_s10 = inlined_call_operand.vmem [shape: bf16[16,32], index: 10, kind: input, shape index: {}]   ;;  %s8152_s11 = inlined_call_operand.vmem [shape: f32[1,32], index: 11, kind: input, shape index: {}]   ;;  %s8153_s12 = inlined_call_operand.vmem [shape: f32[1,32], index: 12, kind: input, shape index: {}]   ;;  %s8154_s13 = inlined_call_operand.hbm [shape: f32[2,8,256], index: 13, kind: output, shape index: {}]  }
   0x1   :  { %8161 = sst [smem:[#allocation16_spill]] %s8152_s11 }
   0x2   :  { %8162 = sst [smem:[#allocation17_spill]] %s8153_s12 }
   0x3   :  { %8163 = sst [smem:[#allocation18_spill]] %s8154_s13 }
   0x4   :  { %18 = vsyncpa [#allocation5], 0 }
   0x5   :  { %20 = vsyncpa [#allocation5 + $0x1], 0 }
   0x6   :  { %21 = vsyncpa [#allocation8], 0 }
   0x7   :  { %22 = vsyncpa [#allocation6], 0 }
   0x8   :  { %24 = vsyncpa [#allocation6 + $0x1], 0  ;;  %s6821_s25 = smov 0   ;;  %s6823_s26 = smov 0  }
   0x9   :  { %s6825_s27 = smov 0   ;;  %s6827_s28 = smov 0  }
   0xa LB: > { %8164 = sst [smem:[#allocation14_spill]] %s6723_s25  ;;  %s6842_s29 = sadd.s32 4294967295, %s6735_s28   ;;  %s6735_s28 = sphi %s6827_s28, %s8187_s28   ;;  %s6731_s27 = sphi %s6825_s27, %s8186_s27   ;;  %s6727_s26 = sphi %s6823_s26, %s8185_s26   ;;  %s6723_s25 = sphi %s6821_s25, %s8184_s25  }
   0xb   : > { %s5234_s30 = sadd.s32 4294967294, %s6735_s28   ;;  %p50_p0 = scmp.ne.s32.totalorder %s6727_s26, %s6723_s25 }
   0xc   : > { %p8157_p1 = scmp.eq.s32.totalorder %s6842_s29, 0  ;;  %p332_p3 = scmp.eq.s32.totalorder %s5234_s30, 1 }
   0xd   : > { %p5235_p5 = scmp.ge.s32.totalorder %s6735_s28, 1  ;;  %p339_p7 = scmp.lt.s32.totalorder %s6735_s28, 3 }
   0xe   : > { %p6851_p4 = por %p8157_p1, %p50_p0  ;;  %p6856_p6 = por %p332_p3, %p50_p0 }
   0xf   : > { %p6861_p8 = pnand %p5235_p5, %p339_p7  ;;  %s6737_s17 = smov [#allocation7]  }
  0x10   : > { %s8165_s14 = scalar_select %p6851_p4, 1, 0 }
  0x11   : > { %s8166_s15 = scalar_select %p6856_p6, 1, 0 }
  0x12   : > { %s357_s18 = sshll.u32 %s6737_s17, 4  ;;  %p6482_p9 = pneg %p6861_p8  ;;  %s6865_s18 = int_to_ptr.vmem [resolvable:$true] %s357_s18 }
  0x13   : > { %8167 = sst [smem:[#allocation15_spill]] %s8166_s15  ;;  %s6738_s20 = smov [#allocation9]  }
  0x14   : > { %p6872_p11 = pnand %p6482_p9, %p8157_p1  ;;  %s373_s21 = sshll.u32 %s6738_s20, 4  ;;  %s6876_s21 = int_to_ptr.vmem [resolvable:$true] %s373_s21 }
  0x15   : > { %s6579_s24 = scalar_lea.hbm %s8144_s3, 1152 }
  0x16   : > { %p6580_p12 = scmp.ne.s32.totalorder %s8144_s3, %s6579_s24  ;;  %p6581_p13 = pneg %p6872_p11 }
  0x17   : > { %p6586_p5 = scmp.lt.u32.totalorder %s6579_s24, %s8144_s3 }
  0x18   : > { %p6582_p0 = pnand %p6581_p13, %p6580_p12 }
  0x1a   : > { %p6583_p3 = pneg %p6582_p0 }
  0x1c   : > { %p6588_p7 = pnand %p6586_p5, %p6583_p3 }
  0x1e   : > { %6591 = shalt.err (!%p6588_p7)
}
  0x1f   : > { %s6592_s20 = scalar_lea.vmem %s6865_s18, 1152  ;;  %p6600_p2 = scmp.lt.s32.totalorder %s6865_s18, %s6865_s18 }
  0x20   : > { %p6593_p9 = scmp.ne.s32.totalorder %s6865_s18, %s6592_s20  ;;  %p6601_p12 = scmp.lt.s32.totalorder %s6592_s20, %s6592_s20 }
  0x22   : > { %p6595_p10 = pnand %p6593_p9, %p6581_p13  ;;  %p6602_p0 = por %p6601_p12, %p6600_p2 }
  0x24   : > { %p6596_p1 = pneg %p6595_p10 }
  0x26   : > { %p6603_p6 = pnand %p6602_p0, %p6596_p1 }
  0x28   : > { %6606 = shalt.err (!%p6603_p6)
}
  0x29   : > { %s6739_s25 = smov 64   ;;  %s6740_s15 = smov 4  }
  0x2a   : > { %6485 = dma.hbm_to_vmem [thread:$0]  (!%p6872_p11), %s8144_s3, 1152, %s6865_s18, [#allocation8], %s6739_s25, %s6739_s25, %s6740_s15  }
  0x2b   : > { %s6607_s17 = scalar_lea.hbm %s8146_s5, 2304 }
  0x2c   : > { %p6608_p2 = scmp.ne.s32.totalorder %s8146_s5, %s6607_s17  ;;  %p6614_p10 = scmp.lt.u32.totalorder %s6607_s17, %s8146_s5 }
  0x2e   : > { %p6610_p1 = pnand %p6608_p2, %p6581_p13 }
  0x30   : > { %p6611_p6 = pneg %p6610_p1 }
  0x32   : > { %p6616_p3 = pnand %p6614_p10, %p6611_p6 }
  0x34   : > { %6619 = shalt.err (!%p6616_p3)
}
  0x35   : > { %s6620_s18 = scalar_lea.vmem %s6876_s21, 2304  ;;  %p6628_p12 = scmp.lt.s32.totalorder %s6876_s21, %s6876_s21 }
  0x36   : > { %p6621_p5 = scmp.ne.s32.totalorder %s6876_s21, %s6620_s18  ;;  %p6629_p0 = scmp.lt.s32.totalorder %s6620_s18, %s6620_s18 }
  0x38   : > { %p6623_p7 = pnand %p6621_p5, %p6581_p13  ;;  %p6630_p2 = por %p6629_p0, %p6628_p12 }
  0x3a   : > { %p6624_p9 = pneg %p6623_p7 }
  0x3c   : > { %p6631_p1 = pnand %p6630_p2, %p6624_p9 }
  0x3e   : > { %6634 = shalt.err (!%p6631_p1)
}
  0x3f   : > { %6488 = dma.hbm_to_vmem [thread:$0]  (!%p6872_p11), %s8146_s5, 2304, %s6876_s21, [#allocation8], %s6739_s25, %s6739_s25, %s6740_s15  }
  0x40   : > { %s6931_s13 = sadd.s32 1, %s6735_s28   ;;  %s37_s19 = sadd.s32 1, %s6731_s27 }
  0x41   : > { %s34_s22 = ssub.s32 %s6735_s28, %s6931_s13  ;;  %p44_p13 = scmp.ne.s32.totalorder %s6731_s27, %s6727_s26 }
  0x42   : > { %p35_p6 = scmp.eq.s32.totalorder %s34_s22, 0  ;;  %p45_p10 = scmp.eq.s32.totalorder %s6735_s28, 0 }
  0x43   : > { %p8170_p3 = scmp.eq.s32.totalorder %s6842_s29, 1  ;;  %p6499_p7 = scmp.lt.s32.totalorder %s6735_s28, 2 }
  0x44   : > { %s6947_s24 = scalar_select %p35_p6, %s6731_s27, %s37_s19  }
  0x45   : > { %p6941_p5 = por %p8170_p3, %p44_p13  ;;  %p46_p9 = por %p45_p10, %p44_p13 }
  0x46   : > { %s408_s30 = sand.u32 1, %s6731_s27   ;;  %s5481_s21 = sshll.u32 %s6735_s28, 12 }
  0x47   : > { %s8171_s23 = scalar_select %p6941_p5, 1, 0 }
  0x48   : > { %s5239_s17 = sshll.u32 %s408_s30, 8  ;;  %s6954_s20 = scalar_lea.hbm %s8141_s0, %s5481_s21 }
  0x49   : > { %s412_s18 = scalar_lea.vmem [#allocation4], %s5239_s17  ;;  %p6958_p11 = pnand %p6499_p7, %p46_p9 }
  0x4a   : > { %s419_s11 = sshll.u32 %s412_s18, 4  ;;  %s6962_s19 = scalar_lea.sflag [#allocation5], %s408_s30  ;;  %s6956_s11 = int_to_ptr.vmem [resolvable:$true] %s419_s11 }
  0x4b   : > { %s6635_s22 = scalar_lea.hbm %s6954_s20, 4096  ;;  %p6637_p0 = pneg %p6958_p11 }
  0x4c   : > { %p6636_p12 = scmp.ne.s32.totalorder %s6954_s20, %s6635_s22  ;;  %s6640_s25 = scalar_lea.hbm %s8141_s0, 8192 }
  0x4d   : > { %p6641_p13 = scmp.lt.u32.totalorder %s6954_s20, %s8141_s0  ;;  %p6642_p6 = scmp.lt.u32.totalorder %s6640_s25, %s6635_s22 }
  0x4e   : > { %p6638_p2 = pnand %p6637_p0, %p6636_p12  ;;  %p6644_p3 = scmp.lt.u32.totalorder %s6635_s22, %s6954_s20 }
  0x4f   : > { %p6643_p10 = por %p6642_p6, %p6641_p13 }
  0x50   : > { %p6639_p1 = pneg %p6638_p2 }
  0x51   : > { %p6645_p7 = por %p6644_p3, %p6643_p10 }
  0x53   : > { %p6646_p9 = pnand %p6645_p7, %p6639_p1 }
  0x55   : > { %6649 = shalt.err (!%p6646_p9)
}
  0x56   : > { %s6650_s30 = scalar_lea.vmem %s6956_s11, 4096  ;;  %s6741_s17 = smov [#allocation4]  }
  0x57   : > { %p6651_p12 = scmp.ne.s32.totalorder %s6956_s11, %s6650_s30  ;;  %s6655_s21 = sshll.u32 %s6741_s17, 4  ;;  %s6656_s21 = int_to_ptr.vmem [resolvable:$false] %s6655_s21 }
  0x58   : > { %s6657_s15 = scalar_lea.vmem %s6656_s21, 8192  ;;  %p6658_p4 = scmp.lt.s32.totalorder %s6956_s11, %s6656_s21 }
  0x59   : > { %p6653_p2 = pnand %p6651_p12, %p6637_p0  ;;  %p6659_p13 = scmp.lt.s32.totalorder %s6657_s15, %s6650_s30 }
  0x5b   : > { %p6654_p5 = pneg %p6653_p2  ;;  %p6660_p6 = por %p6659_p13, %p6658_p4 }
  0x5d   : > { %p6661_p10 = pnand %p6660_p6, %p6654_p5 }
  0x5f   : > { %6664 = shalt.err (!%p6661_p10)
}
  0x60   : > { %s6742_s22 = smov 128   ;;  %s6743_s25 = smov 8  }
  0x61   : > { %6492 = dma.hbm_to_vmem [thread:$0]  (!%p6958_p11), %s6954_s20, 4096, %s6956_s11, %s6962_s19, %s6742_s22, %s6742_s22, %s6743_s25  }
  0x62   : > { %431 = sbr.rel (%p6861_p8) target bundleno = 1716 (0x6b4), region = 72  ;;  %s6993_s18 = sand.u32 (!%p6861_p8), 1, %s6727_s26  }
  0x63   : > { %s5243_s30 = sshll.u32 (!%p6861_p8), %s6993_s18, 8  ;;  %s434_s17 = scalar_lea.sflag (!%p6861_p8), [#allocation5], %s6993_s18 }
  0x64   : > { %s6997_s21 = scalar_lea.vmem (!%p6861_p8), [#allocation4], %s5243_s30  ;;  %p8173_p4 = scmp.ne.s32.totalorder (!%p6861_p8), %s8165_s14, 0 }
  0x69   : > { %6710 = dma.done.wait (%p8173_p4), %s434_s17, 4096  }
  0x6a   : > { %6712 = vsyncadd (%p8173_p4), %s434_s17, 4294963200  ;;  %p8174_p5 = scmp.eq.s32.totalorder %s6842_s29, 0 }
  0x6c   : > { %6714 = dma.done.wait (%p8174_p5), [#allocation8], 3456   ;;  %p8175_p8 = pmov %p8174_p5 }
  0x6d   : > { %vm535_vm0 = vcmask 261120   ;;  %vm489_vm1 = vcmask 130048   ;;  %vm498_vm2 = vcmask 122880   ;;  %v6744_v0 = vmov 0.0   ;;  %v7093_v1 = vld [vmem:[#allocation7 + $0x18] sm:$0xff]   ;;  %v581_v2 = vld [vmem:[%s6997_s21] sm:$0xff] }
  0x6e   : > { %6716 = vsyncadd (%p8175_p8), [#allocation8], 4294963840  ;;  %536 = vst.msk [vmem:[#allocation3] sm:$0xff] %vm535_vm0, %v6744_v0  ;;  %vm492_vm3 = vcmask 123904   ;;  %v582_v3 = vld [vmem:[%s6997_s21 + $0x8] sm:$0xff]  ;;  %5804 = vmatprep.subr.bf16.mxu0 %v7093_v1  ;;  %v7111_v8 = vld [vmem:[#allocation7 + $0x20] sm:$0xff]  }
  0x6f   : > { %537 = vst.msk [vmem:[#allocation3 + $0x8] sm:$0xff] %vm535_vm0, %v6744_v0  ;;  %v7100_v4 = vld [vmem:[%s8142_s1] ss:$0 sm:$0xff]  ;;  %5805 = vmatpush3.bf16.msra.mxu0 %v7093_v1  ;;  %v583_v9 = vld [vmem:[%s6997_s21 + $0x10] sm:$0xff]  ;;  %v584_v10 = vld [vmem:[%s6997_s21 + $0x18] sm:$0xff]  ;;  %vm544_vm4 = vcmask 253952  }
  0x70   : > { %500 = vst.msk [vmem:[#allocation2 + $0x18] sm:$0x1] %vm498_vm2, %v6744_v0  ;;  %501 = vst.msk [vmem:[#allocation2 + $0x30] sm:$0x1] %vm498_vm2, %v6744_v0  ;;  %v620_v5 = vmul.f32 %v7100_v4, %v581_v2  ;;  %v621_v6 = vmul.f32 %v7100_v4, %v582_v3  ;;  %v7108_v7 = vld [vmem:[%s8143_s2] ss:$0 sm:$0xff]  ;;  %v622_v13 = vmul.f32 %v7100_v4, %v583_v9  ;;  %5838 = vmatprep.subr.bf16.mxu0 %v7111_v8 }
  0x71   : > { %490 = vst.msk [vmem:[#allocation2] sm:$0xff] %vm489_vm1, %v6744_v0  ;;  %491 = vst.msk [vmem:[#allocation2 + $0x8] sm:$0xff] %vm489_vm1, %v6744_v0  ;;  %v623_v14 = vmul.f32 %v7100_v4, %v584_v10  ;;  %v585_v15 = vld [vmem:[%s6997_s21 + $0x20] sm:$0xff]  ;;  %v586_v16 = vld [vmem:[%s6997_s21 + $0x28] sm:$0xff]  ;;  %vm538_vm5 = vcmask 254976   ;;  %s8176_s16 = sld [smem:[#allocation16_spill]] }
  0x72   : > { %495 = vst.msk [vmem:[#allocation2 + $0x198] sm:$0xff] %vm489_vm1, %v6744_v0  ;;  %496 = vst.msk [vmem:[#allocation2 + $0x1a0] sm:$0xff] %vm489_vm1, %v6744_v0  ;;  %v659_v11 = vadd.f32 %v7108_v7, %v620_v5  ;;  %v660_v12 = vadd.f32 %v7108_v7, %v621_v6  ;;  %v587_v17 = vld [vmem:[%s6997_s21 + $0x30] sm:$0xff]  ;;  %v624_v18 = vmul.f32 %v7100_v4, %v585_v15  ;;  %v588_v20 = vld [vmem:[%s6997_s21 + $0x38] sm:$0xff]  ;;  %s8177_s12 = sld [smem:[#allocation17_spill]]  ;;  %s6747_s19 = smov 64  }
  0x73   : > { %502 = vst.msk [vmem:[#allocation2 + $0x48] sm:$0x1] %vm498_vm2, %v6744_v0  ;;  %503 = vst.msk [vmem:[#allocation2 + $0x60] sm:$0x1] %vm498_vm2, %v6744_v0  ;;  %v625_v19 = vmul.f32 %v7100_v4, %v586_v16  ;;  %v626_v21 = vmul.f32 %v7100_v4, %v587_v17  ;;  %v589_v22 = vld [vmem:[%s6997_s21 + $0x40] sm:$0xff]  ;;  %v590_v23 = vld [vmem:[%s6997_s21 + $0x48] sm:$0xff]  ;;  %v661_v24 = vadd.f32 %v7108_v7, %v622_v13 }
  0x74   : > { %504 = vst.msk [vmem:[#allocation2 + $0x78] sm:$0x1] %vm498_vm2, %v6744_v0  ;;  %505 = vst.msk [vmem:[#allocation2 + $0x90] sm:$0x1] %vm498_vm2, %v6744_v0  ;;  %v662_v25 = vadd.f32 %v7108_v7, %v623_v14  ;;  %v627_v26 = vmul.f32 %v7100_v4, %v588_v20  ;;  %v628_v27 = vmul.f32 %v7100_v4, %v589_v22  ;;  %v591_v28 = vld [vmem:[%s6997_s21 + $0x50] sm:$0xff]  ;;  %v592_v29 = vld [vmem:[%s6997_s21 + $0x58] sm:$0xff] }
  0x75   : > { %506 = vst.msk [vmem:[#allocation2 + $0xa8] sm:$0x1] %vm498_vm2, %v6744_v0  ;;  %507 = vst.msk [vmem:[#allocation2 + $0xc0] sm:$0x1] %vm498_vm2, %v6744_v0  ;;  %v593_v30 = vld [vmem:[%s6997_s21 + $0x60] sm:$0xff]  ;;  %v663_v31 = vadd.f32 %v7108_v7, %v624_v18  ;;  %v664_v32 = vadd.f32 %v7108_v7, %v625_v19  ;;  %v665_v33 = vadd.f32 %v7108_v7, %v626_v21  ;;  %v594_v35 = vld [vmem:[%s6997_s21 + $0x68] sm:$0xff] }
  0x76   : > { %508 = vst.msk [vmem:[#allocation2 + $0xd8] sm:$0x1] %vm498_vm2, %v6744_v0  ;;  %509 = vst.msk [vmem:[#allocation2 + $0xf0] sm:$0x1] %vm498_vm2, %v6744_v0  ;;  %v629_v34 = vmul.f32 %v7100_v4, %v590_v23  ;;  %v595_v36 = vld [vmem:[%s6997_s21 + $0x70] sm:$0xff]  ;;  %v596_v37 = vld [vmem:[%s6997_s21 + $0x78] sm:$0xff]  ;;  %v666_v38 = vadd.f32 %v7108_v7, %v627_v26  ;;  %v667_v39 = vadd.f32 %v7108_v7, %v628_v27 }
  0x77   : > { %510 = vst.msk [vmem:[#allocation2 + $0x108] sm:$0x1] %vm498_vm2, %v6744_v0  ;;  %511 = vst.msk [vmem:[#allocation2 + $0x120] sm:$0x1] %vm498_vm2, %v6744_v0  ;;  %v630_v40 = vmul.f32 %v7100_v4, %v591_v28  ;;  %v631_v41 = vmul.f32 %v7100_v4, %v592_v29  ;;  %v597_v42 = vld [vmem:[%s6997_s21 + $0x80] sm:$0xff]  ;;  %v598_v43 = vld [vmem:[%s6997_s21 + $0x88] sm:$0xff]  ;;  %v632_v46 = vmul.f32 %v7100_v4, %v593_v30 }
  0x78   : > { %512 = vst.msk [vmem:[#allocation2 + $0x138] sm:$0x1] %vm498_vm2, %v6744_v0  ;;  %513 = vst.msk [vmem:[#allocation2 + $0x150] sm:$0x1] %vm498_vm2, %v6744_v0  ;;  %v599_v44 = vld [vmem:[%s6997_s21 + $0x90] sm:$0xff]  ;;  %v668_v45 = vadd.f32 %v7108_v7, %v629_v34  ;;  %v633_v47 = vmul.f32 %v7100_v4, %v594_v35  ;;  %v634_v48 = vmul.f32 %v7100_v4, %v595_v36  ;;  %v600_v49 = vld [vmem:[%s6997_s21 + $0x98] sm:$0xff] }
  0x79   : > { %514 = vst.msk [vmem:[#allocation2 + $0x168] sm:$0x1] %vm498_vm2, %v6744_v0  ;;  %515 = vst.msk [vmem:[#allocation2 + $0x180] sm:$0x1] %vm498_vm2, %v6744_v0  ;;  %v669_v50 = vadd.f32 %v7108_v7, %v630_v40  ;;  %v670_v51 = vadd.f32 %v7108_v7, %v631_v41  ;;  %v635_v52 = vmul.f32 %v7100_v4, %v596_v37  ;;  %v6549_v54 = vld [vmem:[#allocation7 + $0x8] sm:$0xff]   ;;  %v601_v55 = vld [vmem:[%s6997_s21 + $0xa0] sm:$0xff] }
  0x7a   : > { %518 = vst.msk [vmem:[#allocation2 + $0x29] sm:$0x1] %vm498_vm2, %v6744_v0  ;;  %519 = vst.msk [vmem:[#allocation2 + $0x41] sm:$0x1] %vm498_vm2, %v6744_v0  ;;  %v636_v53 = vmul.f32 %v7100_v4, %v597_v42  ;;  %v602_v56 = vld [vmem:[%s6997_s21 + $0xa8] sm:$0xff]  ;;  %v671_v57 = vadd.f32 %v7108_v7, %v632_v46  ;;  %v672_v58 = vadd.f32 %v7108_v7, %v633_v47  ;;  %v603_v63 = vld [vmem:[%s6997_s21 + $0xb0] sm:$0xff]  ;;  %5702 = vmatprep.subr.bf16.mxu1 %v6549_v54 }
  0x7b   : > { %520 = vst.msk [vmem:[#allocation2 + $0x59] sm:$0x1] %vm498_vm2, %v6744_v0  ;;  %521 = vst.msk [vmem:[#allocation2 + $0x71] sm:$0x1] %vm498_vm2, %v6744_v0  ;;  %v673_v59 = vadd.f32 %v7108_v7, %v634_v48  ;;  %v637_v60 = vmul.f32 %v7100_v4, %v598_v43  ;;  %v774_v61 = vld [vmem:[#allocation2 + $0x1] sm:$0xff]  ;;  %v674_v2 = vadd.f32 %v7108_v7, %v635_v52  ;;  %v604_v9 = vld [vmem:[%s6997_s21 + $0xb8] sm:$0xff]  ;;  %5703 = vmatpush3.bf16.msra.mxu1 %v6549_v54 }
  0x7c   : > { %522 = vst.msk [vmem:[#allocation2 + $0x89] sm:$0x1] %vm498_vm2, %v6744_v0  ;;  %523 = vst.msk [vmem:[#allocation2 + $0xa1] sm:$0x1] %vm498_vm2, %v6744_v0  ;;  %v675_v3 = vadd.f32 %v7108_v7, %v636_v53  ;;  %v638_v5 = vmul.f32 %v7100_v4, %v599_v44  ;;  %v639_v6 = vmul.f32 %v7100_v4, %v600_v49  ;;  %v605_v10 = vld [vmem:[%s6997_s21 + $0xc0] sm:$0xff]  ;;  %s6748_s15 = smov 32  }
  0x7d   : > { %524 = vst.msk [vmem:[#allocation2 + $0xb9] sm:$0x1] %vm498_vm2, %v6744_v0  ;;  %525 = vst.msk [vmem:[#allocation2 + $0xd1] sm:$0x1] %vm498_vm2, %v6744_v0  ;;  %v676_v14 = vadd.f32 %v7108_v7, %v637_v60  ;;  %v640_v15 = vmul.f32 %v7100_v4, %v601_v55  ;;  %v641_v16 = vmul.f32 %v7100_v4, %v602_v56  ;;  %v7248_v56 = vld [vmem:[#allocation7 + $0x28] sm:$0xff]   ;;  %s6749_s22 = smov 96  }
  0x7e   : > { %526 = vst.msk [vmem:[#allocation2 + $0xe9] sm:$0x1] %vm498_vm2, %v6744_v0  ;;  %527 = vst.msk [vmem:[#allocation2 + $0x101] sm:$0x1] %vm498_vm2, %v6744_v0  ;;  %v677_v20 = vadd.f32 %v7108_v7, %v638_v5  ;;  %v678_v21 = vadd.f32 %v7108_v7, %v639_v6  ;;  %v642_v22 = vmul.f32 %v7100_v4, %v603_v63  ;;  %s5246_s25 = sshll.u32 %s6993_s18, 4  ;;  %s8178_s20 = sld [smem:[#allocation18_spill]] }
  0x7f   : > { %528 = vst.msk [vmem:[#allocation2 + $0x119] sm:$0x1] %vm498_vm2, %v6744_v0  ;;  %529 = vst.msk [vmem:[#allocation2 + $0x131] sm:$0x1] %vm498_vm2, %v6744_v0  ;;  %v679_v28 = vadd.f32 %v7108_v7, %v640_v15  ;;  %v680_v29 = vadd.f32 %v7108_v7, %v641_v16  ;;  %v643_v30 = vmul.f32 %v7100_v4, %v604_v9  ;;  %s487_s30 = scalar_lea.vmem [#allocation10], %s5246_s25  ;;  %p8179_p0 = scmp.ne.s32.totalorder %s8171_s23, 0 }
  0x80   : > { %530 = vst.msk [vmem:[#allocation2 + $0x149] sm:$0x1] %vm498_vm2, %v6744_v0  ;;  %531 = vst.msk [vmem:[#allocation2 + $0x161] sm:$0x1] %vm498_vm2, %v6744_v0  ;;  %v681_v36 = vadd.f32 %v7108_v7, %v642_v22  ;;  %v644_v37 = vmul.f32 %v7100_v4, %v605_v10  ;;  %s5099_s17 = sshll.u32 %s487_s30, 4  ;;  %s8099_s17 = int_to_ptr.vmem [resolvable:$true] %s5099_s17 }
  0x81   : > { %532 = vst.msk [vmem:[#allocation2 + $0x179] sm:$0x1] %vm498_vm2, %v6744_v0  ;;  %533 = vst.msk [vmem:[#allocation2 + $0x191] sm:$0x1] %vm498_vm2, %v6744_v0  ;;  %v682_v40 = vadd.f32 %v7108_v7, %v643_v30 }
  0x82   : > { %499 = vst.msk [vmem:[#allocation2] sm:$0x1] %vm498_vm2, %v6744_v0  ;;  %516 = vst.msk [vmem:[#allocation2 + $0x198] sm:$0x1] %vm498_vm2, %v6744_v0  ;;  %v683_v44 = vadd.f32 %v7108_v7, %v644_v37 }
  0x83   : > { %493 = vst.msk [vmem:[#allocation2 + $0x10] sm:$0x3] %vm492_vm3, %v6744_v0  ;;  %497 = vst.msk [vmem:[#allocation2 + $0x1a8] sm:$0x3] %vm492_vm3, %v6744_v0 }
  0x84   : > { %517 = vst.msk [vmem:[#allocation2 + $0x11] sm:$0x1] %vm498_vm2, %v6744_v0  ;;  %534 = vst.msk [vmem:[#allocation2 + $0x1a9] sm:$0x1] %vm498_vm2, %v6744_v0 }
  0x85   : > { %692 = vst.msk [vmem:[#allocation2 + $0x19] sm:$0xff] %vm489_vm1, %v659_v11  ;;  %693 = vst.msk [vmem:[#allocation2 + $0x21] sm:$0xff] %vm489_vm1, %v660_v12  ;;  %v606_v11 = vld [vmem:[%s6997_s21 + $0xc8] sm:$0xff] }
  0x86   : > { %694 = vst.msk [vmem:[#allocation2 + $0x31] sm:$0xff] %vm489_vm1, %v661_v24  ;;  %695 = vst.msk [vmem:[#allocation2 + $0x39] sm:$0xff] %vm489_vm1, %v662_v25  ;;  %v607_v24 = vld [vmem:[%s6997_s21 + $0xd0] sm:$0xff]  ;;  %v608_v25 = vld [vmem:[%s6997_s21 + $0xd8] sm:$0xff] }
  0x87   : > { %696 = vst.msk [vmem:[#allocation2 + $0x49] sm:$0xff] %vm489_vm1, %v663_v31  ;;  %697 = vst.msk [vmem:[#allocation2 + $0x51] sm:$0xff] %vm489_vm1, %v664_v32  ;;  %v646_v42 = vmul.f32 %v7100_v4, %v607_v24  ;;  %v647_v43 = vmul.f32 %v7100_v4, %v608_v25 }
  0x88   : > { %698 = vst.msk [vmem:[#allocation2 + $0x61] sm:$0xff] %vm489_vm1, %v665_v33  ;;  %699 = vst.msk [vmem:[#allocation2 + $0x69] sm:$0xff] %vm489_vm1, %v666_v38  ;;  %v645_v38 = vmul.f32 %v7100_v4, %v606_v11 }
  0x89   : > { %700 = vst.msk [vmem:[#allocation2 + $0x79] sm:$0xff] %vm489_vm1, %v667_v39  ;;  %701 = vst.msk [vmem:[#allocation2 + $0x81] sm:$0xff] %vm489_vm1, %v668_v45  ;;  %v686_v52 = vadd.f32 %v7108_v7, %v647_v43 }
  0x8a   : > { %v775_v62 = vld [vmem:[#allocation2 + $0x9] sm:$0xff]  ;;  %702 = vst.msk [vmem:[#allocation2 + $0x91] sm:$0xff] %vm489_vm1, %v669_v50  ;;  %703 = vst.msk [vmem:[#allocation2 + $0x99] sm:$0xff] %vm489_vm1, %v670_v51  ;;  %v684_v45 = vadd.f32 %v7108_v7, %v645_v38  ;;  %v685_v51 = vadd.f32 %v7108_v7, %v646_v42 }
  0x8b   : > { %704 = vst.msk [vmem:[#allocation2 + $0xa9] sm:$0xff] %vm489_vm1, %v671_v57  ;;  %705 = vst.msk [vmem:[#allocation2 + $0xb1] sm:$0xff] %vm489_vm1, %v672_v58  ;;  %v806_v17 = vpack.c.bf16 %v775_v62, %v774_v61 }
  0x8c   : > { %v1553_v12 = vld [vmem:[#allocation2 + $0x18] sm:$0xff]  ;;  %v1554_v13 = vld [vmem:[#allocation2 + $0x20] sm:$0xff]  ;;  %706 = vst.msk [vmem:[#allocation2 + $0xc1] sm:$0xff] %vm489_vm1, %v673_v59  ;;  %707 = vst.msk [vmem:[#allocation2 + $0xc9] sm:$0xff] %vm489_vm1, %v674_v2 }
  0x8d   : > { %v776_v18 = vld [vmem:[#allocation2 + $0x19] sm:$0xff]  ;;  %v7191_v19 = vpack.c.bf16 %v1554_v13, %v1553_v12  ;;  %708 = vst.msk [vmem:[#allocation2 + $0xd9] sm:$0xff] %vm489_vm1, %v675_v3  ;;  %v777_v23 = vld [vmem:[#allocation2 + $0x21] sm:$0xff]  ;;  %v1555_v26 = vld [vmem:[#allocation2 + $0x30] sm:$0xff]  ;;  %5704 = vmatprep.mubr.msk.bf16.mxu1 %vm489_vm1, %v806_v17 }
  0x8e   : > { %v1556_v27 = vld [vmem:[#allocation2 + $0x38] sm:$0xff]  ;;  %709 = vst.msk [vmem:[#allocation2 + $0xe1] sm:$0xff] %vm489_vm1, %v676_v14  ;;  %v7205_v31 = vpack.c.bf16 %v777_v23, %v776_v18  ;;  %v1557_v34 = vld [vmem:[#allocation2 + $0x48] sm:$0xff]  ;;  %v1558_v35 = vld [vmem:[#allocation2 + $0x50] sm:$0xff] }
  0x8f   : > { %v778_v32 = vld [vmem:[#allocation2 + $0x31] sm:$0xff]  ;;  %5806 = vmatprep.mubr.msk.bf16.mxu0 %vm489_vm1, %v7191_v19  ;;  %v7209_v33 = vpack.c.bf16 %v1556_v27, %v1555_v26  ;;  %710 = vst.msk [vmem:[#allocation2 + $0xf1] sm:$0xff] %vm489_vm1, %v677_v20  ;;  %711 = vst.msk [vmem:[#allocation2 + $0xf9] sm:$0xff] %vm489_vm1, %v678_v21  ;;  %v7216_v39 = vpack.c.bf16 %v1558_v35, %v1557_v34  ;;  %v779_v41 = vld [vmem:[#allocation2 + $0x39] sm:$0xff] }
  0x90   : > { %712 = vst.msk [vmem:[#allocation2 + $0x109] sm:$0xff] %vm489_vm1, %v679_v28  ;;  %713 = vst.msk [vmem:[#allocation2 + $0x111] sm:$0xff] %vm489_vm1, %v680_v29  ;;  %5705 = vmatmul.mubr.msk.bf16.vlgmr.msra.gmra.mrb[0].mxu1 %vm489_vm1, %v7205_v31  ;;  %v7230_v46 = vpack.c.bf16 %v779_v41, %v778_v32  ;;  %v780_v47 = vld [vmem:[#allocation2 + $0x49] sm:$0xff]  ;;  %v781_v48 = vld [vmem:[#allocation2 + $0x51] sm:$0xff] }
  0x91   : > { %5807 = vmatmul.mubr.msk.bf16.vlgmr.msra.gmra.mrb[0].mxu0 %vm489_vm1, %v7209_v33  ;;  %714 = vst.msk [vmem:[#allocation2 + $0x121] sm:$0xff] %vm489_vm1, %v681_v36  ;;  %v1559_v49 = vld [vmem:[#allocation2 + $0x60] sm:$0xff]  ;;  %v1560_v50 = vld [vmem:[#allocation2 + $0x68] sm:$0xff]  ;;  %715 = vst.msk [vmem:[#allocation2 + $0x129] sm:$0xff] %vm489_vm1, %v682_v40 }
  0x92   : > { %5839 = vmatpush3.bf16.msra.mxu0 %v7111_v8  ;;  %5810 = vmatprep.mubr.msk.bf16.mxu0 %vm489_vm1, %v7216_v39  ;;  %v1561_v53 = vld [vmem:[#allocation2 + $0x78] sm:$0xff]  ;;  %v1562_v54 = vld [vmem:[#allocation2 + $0x80] sm:$0xff]  ;;  %716 = vst.msk [vmem:[#allocation2 + $0x139] sm:$0xff] %vm489_vm1, %v683_v44  ;;  %717 = vst.msk [vmem:[#allocation2 + $0x141] sm:$0xff] %vm489_vm1, %v684_v45  ;;  %v7244_v8 = vpack.c.bf16 %v781_v48, %v780_v47  ;;  %v7246_v55 = vpack.c.bf16 %v1560_v50, %v1559_v49 }
  0x93   : > { %5708 = vmatprep.mubr.msk.bf16.mxu1 %vm489_vm1, %v7230_v46  ;;  %718 = vst.msk [vmem:[#allocation2 + $0x151] sm:$0xff] %vm489_vm1, %v685_v51  ;;  %719 = vst.msk [vmem:[#allocation2 + $0x159] sm:$0xff] %vm489_vm1, %v686_v52  ;;  %v782_v57 = vld [vmem:[#allocation2 + $0x61] sm:$0xff]  ;;  %v7250_v58 = vpack.c.bf16 %v1562_v54, %v1561_v53  ;;  %v783_v59 = vld [vmem:[#allocation2 + $0x69] sm:$0xff]  ;;  %5872 = vmatprep.subr.bf16.mxu0 %v7248_v56 }
  0x94   : > { %v7253_v60 = vpack.c.bf16 %v783_v59, %v782_v57  ;;  %v1563_v61 = vld [vmem:[#allocation2 + $0x90] sm:$0xff]  ;;  %v784_v62 = vld [vmem:[#allocation2 + $0x79] sm:$0xff]  ;;  %v785_v63 = vld [vmem:[#allocation2 + $0x81] sm:$0xff]  ;;  %545 = vst.msk [vmem:[#allocation3] sm:$0x1] %vm544_vm4, %v6744_v0 }
  0x95   : > { %v1564_v2 = vld [vmem:[#allocation2 + $0x98] sm:$0xff]  ;;  %v1565_v6 = vld [vmem:[#allocation2 + $0xa8] sm:$0xff]  ;;  %v1566_v9 = vld [vmem:[#allocation2 + $0xb0] sm:$0xff]  ;;  %v7263_v10 = vpack.c.bf16 %v785_v63, %v784_v62  ;;  %547 = vst.msk [vmem:[#allocation3 + $0x30] sm:$0x1] %vm544_vm4, %v6744_v0 }
  0x96   : > { %v786_v3 = vld [vmem:[#allocation2 + $0x91] sm:$0xff]  ;;  %v787_v5 = vld [vmem:[#allocation2 + $0x99] sm:$0xff]  ;;  %v7265_v11 = vpack.c.bf16 %v1564_v2, %v1563_v61  ;;  %v7269_v13 = vpack.c.bf16 %v1566_v9, %v1565_v6  ;;  %v788_v14 = vld [vmem:[#allocation2 + $0xa9] sm:$0xff]  ;;  %546 = vst.msk [vmem:[#allocation3 + $0x18] sm:$0x1] %vm544_vm4, %v6744_v0 }
  0x97   : > { %v7267_v12 = vpack.c.bf16 %v787_v5, %v786_v3  ;;  %v1567_v15 = vld [vmem:[#allocation2 + $0xc0] sm:$0xff]  ;;  %v1568_v16 = vld [vmem:[#allocation2 + $0xc8] sm:$0xff]  ;;  %v789_v17 = vld [vmem:[#allocation2 + $0xb1] sm:$0xff]  ;;  %548 = vst.msk [vmem:[#allocation3 + $0x48] sm:$0x1] %vm544_vm4, %v6744_v0 }
  0x98   : > { %5709 = vmatmul.mubr.msk.bf16.gmra.mrb[4].mxu1 %vm489_vm1, %v7244_v8  ;;  %v609_v18 = vld [vmem:[%s6997_s21 + $0xe0] sm:$0xff]  ;;  %v610_v20 = vld [vmem:[%s6997_s21 + $0xe8] sm:$0xff]  ;;  %v611_v26 = vld [vmem:[%s6997_s21 + $0xf0] sm:$0xff]  ;;  %v7288_v35 = vpack.c.bf16 %v789_v17, %v788_v14  ;;  %v7291_v37 = vpack.c.bf16 %v1568_v16, %v1567_v15  ;;  %549 = vst.msk [vmem:[#allocation3 + $0x60] sm:$0x1] %vm544_vm4, %v6744_v0 }
  0x99   : > { %5811 = vmatmul.mubr.msk.bf16.gmra.mrb[4].mxu0 %vm489_vm1, %v7246_v55  ;;  %5712 = vmatprep.mubr.msk.bf16.mxu1 %vm489_vm1, %v7253_v60  ;;  %v648_v21 = vmul.f32 %v7100_v4, %v609_v18  ;;  %v649_v22 = vmul.f32 %v7100_v4, %v610_v20  ;;  %v6551_v23 = vld [vmem:[#allocation7] sm:$0xff]   ;;  %v791_v25 = vld [vmem:[#allocation2 + $0xc9] sm:$0xff]  ;;  %v1569_v27 = vld [vmem:[#allocation2 + $0xd8] sm:$0xff]  ;;  %v650_v34 = vmul.f32 %v7100_v4, %v611_v26 }
  0x9a   : > { %5814 = vmatprep.mubr.msk.bf16.mxu0 %vm489_vm1, %v7250_v58  ;;  %v790_v24 = vld [vmem:[#allocation2 + $0xc1] sm:$0xff]  ;;  %5736 = vmatprep.subr.bf16.mxu1 %v6551_v23  ;;  %v612_v32 = vld [vmem:[%s6997_s21 + $0xf8] sm:$0xff]  ;;  %v1574_v49 = vld [vmem:[#allocation2 + $0x110] sm:$0xff]  ;;  %550 = vst.msk [vmem:[#allocation3 + $0x78] sm:$0x1] %vm544_vm4, %v6744_v0 }
  0x9b   : > { %v1570_v28 = vld [vmem:[#allocation2 + $0xe0] sm:$0xff]  ;;  %v687_v29 = vadd.f32 %v7108_v7, %v648_v21  ;;  %v688_v30 = vadd.f32 %v7108_v7, %v649_v22  ;;  %5737 = vmatpush3.bf16.msra.mxu1 %v6551_v23  ;;  %v651_v36 = vmul.f32 %v7100_v4, %v612_v32  ;;  %v7293_v38 = vpack.c.bf16 %v791_v25, %v790_v24  ;;  %v1571_v4 = vld [vmem:[#allocation2 + $0xf0] sm:$0xff]  ;;  %v1573_v48 = vld [vmem:[#allocation2 + $0x108] sm:$0xff] }
  0x9c   : > { %v689_v40 = vadd.f32 %v7108_v7, %v650_v34  ;;  %v7298_v41 = vpack.c.bf16 %v1570_v28, %v1569_v27  ;;  %v792_v43 = vld [vmem:[#allocation2 + $0xd9] sm:$0xff]  ;;  %v793_v44 = vld [vmem:[#allocation2 + $0xe1] sm:$0xff]  ;;  %v794_v45 = vld [vmem:[#allocation2 + $0xf1] sm:$0xff]  ;;  %v7317_v53 = vpack.c.bf16 %v1574_v49, %v1573_v48  ;;  %551 = vst.msk [vmem:[#allocation3 + $0x90] sm:$0x1] %vm544_vm4, %v6744_v0 }
  0x9d   : > { %720 = vst.msk [vmem:[#allocation2 + $0x169] sm:$0xff] %vm489_vm1, %v687_v29  ;;  %721 = vst.msk [vmem:[#allocation2 + $0x171] sm:$0xff] %vm489_vm1, %v688_v30  ;;  %v690_v42 = vadd.f32 %v7108_v7, %v651_v36  ;;  %v1572_v7 = vld [vmem:[#allocation2 + $0xf8] sm:$0xff]  ;;  %v7311_v50 = vpack.c.bf16 %v793_v44, %v792_v43  ;;  %v1575_v54 = vld [vmem:[#allocation2 + $0x120] sm:$0xff] }
  0x9e   : > { %722 = vst.msk [vmem:[#allocation2 + $0x181] sm:$0xff] %vm489_vm1, %v689_v40  ;;  %v795_v47 = vld [vmem:[#allocation2 + $0xf9] sm:$0xff]  ;;  %v7313_v51 = vpack.c.bf16 %v1572_v7, %v1571_v4  ;;  %v1576_v57 = vld [vmem:[#allocation2 + $0x128] sm:$0xff]  ;;  %v797_v61 = vld [vmem:[#allocation2 + $0x111] sm:$0xff] }
  0x9f   : > { %723 = vst.msk [vmem:[#allocation2 + $0x189] sm:$0xff] %vm489_vm1, %v690_v42  ;;  %v7315_v52 = vpack.c.bf16 %v795_v47, %v794_v45  ;;  %v796_v59 = vld [vmem:[#allocation2 + $0x109] sm:$0xff]  ;;  %v1577_v63 = vld [vmem:[#allocation2 + $0x138] sm:$0xff]  ;;  %v798_v2 = vld [vmem:[#allocation2 + $0x121] sm:$0xff]  ;;  %v7329_v9 = vpack.c.bf16 %v1576_v57, %v1575_v54 }
  0xa0   : > { %5713 = vmatmul.mubr.msk.bf16.gmra.mrb[8].mxu1 %vm489_vm1, %v7263_v10  ;;  %v6553_v62 = vld [vmem:[#allocation7 + $0x10] sm:$0xff]   ;;  %v1578_v5 = vld [vmem:[#allocation2 + $0x140] sm:$0xff]  ;;  %v7327_v6 = vpack.c.bf16 %v797_v61, %v796_v59  ;;  %v1580_v17 = vld [vmem:[#allocation2 + $0x158] sm:$0xff]  ;;  %552 = vst.msk [vmem:[#allocation3 + $0xa8] sm:$0x1] %vm544_vm4, %v6744_v0 }
  0xa1   : > { %5815 = vmatmul.mubr.msk.bf16.gmra.mrb[8].mxu0 %vm489_vm1, %v7265_v11  ;;  %5716 = vmatprep.mubr.msk.bf16.mxu1 %vm489_vm1, %v7267_v12  ;;  %v799_v3 = vld [vmem:[#allocation2 + $0x129] sm:$0xff]  ;;  %v7333_v15 = vpack.c.bf16 %v1578_v5, %v1577_v63  ;;  %v800_v18 = vld [vmem:[#allocation2 + $0x139] sm:$0xff]  ;;  %v801_v20 = vld [vmem:[#allocation2 + $0x141] sm:$0xff]  ;;  %553 = vst.msk [vmem:[#allocation3 + $0xc0] sm:$0x1] %vm544_vm4, %v6744_v0 }
  0xa2   : > { %5818 = vmatprep.mubr.msk.bf16.mxu0 %vm489_vm1, %v7269_v13  ;;  %5770 = vmatprep.subr.bf16.mxu1 %v6553_v62  ;;  %v7331_v14 = vpack.c.bf16 %v799_v3, %v798_v2  ;;  %v1579_v16 = vld [vmem:[#allocation2 + $0x150] sm:$0xff]  ;;  %v803_v22 = vld [vmem:[#allocation2 + $0x159] sm:$0xff]  ;;  %v7343_v23 = vpack.c.bf16 %v801_v20, %v800_v18  ;;  %v725_v29 = vld [vmem:[#allocation2 + $0x8] sm:$0xff]  ;;  %554 = vst.msk [vmem:[#allocation3 + $0xd8] sm:$0x1] %vm544_vm4, %v6744_v0 }
  0xa3   : > { %v802_v21 = vld [vmem:[#allocation2 + $0x151] sm:$0xff]  ;;  %v7345_v24 = vpack.c.bf16 %v1580_v17, %v1579_v16  ;;  %v724_v28 = vld [vmem:[#allocation2] sm:$0xff]  ;;  %555 = vst.msk [vmem:[#allocation3 + $0xf0] sm:$0x1] %vm544_vm4, %v6744_v0  ;;  %556 = vst.msk [vmem:[#allocation3 + $0x108] sm:$0x1] %vm544_vm4, %v6744_v0 }
  0xa4   : > { %v7347_v25 = vpack.c.bf16 %v803_v22, %v802_v21  ;;  %v804_v26 = vld [vmem:[#allocation2 + $0x169] sm:$0xff]  ;;  %v805_v27 = vld [vmem:[#allocation2 + $0x171] sm:$0xff]  ;;  %v756_v32 = vpack.c.bf16 %v725_v29, %v724_v28  ;;  %v2152_v7 = vld [vmem:[#allocation2 + $0x3a] sm:$0xff]  ;;  %557 = vst.msk [vmem:[#allocation3 + $0x120] sm:$0x1] %vm544_vm4, %v6744_v0 }
  0xa5   : > { %v7357_v30 = vpack.c.bf16 %v805_v27, %v804_v26  ;;  %v6552_v34 = vld [vmem:[#allocation7 + $0x30] sm:$0xff]   ;;  %v2150_v36 = vld [vmem:[#allocation2 + $0x22] sm:$0xff]  ;;  %v2157_v3 = vld [vmem:[#allocation2 + $0x7a] sm:$0xff]  ;;  %558 = vst.msk [vmem:[#allocation3 + $0x138] sm:$0x1] %vm544_vm4, %v6744_v0 }
  0xa6   : > { %v2151_v4 = vld [vmem:[#allocation2 + $0x32] sm:$0xff]  ;;  %v754_v43 = vld [vmem:[#allocation2 + $0x168] sm:$0xff]  ;;  %v2160_v20 = vld [vmem:[#allocation2 + $0x9a] sm:$0xff]  ;;  %559 = vst.msk [vmem:[#allocation3 + $0x150] sm:$0x1] %vm544_vm4, %v6744_v0 }
  0xa7   : > { %v755_v44 = vld [vmem:[#allocation2 + $0x170] sm:$0xff]  ;;  %v1255_v45 = vld [vmem:[#allocation2 + $0x2] sm:$0xff]  ;;  %v7427_v57 = vpack.c.bf16 %v2152_v7, %v2151_v4  ;;  %v2165_v29 = vld [vmem:[#allocation2 + $0xda] sm:$0xff]  ;;  %560 = vst.msk [vmem:[#allocation3 + $0x168] sm:$0x1] %vm544_vm4, %v6744_v0 }
  0xa8   : > { %5717 = vmatmul.mubr.msk.bf16.gmra.mrb[12].mxu1 %vm489_vm1, %v7288_v35  ;;  %v1256_v47 = vld [vmem:[#allocation2 + $0xa] sm:$0xff]  ;;  %v2154_v49 = vld [vmem:[#allocation2 + $0x52] sm:$0xff]  ;;  %v7425_v54 = vpack.c.bf16 %v755_v44, %v754_v43  ;;  %v2155_v63 = vld [vmem:[#allocation2 + $0x62] sm:$0xff]  ;;  %561 = vst.msk [vmem:[#allocation3 + $0x180] sm:$0x1] %vm544_vm4, %v6744_v0 }
  0xa9   : > { %5819 = vmatmul.mubr.msk.bf16.gmra.mrb[12].mxu0 %vm489_vm1, %v7291_v37  ;;  %5720 = vmatprep.mubr.msk.bf16.mxu1 %vm489_vm1, %v7293_v38  ;;  %v2153_v48 = vld [vmem:[#allocation2 + $0x4a] sm:$0xff]  ;;  %v1287_v59 = vpack.c.bf16 %v1256_v47, %v1255_v45  ;;  %v2158_v5 = vld [vmem:[#allocation2 + $0x82] sm:$0xff]  ;;  %v2159_v18 = vld [vmem:[#allocation2 + $0x92] sm:$0xff]  ;;  %539 = vst.msk [vmem:[#allocation3 + $0x10] sm:$0x3] %vm538_vm5, %v6744_v0 }
  0xaa   : > { %5822 = vmatprep.mubr.msk.bf16.mxu0 %vm489_vm1, %v7298_v41  ;;  %v7429_v61 = vpack.c.bf16 %v2154_v49, %v2153_v48  ;;  %v2156_v2 = vld [vmem:[#allocation2 + $0x6a] sm:$0xff]  ;;  %v7443_v17 = vpack.c.bf16 %v2158_v5, %v2157_v3  ;;  %v2162_v22 = vld [vmem:[#allocation2 + $0xb2] sm:$0xff]  ;;  %v7453_v26 = vpack.c.bf16 %v2160_v20, %v2159_v18  ;;  %v2163_v28 = vld [vmem:[#allocation2 + $0xc2] sm:$0xff] }
  0xab   : > { %v7441_v16 = vpack.c.bf16 %v2156_v2, %v2155_v63  ;;  %v2161_v21 = vld [vmem:[#allocation2 + $0xaa] sm:$0xff]  ;;  %v2171_v44 = vld [vmem:[#allocation2 + $0x122] sm:$0xff]  ;;  %v2173_v45 = vld [vmem:[#allocation2 + $0x13a] sm:$0xff] }
  0xac   : > { %v7455_v27 = vpack.c.bf16 %v2162_v22, %v2161_v21  ;;  %v2172_v7 = vld [vmem:[#allocation2 + $0x12a] sm:$0xff]  ;;  %v2174_v47 = vld [vmem:[#allocation2 + $0x142] sm:$0xff]  ;;  %v2176_v63 = vld [vmem:[#allocation2 + $0x15a] sm:$0xff] }
  0xad   : > { %v7489_v48 = vpack.c.bf16 %v2172_v7, %v2171_v44  ;;  %v7491_v49 = vpack.c.bf16 %v2174_v47, %v2173_v45  ;;  %v2177_v2 = vld [vmem:[#allocation2 + $0x16a] sm:$0xff]  ;;  %v2178_v3 = vld [vmem:[#allocation2 + $0x172] sm:$0xff]  ;;  %v2179_v20 = vld [vmem:[#allocation2 + $0x182] sm:$0xff] }
  0xae   : > { %v7503_v18 = vpack.c.bf16 %v2178_v3, %v2177_v2  ;;  %v2180_v21 = vld [vmem:[#allocation2 + $0x18a] sm:$0xff]  ;;  %v7725_v7 = vld [vmem:[%s8145_s4] ss:$0 sm:$0xff] }
  0xaf   : > { %v7513_v22 = vpack.c.bf16 %v2180_v21, %v2179_v20 }
  0xb0   : > { %5721 = vmatmul.mubr.msk.bf16.gmra.mrb[16].mxu1 %vm489_vm1, %v7311_v50 }
  0xb1   : > { %5823 = vmatmul.mubr.msk.bf16.gmra.mrb[16].mxu0 %vm489_vm1, %v7313_v51  ;;  %5724 = vmatprep.mubr.msk.bf16.mxu1 %vm489_vm1, %v7315_v52 }
  0xb2   : > { %5826 = vmatprep.mubr.msk.bf16.mxu0 %vm489_vm1, %v7317_v53 }
  0xb8   : > { %5725 = vmatmul.mubr.msk.bf16.gmra.mrb[20].mxu1 %vm489_vm1, %v7327_v6 }
  0xb9   : > { %5827 = vmatmul.mubr.msk.bf16.gmra.mrb[20].mxu0 %vm489_vm1, %v7329_v9  ;;  %5728 = vmatprep.mubr.msk.bf16.mxu1 %vm489_vm1, %v7331_v14 }
  0xba   : > { %5830 = vmatprep.mubr.msk.bf16.mxu0 %vm489_vm1, %v7333_v15 }
  0xc0   : > { %5729 = vmatmul.mubr.msk.bf16.gmra.mrb[24].mxu1 %vm489_vm1, %v7343_v23 }
  0xc1   : > { %5831 = vmatmul.mubr.msk.bf16.gmra.mrb[24].mxu0 %vm489_vm1, %v7345_v24  ;;  %5732 = vmatprep.mubr.msk.bf16.mxu1 %vm489_vm1, %v7347_v25 }
  0xc2   : > { %5840 = vmatprep.mubr.msk.bf16.mxu0 %vm489_vm1, %v7205_v31  ;;  %v1882_v31 = vld [vmem:[#allocation2 + $0x189] sm:$0xff] }
  0xc8   : > { %5733 = vmatmul.mubr.msk.bf16.gmra.mrb[28].mxu1 %vm489_vm1, %v7357_v30 }
  0xc9   : > { %5841 = vmatmul.mubr.msk.bf16.vlgmr.msra.gmra.mrb[0].mxu0 %vm489_vm1, %v7230_v46  ;;  %5738 = vmatprep.mubr.msk.bf16.mxu1 %vm489_vm1, %v756_v32  ;;  %v2166_v32 = vld [vmem:[#allocation2 + $0xe2] sm:$0xff] }
  0xca   : > { %5873 = vmatpush3.bf16.msra.mxu0 %v7248_v56  ;;  %5844 = vmatprep.mubr.msk.bf16.mxu0 %vm489_vm1, %v7244_v8  ;;  %v2149_v56 = vld [vmem:[#allocation2 + $0x1a] sm:$0xff] }
  0xcb   : > { %5906 = vmatprep.subr.bf16.mxu0 %v6552_v34  ;;  %v2181_v42 = vpack.c.bf16 %v2150_v36, %v2149_v56  ;;  %v2168_v56 = vld [vmem:[#allocation2 + $0xfa] sm:$0xff]  ;;  %v2169_v36 = vld [vmem:[#allocation2 + $0x10a] sm:$0xff] }
  0xd0   : > { %5739 = vmatmul.mubr.msk.bf16.vlgmr.msra.gmra.mrb[0].mxu1 %vm489_vm1, %v7191_v19  ;;  %v1881_v19 = vld [vmem:[#allocation2 + $0x181] sm:$0xff] }
  0xd1   : > { %5845 = vmatmul.mubr.msk.bf16.gmra.mrb[4].mxu0 %vm489_vm1, %v7253_v60  ;;  %5742 = vmatprep.mubr.msk.bf16.mxu1 %vm489_vm1, %v7209_v33  ;;  %v7416_v40 = vpack.c.bf16 %v1882_v31, %v1881_v19  ;;  %v7467_v19 = vpack.c.bf16 %v2166_v32, %v2165_v29  ;;  %v2167_v31 = vld [vmem:[#allocation2 + $0xf2] sm:$0xff]  ;;  %v1584_v29 = vld [vmem:[#allocation2 + $0x188] sm:$0xff] }
  0xd2   : > { %5848 = vmatprep.mubr.msk.bf16.mxu0 %vm489_vm1, %v7263_v10  ;;  %5771 = vmatpush3.bf16.msra.mxu1 %v6553_v62  ;;  %v7431_v62 = vld [vmem:[#allocation7 + $0x38] sm:$0xff]   ;;  %v7477_v4 = vpack.c.bf16 %v2168_v56, %v2167_v31 }
  0xd3   : > { %6148 = vmatprep.subr.bf16.mxu1 %v7093_v1 }
  0xd8   : > { %5743 = vmatmul.mubr.msk.bf16.gmra.mrb[4].mxu1 %vm489_vm1, %v7216_v39 }
  0xd9   : > { %5849 = vmatmul.mubr.msk.bf16.gmra.mrb[8].mxu0 %vm489_vm1, %v7267_v12  ;;  %5746 = vmatprep.mubr.msk.bf16.mxu1 %vm489_vm1, %v7246_v55 }
  0xda   : > { %5852 = vmatprep.mubr.msk.bf16.mxu0 %vm489_vm1, %v7288_v35 }
  0xe0   : > { %5747 = vmatmul.mubr.msk.bf16.gmra.mrb[8].mxu1 %vm489_vm1, %v7250_v58 }
  0xe1   : > { %5853 = vmatmul.mubr.msk.bf16.gmra.mrb[12].mxu0 %vm489_vm1, %v7293_v38  ;;  %5750 = vmatprep.mubr.msk.bf16.mxu1 %vm489_vm1, %v7265_v11 }
  0xe2   : > { %5856 = vmatprep.mubr.msk.bf16.mxu0 %vm489_vm1, %v7311_v50 }
  0xe8   : > { %5751 = vmatmul.mubr.msk.bf16.gmra.mrb[12].mxu1 %vm489_vm1, %v7269_v13 }
  0xe9   : > { %5857 = vmatmul.mubr.msk.bf16.gmra.mrb[16].mxu0 %vm489_vm1, %v7315_v52  ;;  %5754 = vmatprep.mubr.msk.bf16.mxu1 %vm489_vm1, %v7291_v37 }
  0xea   : > { %5860 = vmatprep.mubr.msk.bf16.mxu0 %vm489_vm1, %v7327_v6 }
  0xf0   : > { %5755 = vmatmul.mubr.msk.bf16.gmra.mrb[16].mxu1 %vm489_vm1, %v7298_v41 }
  0xf1   : > { %5861 = vmatmul.mubr.msk.bf16.gmra.mrb[20].mxu0 %vm489_vm1, %v7331_v14  ;;  %5758 = vmatprep.mubr.msk.bf16.mxu1 %vm489_vm1, %v7313_v51 }
  0xf2   : > { %5864 = vmatprep.mubr.msk.bf16.mxu0 %vm489_vm1, %v7343_v23 }
  0xf8   : > { %5759 = vmatmul.mubr.msk.bf16.gmra.mrb[20].mxu1 %vm489_vm1, %v7317_v53 }
  0xf9   : > { %5865 = vmatmul.mubr.msk.bf16.gmra.mrb[24].mxu0 %vm489_vm1, %v7347_v25  ;;  %5762 = vmatprep.mubr.msk.bf16.mxu1 %vm489_vm1, %v7329_v9 }
  0xfa   : > { %5868 = vmatprep.mubr.msk.bf16.mxu0 %vm489_vm1, %v7357_v30 }
 0x100   : > { %5763 = vmatmul.mubr.msk.bf16.gmra.mrb[24].mxu1 %vm489_vm1, %v7333_v15 }
 0x101   : > { %5869 = vmatmul.mubr.msk.bf16.gmra.mrb[28].mxu0 %vm489_vm1, %v7416_v40  ;;  %5766 = vmatprep.mubr.msk.bf16.mxu1 %vm489_vm1, %v7345_v24 }
 0x102   : > { %5874 = vmatprep.mubr.msk.bf16.mxu0 %vm489_vm1, %v2181_v42 }
 0x108   : > { %5767 = vmatmul.mubr.msk.bf16.gmra.mrb[28].mxu1 %vm489_vm1, %v7425_v54 }
 0x109   : > { %5875 = vmatmul.mubr.msk.bf16.vlgmr.msra.gmra.mrb[0].mxu0 %vm489_vm1, %v7427_v57  ;;  %5772 = vmatprep.mubr.msk.bf16.mxu1 %vm489_vm1, %v1287_v59  ;;  %v2175_v59 = vld [vmem:[#allocation2 + $0x152] sm:$0xff] }
 0x10a   : > { %5907 = vmatpush3.bf16.msra.mxu0 %v6552_v34  ;;  %5878 = vmatprep.mubr.msk.bf16.mxu0 %vm489_vm1, %v7429_v61  ;;  %v7501_v5 = vpack.c.bf16 %v2176_v63, %v2175_v59 }
 0x10b   : > { %5940 = vmatprep.subr.bf16.mxu0 %v7431_v62 }
 0x110   : > { %5773 = vmatmul.mubr.msk.bf16.vlgmr.msra.gmra.mrb[0].mxu1 %vm489_vm1, %v2181_v42  ;;  %v2170_v42 = vld [vmem:[#allocation2 + $0x112] sm:$0xff] }
 0x111   : > { %5879 = vmatmul.mubr.msk.bf16.gmra.mrb[4].mxu0 %vm489_vm1, %v7441_v16  ;;  %5776 = vmatprep.mubr.msk.bf16.mxu1 %vm489_vm1, %v7427_v57  ;;  %v7479_v43 = vpack.c.bf16 %v2170_v42, %v2169_v36  ;;  %v6556_v42 = vld [vmem:[#allocation9 + $0x10] sm:$0xff]  }
 0x112   : > { %5882 = vmatprep.mubr.msk.bf16.mxu0 %vm489_vm1, %v7443_v17  ;;  %6149 = vmatpush3.bf16.msra.mxu1 %v7093_v1  ;;  %v2164_v1 = vld [vmem:[#allocation2 + $0xca] sm:$0xff] }
 0x113   : > { %v7465_v34 = vpack.c.bf16 %v2164_v1, %v2163_v28  ;;  %v6555_v28 = vld [vmem:[#allocation7 + $0x40] sm:$0xff]   ;;  %6008 = vmatprep.subr.bf16.mxu1 %v6556_v42 }
 0x114   : > { %v1583_v1 = vld [vmem:[#allocation2 + $0x180] sm:$0xff] }
 0x115   : > { %v1600_v32 = vpack.c.bf16 %v1584_v29, %v1583_v1 }
 0x118   : > { %5777 = vmatmul.mubr.msk.bf16.gmra.mrb[4].mxu1 %vm489_vm1, %v7429_v61 }
 0x119   : > { %5883 = vmatmul.mubr.msk.bf16.gmra.mrb[8].mxu0 %vm489_vm1, %v7453_v26  ;;  %5780 = vmatprep.mubr.msk.bf16.mxu1 %vm489_vm1, %v7441_v16 }
 0x11a   : > { %5886 = vmatprep.mubr.msk.bf16.mxu0 %vm489_vm1, %v7455_v27 }
 0x120   : > { %5781 = vmatmul.mubr.msk.bf16.gmra.mrb[8].mxu1 %vm489_vm1, %v7443_v17 }
 0x121   : > { %5887 = vmatmul.mubr.msk.bf16.gmra.mrb[12].mxu0 %vm489_vm1, %v7465_v34  ;;  %5784 = vmatprep.mubr.msk.bf16.mxu1 %vm489_vm1, %v7453_v26 }
 0x122   : > { %5890 = vmatprep.mubr.msk.bf16.mxu0 %vm489_vm1, %v7467_v19 }
 0x128   : > { %5785 = vmatmul.mubr.msk.bf16.gmra.mrb[12].mxu1 %vm489_vm1, %v7455_v27 }
 0x129   : > { %5891 = vmatmul.mubr.msk.bf16.gmra.mrb[16].mxu0 %vm489_vm1, %v7477_v4  ;;  %5788 = vmatprep.mubr.msk.bf16.mxu1 %vm489_vm1, %v7465_v34 }
 0x12a   : > { %5894 = vmatprep.mubr.msk.bf16.mxu0 %vm489_vm1, %v7479_v43 }
 0x130   : > { %5789 = vmatmul.mubr.msk.bf16.gmra.mrb[16].mxu1 %vm489_vm1, %v7467_v19 }
 0x131   : > { %5895 = vmatmul.mubr.msk.bf16.gmra.mrb[20].mxu0 %vm489_vm1, %v7489_v48  ;;  %5792 = vmatprep.mubr.msk.bf16.mxu1 %vm489_vm1, %v7477_v4 }
 0x132   : > { %5898 = vmatprep.mubr.msk.bf16.mxu0 %vm489_vm1, %v7491_v49 }
 0x138   : > { %5793 = vmatmul.mubr.msk.bf16.gmra.mrb[20].mxu1 %vm489_vm1, %v7479_v43 }
 0x139   : > { %5899 = vmatmul.mubr.msk.bf16.gmra.mrb[24].mxu0 %vm489_vm1, %v7501_v5  ;;  %5796 = vmatprep.mubr.msk.bf16.mxu1 %vm489_vm1, %v7489_v48 }
 0x13a   : > { %5902 = vmatprep.mubr.msk.bf16.mxu0 %vm489_vm1, %v7503_v18 }
 0x140   : > { %5797 = vmatmul.mubr.msk.bf16.gmra.mrb[24].mxu1 %vm489_vm1, %v7491_v49 }
 0x141   : > { %5903 = vmatmul.mubr.msk.bf16.gmra.mrb[28].mxu0 %vm489_vm1, %v7513_v22  ;;  %5800 = vmatprep.mubr.msk.bf16.mxu1 %vm489_vm1, %v7501_v5 }
 0x142   : > { %5908 = vmatprep.mubr.msk.bf16.mxu0 %vm489_vm1, %v7209_v33  ;;  %v2478_v33 = vld [vmem:[#allocation2 + $0x198] sm:$0xff] }
 0x148   : > { %5801 = vmatmul.mubr.msk.bf16.gmra.mrb[28].mxu1 %vm489_vm1, %v7503_v18 }
 0x149   : > { %5909 = vmatmul.mubr.msk.bf16.vlgmr.msra.gmra.mrb[0].mxu0 %vm489_vm1, %v7216_v39  ;;  %5834 = vmatprep.mubr.msk.bf16.mxu1 %vm489_vm1, %v7425_v54  ;;  %v2479_v39 = vld [vmem:[#allocation2 + $0x1a0] sm:$0xff] }
 0x14a   : > { %5941 = vmatpush3.bf16.msra.mxu0 %v7431_v62  ;;  %5912 = vmatprep.mubr.msk.bf16.mxu0 %vm489_vm1, %v7246_v55  ;;  %v2495_v55 = vpack.c.bf16 %v2479_v39, %v2478_v33 }
 0x14b   : > { %5974 = vmatprep.subr.bf16.mxu0 %v6555_v28 }
 0x151   : > { %5913 = vmatmul.mubr.msk.bf16.gmra.mrb[4].mxu0 %vm489_vm1, %v7250_v58 }
 0x152   : > { %5916 = vmatprep.mubr.msk.bf16.mxu0 %vm489_vm1, %v7265_v11 }
 0x154   : > { %5835 = vmatmul.mubr.msk.bf16.vlgmr.msra.gmra.mrb[28].mxu1 %vm489_vm1, %v1600_v32 }
 0x155   : > { %6009 = vmatpush3.bf16.msra.mxu1 %v6556_v42 }
 0x159   : > { %5917 = vmatmul.mubr.msk.bf16.gmra.mrb[8].mxu0 %vm489_vm1, %v7269_v13 }
 0x15a   : > { %5920 = vmatprep.mubr.msk.bf16.mxu0 %vm489_vm1, %v7291_v37 }
 0x161   : > { %5921 = vmatmul.mubr.msk.bf16.gmra.mrb[12].mxu0 %vm489_vm1, %v7298_v41 }
 0x162   : > { %5924 = vmatprep.mubr.msk.bf16.mxu0 %vm489_vm1, %v7313_v51 }
 0x169   : > { %5925 = vmatmul.mubr.msk.bf16.gmra.mrb[16].mxu0 %vm489_vm1, %v7317_v53  ;;  %v3074_v53 = vld [vmem:[#allocation2 + $0x19a] sm:$0xff] }
 0x16a   : > { %5928 = vmatprep.mubr.msk.bf16.mxu0 %vm489_vm1, %v7329_v9 }
 0x171   : > { %5929 = vmatmul.mubr.msk.bf16.gmra.mrb[20].mxu0 %vm489_vm1, %v7333_v15 }
 0x172   : > { %5932 = vmatprep.mubr.msk.bf16.mxu0 %vm489_vm1, %v7345_v24 }
 0x179   : > { %5933 = vmatmul.mubr.msk.bf16.gmra.mrb[24].mxu0 %vm489_vm1, %v7425_v54 }
 0x17a   : > { %5936 = vmatprep.mubr.msk.bf16.mxu0 %vm489_vm1, %v1600_v32 }
 0x181   : > { %5937 = vmatmul.mubr.msk.bf16.gmra.mrb[28].mxu0 %vm489_vm1, %v2495_v55 }
 0x182   : > { %5942 = vmatprep.mubr.msk.bf16.mxu0 %vm489_vm1, %v7230_v46  ;;  %v2776_v46 = vld [vmem:[#allocation2 + $0x199] sm:$0xff] }
 0x189   : > { %5943 = vmatmul.mubr.msk.bf16.vlgmr.msra.gmra.mrb[0].mxu0 %vm489_vm1, %v7244_v8  ;;  %v2777_v8 = vld [vmem:[#allocation2 + $0x1a1] sm:$0xff] }
 0x18a   : > { %5975 = vmatpush3.bf16.msra.mxu0 %v6555_v28  ;;  %5946 = vmatprep.mubr.msk.bf16.mxu0 %vm489_vm1, %v7253_v60  ;;  %v2793_v58 = vpack.c.bf16 %v2777_v8, %v2776_v46 }
 0x191   : > { %5947 = vmatmul.mubr.msk.bf16.gmra.mrb[4].mxu0 %vm489_vm1, %v7263_v10 }
 0x192   : > { %5950 = vmatprep.mubr.msk.bf16.mxu0 %vm489_vm1, %v7267_v12 }
 0x199   : > { %5951 = vmatmul.mubr.msk.bf16.gmra.mrb[8].mxu0 %vm489_vm1, %v7288_v35 }
 0x19a   : > { %5954 = vmatprep.mubr.msk.bf16.mxu0 %vm489_vm1, %v7293_v38 }
 0x1a1   : > { %5955 = vmatmul.mubr.msk.bf16.gmra.mrb[12].mxu0 %vm489_vm1, %v7311_v50 }
 0x1a2   : > { %5958 = vmatprep.mubr.msk.bf16.mxu0 %vm489_vm1, %v7315_v52 }
 0x1a9   : > { %5959 = vmatmul.mubr.msk.bf16.gmra.mrb[16].mxu0 %vm489_vm1, %v7327_v6  ;;  %v3075_v6 = vld [vmem:[#allocation2 + $0x1a2] sm:$0xff] }
 0x1aa   : > { %5962 = vmatprep.mubr.msk.bf16.mxu0 %vm489_vm1, %v7331_v14  ;;  %v3091_v15 = vpack.c.bf16 %v3075_v6, %v3074_v53 }
 0x1b1   : > { %5963 = vmatmul.mubr.msk.bf16.gmra.mrb[20].mxu0 %vm489_vm1, %v7343_v23 }
 0x1b2   : > { %5966 = vmatprep.mubr.msk.bf16.mxu0 %vm489_vm1, %v7347_v25 }
 0x1b9   : > { %5967 = vmatmul.mubr.msk.bf16.gmra.mrb[24].mxu0 %vm489_vm1, %v7357_v30 }
 0x1ba   : > { %5970 = vmatprep.mubr.msk.bf16.mxu0 %vm489_vm1, %v7416_v40 }
 0x1c1   : > { %5971 = vmatmul.mubr.msk.bf16.gmra.mrb[28].mxu0 %vm489_vm1, %v2793_v58 }
 0x1c2   : > { %5976 = vmatprep.mubr.msk.bf16.mxu0 %vm489_vm1, %v7427_v57 }
 0x1c9   : > { %5977 = vmatmul.mubr.msk.bf16.vlgmr.msra.gmra.mrb[0].mxu0 %vm489_vm1, %v7429_v61 }
 0x1ca   : > { %5980 = vmatprep.mubr.msk.bf16.mxu0 %vm489_vm1, %v7441_v16 }
 0x1d1   : > { %5981 = vmatmul.mubr.msk.bf16.gmra.mrb[4].mxu0 %vm489_vm1, %v7443_v17 }
 0x1d2   : > { %5984 = vmatprep.mubr.msk.bf16.mxu0 %vm489_vm1, %v7453_v26 }
 0x1d9   : > { %5985 = vmatmul.mubr.msk.bf16.gmra.mrb[8].mxu0 %vm489_vm1, %v7455_v27 }
 0x1da   : > { %5988 = vmatprep.mubr.msk.bf16.mxu0 %vm489_vm1, %v7465_v34 }
 0x1e1   : > { %5989 = vmatmul.mubr.msk.bf16.gmra.mrb[12].mxu0 %vm489_vm1, %v7467_v19 }
 0x1e2   : > { %5992 = vmatprep.mubr.msk.bf16.mxu0 %vm489_vm1, %v7477_v4  ;;  %v6557_v4 = vld [vmem:[#allocation9 + $0x18] sm:$0xff]  }
 0x1e3   : > { %v7606_v60 = vpop.f32.mrb[0].mxu1  ;;  %6010 = vmatprep.subr.bf16.mxu1 %v6557_v4 }
 0x1e4   : > { %v7608_v10 = vpop.f32.mrb[1].mxu1  ;;  %6011 = vmatpush3.bf16.msra.mxu1 %v6557_v4 }
 0x1e5   : > { %v7610_v11 = vpop.f32.mrb[2].mxu1 }
 0x1e6   : > { %v7612_v12 = vpop.f32.mrb[3].mxu1 }
 0x1e9   : > { %5993 = vmatmul.mubr.msk.bf16.gmra.mrb[16].mxu0 %vm489_vm1, %v7479_v43  ;;  %v7719_v43 = vld [vmem:[#allocation9] sm:$0xff]  }
 0x1ea   : > { %5996 = vmatprep.mubr.msk.bf16.mxu0 %vm489_vm1, %v7489_v48  ;;  %6020 = vmatprep.subr.bf16.mxu1 %v7719_v43 }
 0x1eb   : > { %v7618_v13 = vpop.f32.mrb[4].mxu1 }
 0x1ec   : > { %v7620_v35 = vpop.f32.mrb[5].mxu1 }
 0x1ed   : > { %v7622_v37 = vpop.f32.mrb[6].mxu1 }
 0x1ee   : > { %v7624_v38 = vpop.f32.mrb[7].mxu1 }
 0x1f1   : > { %5997 = vmatmul.mubr.msk.bf16.gmra.mrb[20].mxu0 %vm489_vm1, %v7491_v49 }
 0x1f2   : > { %6000 = vmatprep.mubr.msk.bf16.mxu0 %vm489_vm1, %v7501_v5 }
 0x1f3   : > { %v7630_v41 = vpop.f32.mrb[8].mxu1 }
 0x1f4   : > { %v7632_v50 = vpop.f32.mrb[9].mxu1 }
 0x1f5   : > { %v7634_v51 = vpop.f32.mrb[10].mxu1 }
 0x1f6   : > { %v7636_v52 = vpop.f32.mrb[11].mxu1 }
 0x1f9   : > { %6001 = vmatmul.mubr.msk.bf16.gmra.mrb[24].mxu0 %vm489_vm1, %v7503_v18 }
 0x1fa   : > { %6004 = vmatprep.mubr.msk.bf16.mxu0 %vm489_vm1, %v7513_v22 }
 0x1fb   : > { %v7642_v9 = vpop.f32.mrb[12].mxu1 }
 0x1fc   : > { %v7644_v14 = vpop.f32.mrb[13].mxu1 }
 0x1fd   : > { %v7646_v23 = vpop.f32.mrb[14].mxu1 }
 0x1fe   : > { %v7648_v24 = vpop.f32.mrb[15].mxu1 }
 0x201   : > { %6005 = vmatmul.mubr.msk.bf16.gmra.mrb[28].mxu0 %vm489_vm1, %v3091_v15 }
 0x203   : > { %v7651_v25 = vpop.f32.mrb[16].mxu1 }
 0x204   : > { %v7653_v30 = vpop.f32.mrb[17].mxu1 }
 0x205   : > { %v7655_v40 = vpop.f32.mrb[18].mxu1 }
 0x206   : > { %v7657_v54 = vpop.f32.mrb[19].mxu1 }
 0x20b   : > { %v7659_v57 = vpop.f32.mrb[20].mxu1 }
 0x20c   : > { %v7661_v61 = vpop.f32.mrb[21].mxu1 }
 0x20d   : > { %v7663_v62 = vpop.f32.mrb[22].mxu1 }
 0x20e   : > { %v7665_v16 = vpop.f32.mrb[23].mxu1 }
 0x213   : > { %v7667_v17 = vpop.f32.mrb[24].mxu1 }
 0x214   : > { %v7669_v26 = vpop.f32.mrb[25].mxu1 }
 0x215   : > { %v7671_v27 = vpop.f32.mrb[26].mxu1 }
 0x216   : > { %v7673_v34 = vpop.f32.mrb[27].mxu1 }
 0x227   : > { %v7711_v19 = vpop.f32.mrb[28].mxu1 }
 0x228   : > { %v7713_v31 = vpop.f32.mrb[29].mxu1 }
 0x229   : > { %v7715_v56 = vpop.f32.mrb[30].mxu1 }
 0x22a   : > { %v7717_v36 = vpop.f32.mrb[31].mxu1 }
 0x29c   : > { %v5978_v44 = vpop.f32.mrb[0].mxu0 }
 0x29d   : > { %v6150_v45 = vadd.f32 %v5978_v44, %v7606_v60  ;;  %v3183_v47 = vpop.f32.mrb[1].mxu0 }
 0x29e   : > { %v6151_v48 = vadd.f32 %v3183_v47, %v7608_v10  ;;  %v5979_v49 = vpop.f32.mrb[2].mxu0 }
 0x29f   : > { %vm3344_vm6 = vcmp.gt.f32.partialorder %v6150_v45, 0.0  ;;  %v3383_v59 = vmul.f32 %v6150_v45, %v7725_v7  ;;  %v6152_v63 = vadd.f32 %v5979_v49, %v7610_v11  ;;  %v3186_v2 = vpop.f32.mrb[3].mxu0 }
 0x2a0   : > { %vm3342_vm7 = vcmp.gt.f32.partialorder %v6151_v48, 0.0  ;;  %v3381_v3 = vmul.f32 %v6151_v48, %v7725_v7  ;;  %v6153_v5 = vadd.f32 %v3186_v2, %v7612_v12 }
 0x2a1   : > { %v3415_v18 = vsel %vm3344_vm6, %v6150_v45, %v3383_v59  ;;  %vm3345_vm8 = vcmp.gt.f32.partialorder %v6152_v63, 0.0  ;;  %v3384_v20 = vmul.f32 %v6152_v63, %v7725_v7 }
 0x2a2   : > { %3448 = vst.msk [vmem:[#allocation3 + $0x31] sm:$0xff] %vm535_vm0, %v3415_v18  ;;  %v3413_v21 = vsel %vm3342_vm7, %v6151_v48, %v3381_v3  ;;  %vm3343_vm9 = vcmp.gt.f32.partialorder %v6153_v5, 0.0  ;;  %v3382_v22 = vmul.f32 %v6153_v5, %v7725_v7 }
 0x2a3   : > { %3446 = vst.msk [vmem:[#allocation3 + $0x19] sm:$0xff] %vm535_vm0, %v3413_v21  ;;  %v3416_v28 = vsel %vm3345_vm8, %v6152_v63, %v3384_v20 }
 0x2a4   : > { %3449 = vst.msk [vmem:[#allocation3 + $0x39] sm:$0xff] %vm535_vm0, %v3416_v28  ;;  %v3414_v1 = vsel %vm3343_vm9, %v6153_v5, %v3382_v22  ;;  %v5982_v29 = vpop.f32.mrb[4].mxu0 }
 0x2a5   : > { %3447 = vst.msk [vmem:[#allocation3 + $0x21] sm:$0xff] %vm535_vm0, %v3414_v1  ;;  %v6154_v32 = vadd.f32 %v5982_v29, %v7618_v13  ;;  %v3199_v33 = vpop.f32.mrb[5].mxu0  ;;  %v3502_v13 = vld [vmem:[#allocation3 + $0x1] ss:$2 sm:$0xff] }
 0x2a6   : > { %v6155_v39 = vadd.f32 %v3199_v33, %v7620_v35  ;;  %v5983_v55 = vpop.f32.mrb[6].mxu0 }
 0x2a7   : > { %vm3348_vm10 = vcmp.gt.f32.partialorder %v6154_v32, 0.0  ;;  %v3387_v46 = vmul.f32 %v6154_v32, %v7725_v7  ;;  %v6156_v8 = vadd.f32 %v5983_v55, %v7622_v37  ;;  %v3202_v58 = vpop.f32.mrb[7].mxu0 }
 0x2a8   : > { %vm3346_vm11 = vcmp.gt.f32.partialorder %v6155_v39, 0.0  ;;  %v3385_v60 = vmul.f32 %v6155_v39, %v7725_v7  ;;  %v6157_v10 = vadd.f32 %v3202_v58, %v7624_v38 }
 0x2a9   : > { %v3419_v11 = vsel %vm3348_vm10, %v6154_v32, %v3387_v46  ;;  %vm3349_vm12 = vcmp.gt.f32.partialorder %v6156_v8, 0.0  ;;  %v3388_v12 = vmul.f32 %v6156_v8, %v7725_v7 }
 0x2aa   : > { %3452 = vst.msk [vmem:[#allocation3 + $0x61] sm:$0xff] %vm535_vm0, %v3419_v11  ;;  %v3417_v35 = vsel %vm3346_vm11, %v6155_v39, %v3385_v60  ;;  %vm3347_vm13 = vcmp.gt.f32.partialorder %v6157_v10, 0.0  ;;  %v3386_v53 = vmul.f32 %v6157_v10, %v7725_v7  ;;  %v6559_v11 = vld [vmem:[#allocation9 + $0x8] sm:$0xff]  }
 0x2ab   : > { %3450 = vst.msk [vmem:[#allocation3 + $0x49] sm:$0xff] %vm535_vm0, %v3417_v35  ;;  %v3420_v37 = vsel %vm3349_vm12, %v6156_v8, %v3388_v12  ;;  %v3504_v6 = vld [vmem:[#allocation3 + $0x31] ss:$2 sm:$0xff] }
 0x2ac   : > { %3453 = vst.msk [vmem:[#allocation3 + $0x69] sm:$0xff] %vm535_vm0, %v3420_v37  ;;  %v3418_v15 = vsel %vm3347_vm13, %v6157_v10, %v3386_v53  ;;  %v5986_v42 = vpop.f32.mrb[8].mxu0  ;;  %v3517_v38 = vpack.c.bf16 %v3504_v6, %v3502_v13 }
 0x2ad   : > { %3451 = vst.msk [vmem:[#allocation3 + $0x51] sm:$0xff] %vm535_vm0, %v3418_v15  ;;  %v6158_v4 = vadd.f32 %v5986_v42, %v7630_v41  ;;  %v3215_v44 = vpop.f32.mrb[9].mxu0 }
 0x2ae   : > { %v6159_v45 = vadd.f32 %v3215_v44, %v7632_v50  ;;  %v5987_v47 = vpop.f32.mrb[10].mxu0  ;;  %6012 = vmatprep.mubr.msk.bf16.mxu1 %vm535_vm0, %v3517_v38 }
 0x2af   : > { %vm3352_vm14 = vcmp.gt.f32.partialorder %v6158_v4, 0.0  ;;  %v3391_v48 = vmul.f32 %v6158_v4, %v7725_v7  ;;  %v6160_v49 = vadd.f32 %v5987_v47, %v7634_v51  ;;  %v3218_v59 = vpop.f32.mrb[11].mxu0 }
 0x2b0   : > { %vm3350_vm15 = vcmp.gt.f32.partialorder %v6159_v45, 0.0  ;;  %v3389_v63 = vmul.f32 %v6159_v45, %v7725_v7  ;;  %v6161_v2 = vadd.f32 %v3218_v59, %v7636_v52 }
 0x2b1   : > { %v3423_v3 = vsel %vm3352_vm14, %v6158_v4, %v3391_v48  ;;  %vm3353_vm2 = vcmp.gt.f32.partialorder %v6160_v49, 0.0  ;;  %v3392_v41 = vmul.f32 %v6160_v49, %v7725_v7 }
 0x2b2   : > { %3456 = vst.msk [vmem:[#allocation3 + $0x91] sm:$0xff] %vm535_vm0, %v3423_v3  ;;  %v3421_v50 = vsel %vm3350_vm15, %v6159_v45, %v3389_v63  ;;  %vm3351_vm3 = vcmp.gt.f32.partialorder %v6161_v2, 0.0  ;;  %v3390_v5 = vmul.f32 %v6161_v2, %v7725_v7 }
 0x2b3   : > { %3454 = vst.msk [vmem:[#allocation3 + $0x79] sm:$0xff] %vm535_vm0, %v3421_v50  ;;  %v3424_v18 = vsel %vm3353_vm2, %v6160_v49, %v3392_v41 }
 0x2b4   : > { %3457 = vst.msk [vmem:[#allocation3 + $0x99] sm:$0xff] %vm535_vm0, %v3424_v18  ;;  %v3422_v51 = vsel %vm3351_vm3, %v6161_v2, %v3390_v5  ;;  %v5990_v20 = vpop.f32.mrb[12].mxu0 }
 0x2b5   : > { %3455 = vst.msk [vmem:[#allocation3 + $0x81] sm:$0xff] %vm535_vm0, %v3422_v51  ;;  %v6162_v52 = vadd.f32 %v5990_v20, %v7642_v9  ;;  %v3231_v21 = vpop.f32.mrb[13].mxu0 }
 0x2b6   : > { %v6163_v22 = vadd.f32 %v3231_v21, %v7644_v14  ;;  %v5991_v28 = vpop.f32.mrb[14].mxu0 }
 0x2b7   : > { %vm3356_vm4 = vcmp.gt.f32.partialorder %v6162_v52, 0.0  ;;  %v3395_v1 = vmul.f32 %v6162_v52, %v7725_v7  ;;  %v6164_v29 = vadd.f32 %v5991_v28, %v7646_v23  ;;  %v3234_v32 = vpop.f32.mrb[15].mxu0  ;;  %v3506_v23 = vld [vmem:[#allocation3 + $0x61] ss:$2 sm:$0xff] }
 0x2b8   : > { %vm3354_vm5 = vcmp.gt.f32.partialorder %v6163_v22, 0.0  ;;  %v3393_v33 = vmul.f32 %v6163_v22, %v7725_v7  ;;  %v6165_v39 = vadd.f32 %v3234_v32, %v7648_v24 }
 0x2b9   : > { %v3427_v55 = vsel %vm3356_vm4, %v6162_v52, %v3395_v1  ;;  %vm3357_vm6 = vcmp.gt.f32.partialorder %v6164_v29, 0.0  ;;  %v3396_v46 = vmul.f32 %v6164_v29, %v7725_v7 }
 0x2ba   : > { %3460 = vst.msk [vmem:[#allocation3 + $0xc1] sm:$0xff] %vm535_vm0, %v3427_v55  ;;  %v3425_v9 = vsel %vm3354_vm5, %v6163_v22, %v3393_v33  ;;  %vm3355_vm7 = vcmp.gt.f32.partialorder %v6165_v39, 0.0  ;;  %v3394_v14 = vmul.f32 %v6165_v39, %v7725_v7 }
 0x2bb   : > { %3458 = vst.msk [vmem:[#allocation3 + $0xa9] sm:$0xff] %vm535_vm0, %v3425_v9  ;;  %v3428_v8 = vsel %vm3357_vm6, %v6164_v29, %v3396_v46  ;;  %v3508_v58 = vld [vmem:[#allocation3 + $0x91] ss:$2 sm:$0xff] }
 0x2bc   : > { %3461 = vst.msk [vmem:[#allocation3 + $0xc9] sm:$0xff] %vm535_vm0, %v3428_v8  ;;  %v3426_v60 = vsel %vm3355_vm7, %v6165_v39, %v3394_v14  ;;  %v5994_v10 = vpop.f32.mrb[16].mxu0  ;;  %v3518_v24 = vpack.c.bf16 %v3508_v58, %v3506_v23 }
 0x2bd   : > { %3459 = vst.msk [vmem:[#allocation3 + $0xb1] sm:$0xff] %vm535_vm0, %v3426_v60  ;;  %v6166_v12 = vadd.f32 %v5994_v10, %v7651_v25  ;;  %v3247_v13 = vpop.f32.mrb[17].mxu0  ;;  %v7784_v25 = vld [vmem:[#allocation9 + $0x20] sm:$0xff]  }
 0x2be   : > { %v6167_v35 = vadd.f32 %v3247_v13, %v7653_v30  ;;  %v5995_v53 = vpop.f32.mrb[18].mxu0  ;;  %6013 = vmatmul.mubr.msk.bf16.vlgmr.msra.gmra.mrb[32].mxu1 %vm535_vm0, %v3518_v24 }
 0x2bf   : > { %vm3360_vm8 = vcmp.gt.f32.partialorder %v6166_v12, 0.0  ;;  %v3399_v37 = vmul.f32 %v6166_v12, %v7725_v7  ;;  %v6168_v6 = vadd.f32 %v5995_v53, %v7655_v40  ;;  %v3250_v15 = vpop.f32.mrb[19].mxu0  ;;  %6021 = vmatpush3.bf16.msra.mxu1 %v7719_v43 }
 0x2c0   : > { %vm3358_vm9 = vcmp.gt.f32.partialorder %v6167_v35, 0.0  ;;  %v3397_v42 = vmul.f32 %v6167_v35, %v7725_v7  ;;  %v6169_v38 = vadd.f32 %v3250_v15, %v7657_v54  ;;  %6022 = vmatprep.subr.bf16.mxu1 %v6559_v11  ;;  %v3480_v15 = vld [vmem:[#allocation3 + $0x30] ss:$2 sm:$0xff] }
 0x2c1   : > { %v3431_v30 = vsel %vm3360_vm8, %v6166_v12, %v3399_v37  ;;  %vm3361_vm10 = vcmp.gt.f32.partialorder %v6168_v6, 0.0  ;;  %v3400_v4 = vmul.f32 %v6168_v6, %v7725_v7 }
 0x2c2   : > { %3464 = vst.msk [vmem:[#allocation3 + $0xf1] sm:$0xff] %vm535_vm0, %v3431_v30  ;;  %v3429_v44 = vsel %vm3358_vm9, %v6167_v35, %v3397_v42  ;;  %vm3359_vm11 = vcmp.gt.f32.partialorder %v6169_v38, 0.0  ;;  %v3398_v40 = vmul.f32 %v6169_v38, %v7725_v7 }
 0x2c3   : > { %3462 = vst.msk [vmem:[#allocation3 + $0xd9] sm:$0xff] %vm535_vm0, %v3429_v44  ;;  %v3432_v43 = vsel %vm3361_vm10, %v6168_v6, %v3400_v4  ;;  %6023 = vmatpush3.bf16.msra.mxu1 %v6559_v11  ;;  %v3478_v6 = vld [vmem:[#allocation3] ss:$2 sm:$0xff]  ;;  %v3484_v44 = vld [vmem:[#allocation3 + $0x90] ss:$2 sm:$0xff]  ;;  %vm6746_vm10 = vmmov 0  }
 0x2c4   : > { %3465 = vst.msk [vmem:[#allocation3 + $0xf9] sm:$0xff] %vm535_vm0, %v3432_v43  ;;  %v3430_v54 = vsel %vm3359_vm11, %v6169_v38, %v3398_v40  ;;  %v5998_v45 = vpop.f32.mrb[20].mxu0  ;;  %6032 = vmatprep.subr.bf16.mxu1 %v7784_v25  ;;  %v3493_v4 = vpack.c.bf16 %v3480_v15, %v3478_v6  ;;  %v3482_v40 = vld [vmem:[#allocation3 + $0x60] ss:$2 sm:$0xff]  ;;  %vm4693_vm11 = vcmask 1041408  }
 0x2c5   : > { %3463 = vst.msk [vmem:[#allocation3 + $0xe1] sm:$0xff] %vm535_vm0, %v3430_v54  ;;  %v6170_v47 = vadd.f32 %v5998_v45, %v7659_v57  ;;  %v3263_v48 = vpop.f32.mrb[21].mxu0  ;;  %v3494_v43 = vpack.c.bf16 %v3484_v44, %v3482_v40  ;;  %v3486_v54 = vld [vmem:[#allocation3 + $0xc0] ss:$2 sm:$0xff] }
 0x2c6   : > { %v6171_v49 = vadd.f32 %v3263_v48, %v7661_v61  ;;  %v5999_v59 = vpop.f32.mrb[22].mxu0  ;;  %v6561_v45 = vld [vmem:[#allocation9 + $0x28] sm:$0xff]   ;;  %v6562_v48 = vld [vmem:[#allocation9 + $0x30] sm:$0xff]  }
 0x2c7   : > { %vm3364_vm12 = vcmp.gt.f32.partialorder %v6170_v47, 0.0  ;;  %v3403_v63 = vmul.f32 %v6170_v47, %v7725_v7  ;;  %v6172_v2 = vadd.f32 %v5999_v59, %v7663_v62  ;;  %v3266_v3 = vpop.f32.mrb[23].mxu0  ;;  %v3510_v62 = vld [vmem:[#allocation3 + $0xc1] ss:$2 sm:$0xff]  ;;  %v3705_v59 = vld [vmem:[#allocation3 + $0x2] ss:$2 sm:$0xff] }
 0x2c8   : > { %vm3362_vm13 = vcmp.gt.f32.partialorder %v6171_v49, 0.0  ;;  %v3401_v41 = vmul.f32 %v6171_v49, %v7725_v7  ;;  %v6173_v50 = vadd.f32 %v3266_v3, %v7665_v16  ;;  %v4076_v15 = vld [vmem:[#allocation3 + $0xaa] ss:$2 sm:$0xff] }
 0x2c9   : > { %v3435_v5 = vsel %vm3364_vm12, %v6170_v47, %v3403_v63  ;;  %vm3365_vm14 = vcmp.gt.f32.partialorder %v6172_v2, 0.0  ;;  %v3404_v18 = vmul.f32 %v6172_v2, %v7725_v7  ;;  %v3707_v63 = vld [vmem:[#allocation3 + $0x32] ss:$2 sm:$0xff]  ;;  %v6570_v44 = vld [vmem:[#allocation9 + $0x70] sm:$0xff]   ;;  %vm4689_vm12 = vcmask 15360  }
 0x2ca   : > { %3468 = vst.msk [vmem:[#allocation3 + $0x121] sm:$0xff] %vm535_vm0, %v3435_v5  ;;  %v3433_v57 = vsel %vm3362_vm13, %v6171_v49, %v3401_v41  ;;  %vm3363_vm15 = vcmp.gt.f32.partialorder %v6173_v50, 0.0  ;;  %v3402_v61 = vmul.f32 %v6173_v50, %v7725_v7  ;;  %v3720_v41 = vpack.c.bf16 %v3707_v63, %v3705_v59  ;;  %v4194_v40 = vld [vmem:[#allocation3 + $0x60] ss:$2 sm:$0xff]  ;;  %v4196_v59 = vld [vmem:[#allocation3 + $0x90] ss:$2 sm:$0xff] }
 0x2cb   : > { %3466 = vst.msk [vmem:[#allocation3 + $0x109] sm:$0xff] %vm535_vm0, %v3433_v57  ;;  %v3436_v51 = vsel %vm3365_vm14, %v6172_v2, %v3404_v18  ;;  %v3512_v20 = vld [vmem:[#allocation3 + $0xf1] ss:$2 sm:$0xff]  ;;  %v3715_v5 = vld [vmem:[#allocation3 + $0xf2] ss:$2 sm:$0xff]  ;;  %vm4939_vm13 = vcmask 1042434  }
 0x2cc   : > { %3469 = vst.msk [vmem:[#allocation3 + $0x129] sm:$0xff] %vm535_vm0, %v3436_v51  ;;  %v3434_v52 = vsel %vm3363_vm15, %v6173_v50, %v3402_v61  ;;  %v6002_v21 = vpop.f32.mrb[24].mxu0  ;;  %v3519_v16 = vpack.c.bf16 %v3512_v20, %v3510_v62  ;;  %v3711_v50 = vld [vmem:[#allocation3 + $0x92] ss:$2 sm:$0xff]  ;;  %v3709_v18 = vld [vmem:[#allocation3 + $0x62] ss:$2 sm:$0xff] }
 0x2cd   : > { %3467 = vst.msk [vmem:[#allocation3 + $0x111] sm:$0xff] %vm535_vm0, %v3434_v52  ;;  %v6174_v22 = vadd.f32 %v6002_v21, %v7667_v17  ;;  %v3279_v28 = vpop.f32.mrb[25].mxu0  ;;  %v3713_v57 = vld [vmem:[#allocation3 + $0xc2] ss:$2 sm:$0xff]  ;;  %v6564_v62 = vld [vmem:[#allocation9 + $0x40] sm:$0xff]   ;;  %vm4942_vm14 = vcmask 1043459  }
 0x2ce   : > { %v6175_v1 = vadd.f32 %v3279_v28, %v7669_v26  ;;  %v6003_v29 = vpop.f32.mrb[26].mxu0  ;;  %6016 = vmatprep.mubr.msk.bf16.mxu1 %vm535_vm0, %v3519_v16  ;;  %v6563_v61 = vld [vmem:[#allocation9 + $0x38] sm:$0xff]   ;;  %v3722_v51 = vpack.c.bf16 %v3715_v5, %v3713_v57  ;;  %vm4945_vm15 = vcmask 1044484  }
 0x2cf   : > { %vm3368_vm2 = vcmp.gt.f32.partialorder %v6174_v22, 0.0  ;;  %v3407_v32 = vmul.f32 %v6174_v22, %v7725_v7  ;;  %v6176_v33 = vadd.f32 %v6003_v29, %v7671_v27  ;;  %v3282_v39 = vpop.f32.mrb[27].mxu0  ;;  %v3828_v52 = vld [vmem:[#allocation3 + $0x48] ss:$2 sm:$0xff] }
 0x2d0   : > { %vm3366_vm3 = vcmp.gt.f32.partialorder %v6175_v1, 0.0  ;;  %v3405_v55 = vmul.f32 %v6175_v1, %v7725_v7  ;;  %v6177_v46 = vadd.f32 %v3282_v39, %v7673_v34  ;;  %v3834_v39 = vld [vmem:[#allocation3 + $0xd8] ss:$2 sm:$0xff] }
 0x2d1   : > { %v3439_v9 = vsel %vm3368_vm2, %v6174_v22, %v3407_v32  ;;  %vm3369_vm4 = vcmp.gt.f32.partialorder %v6176_v33, 0.0  ;;  %v3408_v17 = vmul.f32 %v6176_v33, %v7725_v7  ;;  %v3826_v22 = vld [vmem:[#allocation3 + $0x18] ss:$2 sm:$0xff]  ;;  %vm4948_vm2 = vcmask 1045509  }
 0x2d2   : > { %3472 = vst.msk [vmem:[#allocation3 + $0x151] sm:$0xff] %vm535_vm0, %v3439_v9  ;;  %v3437_v26 = vsel %vm3366_vm3, %v6175_v1, %v3405_v55  ;;  %vm3367_vm5 = vcmp.gt.f32.partialorder %v6177_v46, 0.0  ;;  %v3406_v14 = vmul.f32 %v6177_v46, %v7725_v7  ;;  %v3841_v28 = vpack.c.bf16 %v3828_v52, %v3826_v22  ;;  %v3832_v1 = vld [vmem:[#allocation3 + $0xa8] ss:$2 sm:$0xff]  ;;  %v3830_v32 = vld [vmem:[#allocation3 + $0x78] ss:$2 sm:$0xff] }
 0x2d3   : > { %3470 = vst.msk [vmem:[#allocation3 + $0x139] sm:$0xff] %vm535_vm0, %v3437_v26  ;;  %v3440_v8 = vsel %vm3369_vm4, %v6176_v33, %v3408_v17  ;;  %v3514_v42 = vld [vmem:[#allocation3 + $0x121] ss:$2 sm:$0xff]  ;;  %v3490_v2 = vld [vmem:[#allocation3 + $0x120] ss:$2 sm:$0xff]  ;;  %v3842_v33 = vpack.c.bf16 %v3832_v1, %v3830_v32  ;;  %vm4951_vm3 = vcmask 1046534  }
 0x2d4   : > { %3473 = vst.msk [vmem:[#allocation3 + $0x159] sm:$0xff] %vm535_vm0, %v3440_v8  ;;  %v3438_v27 = vsel %vm3367_vm5, %v6177_v46, %v3406_v14  ;;  %v6006_v23 = vpop.f32.mrb[28].mxu0  ;;  %v3717_v21 = vld [vmem:[#allocation3 + $0x122] ss:$2 sm:$0xff]  ;;  %v3950_v26 = vld [vmem:[#allocation3 + $0x49] ss:$2 sm:$0xff] }
 0x2d5   : > { %3471 = vst.msk [vmem:[#allocation3 + $0x141] sm:$0xff] %vm535_vm0, %v3438_v27  ;;  %v6178_v34 = vadd.f32 %v6006_v23, %v7711_v19  ;;  %v3295_v58 = vpop.f32.mrb[29].mxu0  ;;  %v3836_v29 = vld [vmem:[#allocation3 + $0x108] ss:$2 sm:$0xff]  ;;  %v6565_v55 = vld [vmem:[#allocation9 + $0x48] sm:$0xff]   ;;  %vm4954_vm4 = vcmask 1047559  }
 0x2d6   : > { %v6179_v60 = vadd.f32 %v3295_v58, %v7713_v31  ;;  %v6007_v10 = vpop.f32.mrb[30].mxu0  ;;  %v3843_v46 = vpack.c.bf16 %v3836_v29, %v3834_v39  ;;  %v6566_v9 = vld [vmem:[#allocation9 + $0x50] sm:$0xff]   ;;  %v3948_v27 = vld [vmem:[#allocation3 + $0x19] ss:$2 sm:$0xff]  ;;  %v4436_v39 = vld [vmem:[#allocation3 + $0x32] ss:$2 sm:$0xff] }
 0x2d7   : > { %vm3372_vm6 = vcmp.gt.f32.partialorder %v6178_v34, 0.0  ;;  %v3411_v24 = vmul.f32 %v6178_v34, %v7725_v7  ;;  %v6180_v11 = vadd.f32 %v6007_v10, %v7715_v56  ;;  %v3298_v12 = vpop.f32.mrb[31].mxu0  ;;  %v3963_v23 = vpack.c.bf16 %v3950_v26, %v3948_v27  ;;  %v3958_v58 = vld [vmem:[#allocation3 + $0x109] ss:$2 sm:$0xff]  ;;  %v6573_v22 = vld [vmem:[#allocation9 + $0x88] sm:$0xff]  }
 0x2d8   : > { %vm3370_vm7 = vcmp.gt.f32.partialorder %v6179_v60, 0.0  ;;  %v3409_v13 = vmul.f32 %v6179_v60, %v7725_v7  ;;  %v6181_v35 = vadd.f32 %v3298_v12, %v7717_v36  ;;  %v4318_v52 = vld [vmem:[#allocation3 + $0x91] ss:$2 sm:$0xff]  ;;  %v4438_v29 = vld [vmem:[#allocation3 + $0x62] ss:$2 sm:$0xff]  ;;  %vm5077_vm5 = vcmask 785408  }
 0x2d9   : > { %v3443_v53 = vsel %vm3372_vm6, %v6178_v34, %v3411_v24  ;;  %vm3373_vm8 = vcmp.gt.f32.partialorder %v6180_v11, 0.0  ;;  %v3412_v37 = vmul.f32 %v6180_v11, %v7725_v7  ;;  %v3954_v34 = vld [vmem:[#allocation3 + $0xa9] ss:$2 sm:$0xff]  ;;  %v3956_v24 = vld [vmem:[#allocation3 + $0xd9] ss:$2 sm:$0xff]  ;;  %vm5075_vm6 = vcmask 523264  }
 0x2da   : > { %3476 = vst.msk [vmem:[#allocation3 + $0x181] sm:$0xff] %vm535_vm0, %v3443_v53  ;;  %v3441_v19 = vsel %vm3370_vm7, %v6179_v60, %v3409_v13  ;;  %vm3371_vm9 = vcmp.gt.f32.partialorder %v6181_v35, 0.0  ;;  %v3410_v31 = vmul.f32 %v6181_v35, %v7725_v7  ;;  %v3488_v7 = vld [vmem:[#allocation3 + $0xf0] ss:$2 sm:$0xff]  ;;  %v3952_v60 = vld [vmem:[#allocation3 + $0x79] ss:$2 sm:$0xff]  ;;  %v3965_v12 = vpack.c.bf16 %v3958_v58, %v3956_v24 }
 0x2db   : > { %3474 = vst.msk [vmem:[#allocation3 + $0x169] sm:$0xff] %vm535_vm0, %v3441_v19  ;;  %v3444_v56 = vsel %vm3373_vm8, %v6180_v11, %v3412_v37  ;;  %v3516_v38 = vld [vmem:[#allocation3 + $0x151] ss:$2 sm:$0xff]  ;;  %v3495_v47 = vpack.c.bf16 %v3488_v7, %v3486_v54  ;;  %v3492_v49 = vld [vmem:[#allocation3 + $0x150] ss:$2 sm:$0xff]  ;;  %v3964_v10 = vpack.c.bf16 %v3954_v34, %v3952_v60  ;;  %v6745_v24 = vmov 0.0|0.0  }
 0x2dc   : > { %3477 = vst.msk [vmem:[#allocation3 + $0x189] sm:$0xff] %vm535_vm0, %v3444_v56  ;;  %v3442_v36 = vsel %vm3371_vm9, %v6181_v35, %v3410_v31  ;;  %v3520_v30 = vpack.c.bf16 %v3516_v38, %v3514_v42  ;;  %v3496_v3 = vpack.c.bf16 %v3492_v49, %v3490_v2  ;;  %v3719_v20 = vld [vmem:[#allocation3 + $0x152] ss:$2 sm:$0xff]  ;;  %v3960_v37 = vld [vmem:[#allocation3 + $0x139] ss:$2 sm:$0xff] }
 0x2dd   : > { %3475 = vst.msk [vmem:[#allocation3 + $0x171] sm:$0xff] %vm535_vm0, %v3442_v36  ;;  %v3723_v16 = vpack.c.bf16 %v3719_v20, %v3717_v21  ;;  %v3838_v14 = vld [vmem:[#allocation3 + $0x138] ss:$2 sm:$0xff]  ;;  %v6567_v11 = vld [vmem:[#allocation9 + $0x58] sm:$0xff]   ;;  %v4324_v20 = vld [vmem:[#allocation3 + $0x121] ss:$2 sm:$0xff] }
 0x2de   : > { %6017 = vmatmul.mubr.msk.bf16.gmra.mrb[36].mxu1 %vm535_vm0, %v3520_v30  ;;  %v6568_v13 = vld [vmem:[#allocation9 + $0x60] sm:$0xff]   ;;  %v6569_v30 = vld [vmem:[#allocation9 + $0x68] sm:$0xff]   ;;  %v4610_v58 = vld [vmem:[%s8149_s8] sm:$0xff] }
 0x2df   : > { %6024 = vmatprep.mubr.msk.bf16.mxu1 %vm535_vm0, %v3493_v4  ;;  %v4072_v53 = vld [vmem:[#allocation3 + $0x4a] ss:$2 sm:$0xff]  ;;  %v4070_v31 = vld [vmem:[#allocation3 + $0x1a] ss:$2 sm:$0xff]  ;;  %v4326_v32 = vld [vmem:[#allocation3 + $0x151] ss:$2 sm:$0xff] }
 0x2e0   : > { %v4085_v6 = vpack.c.bf16 %v4072_v53, %v4070_v31  ;;  %v4080_v56 = vld [vmem:[#allocation3 + $0x10a] ss:$2 sm:$0xff]  ;;  %v4074_v42 = vld [vmem:[#allocation3 + $0x7a] ss:$2 sm:$0xff] }
 0x2e1   : > { %v4086_v38 = vpack.c.bf16 %v4076_v15, %v4074_v42  ;;  %v4078_v36 = vld [vmem:[#allocation3 + $0xda] ss:$2 sm:$0xff] }
 0x2e2   : > { %v4087_v4 = vpack.c.bf16 %v4080_v56, %v4078_v36  ;;  %v4202_v49 = vld [vmem:[#allocation3 + $0x120] ss:$2 sm:$0xff]  ;;  %v4200_v2 = vld [vmem:[#allocation3 + $0xf0] ss:$2 sm:$0xff] }
 0x2e3   : > { %v4206_v5 = vld [vmem:[#allocation3 + $0x180] ss:$2 sm:$0xff]  ;;  %v4328_v1 = vld [vmem:[#allocation3 + $0x181] ss:$2 sm:$0xff]  ;;  %v4611_v60 = vld [vmem:[%s8149_s8 + $0x8] sm:$0xff] }
 0x2e4   : > { %v3840_v17 = vld [vmem:[#allocation3 + $0x168] ss:$2 sm:$0xff]  ;;  %v3962_v35 = vld [vmem:[#allocation3 + $0x169] ss:$2 sm:$0xff] }
 0x2e5   : > { %v3844_v8 = vpack.c.bf16 %v3840_v17, %v3838_v14  ;;  %v3966_v19 = vpack.c.bf16 %v3962_v35, %v3960_v37  ;;  %v4084_v7 = vld [vmem:[#allocation3 + $0x16a] ss:$2 sm:$0xff] }
 0x2e6   : > { %6025 = vmatmul.mubr.msk.bf16.vlgmr.msra.gmra.mrb[32].mxu1 %vm535_vm0, %v3494_v43  ;;  %v4082_v43 = vld [vmem:[#allocation3 + $0x13a] ss:$2 sm:$0xff]  ;;  %v5457_v35 = vld [vmem:[%s8147_s6] ss:$0 sm:$0xff] }
 0x2e7   : > { %6033 = vmatpush3.bf16.msra.mxu1 %v7784_v25  ;;  %6028 = vmatprep.mubr.msk.bf16.mxu1 %vm535_vm0, %v3495_v47  ;;  %v3721_v25 = vpack.c.bf16 %v3711_v50, %v3709_v18  ;;  %v4088_v54 = vpack.c.bf16 %v4084_v7, %v4082_v43  ;;  %v6572_v50 = vld [vmem:[#allocation9 + $0x80] sm:$0xff]   ;;  %v4316_v18 = vld [vmem:[#allocation3 + $0x61] ss:$2 sm:$0xff]  ;;  %v4450_v27 = vld [vmem:[#allocation3 + $0x182] ss:$2 sm:$0xff] }
 0x2e8   : > { %6034 = vmatprep.subr.bf16.mxu1 %v6561_v45  ;;  %v4440_v17 = vld [vmem:[#allocation3 + $0x92] ss:$2 sm:$0xff]  ;;  %v5458_v37 = vld [vmem:[%s8148_s7] ss:$0 sm:$0xff] }
 0x2e9   : > { %v4444_v14 = vld [vmem:[#allocation3 + $0xf2] ss:$2 sm:$0xff] }
 0x2eb   : > { %6035 = vmatpush3.bf16.msra.mxu1 %v6561_v45  ;;  %v4192_v45 = vld [vmem:[#allocation3 + $0x30] ss:$2 sm:$0xff] }
 0x2ec   : > { %6044 = vmatprep.subr.bf16.mxu1 %v6562_v48  ;;  %v4207_v47 = vpack.c.bf16 %v4194_v40, %v4192_v45 }
 0x2ee   : > { %6029 = vmatmul.mubr.msk.bf16.gmra.mrb[36].mxu1 %vm535_vm0, %v3496_v3  ;;  %v6571_v3 = vld [vmem:[#allocation9 + $0x78] sm:$0xff]  }
 0x2ef   : > { %6036 = vmatprep.mubr.msk.bf16.mxu1 %vm535_vm0, %v3720_v41  ;;  %v4209_v41 = vpack.c.bf16 %v4202_v49, %v4200_v2 }
 0x2f6   : > { %6037 = vmatmul.mubr.msk.bf16.vlgmr.msra.gmra.mrb[32].mxu1 %vm535_vm0, %v3721_v25  ;;  %v4204_v25 = vld [vmem:[#allocation3 + $0x150] ss:$2 sm:$0xff] }
 0x2f7   : > { %6045 = vmatpush3.bf16.msra.mxu1 %v6562_v48  ;;  %6040 = vmatprep.mubr.msk.bf16.mxu1 %vm535_vm0, %v3722_v51  ;;  %v4198_v48 = vld [vmem:[#allocation3 + $0xc0] ss:$2 sm:$0xff]  ;;  %v4210_v57 = vpack.c.bf16 %v4206_v5, %v4204_v25 }
 0x2f8   : > { %6046 = vmatprep.subr.bf16.mxu1 %v6563_v61  ;;  %v4208_v63 = vpack.c.bf16 %v4198_v48, %v4196_v59 }
 0x2fb   : > { %6047 = vmatpush3.bf16.msra.mxu1 %v6563_v61  ;;  %v4314_v61 = vld [vmem:[#allocation3 + $0x31] ss:$2 sm:$0xff] }
 0x2fc   : > { %6056 = vmatprep.subr.bf16.mxu1 %v6564_v62  ;;  %v4329_v51 = vpack.c.bf16 %v4316_v18, %v4314_v61 }
 0x2fe   : > { %6041 = vmatmul.mubr.msk.bf16.gmra.mrb[36].mxu1 %vm535_vm0, %v3723_v16  ;;  %v4322_v16 = vld [vmem:[#allocation3 + $0xf1] ss:$2 sm:$0xff] }
 0x2ff   : > { %6048 = vmatprep.mubr.msk.bf16.mxu1 %vm535_vm0, %v3841_v28  ;;  %v4331_v28 = vpack.c.bf16 %v4324_v20, %v4322_v16 }
 0x306   : > { %6049 = vmatmul.mubr.msk.bf16.vlgmr.msra.gmra.mrb[32].mxu1 %vm535_vm0, %v3842_v33  ;;  %v4332_v33 = vpack.c.bf16 %v4328_v1, %v4326_v32 }
 0x307   : > { %6057 = vmatpush3.bf16.msra.mxu1 %v6564_v62  ;;  %6052 = vmatprep.mubr.msk.bf16.mxu1 %vm535_vm0, %v3843_v46  ;;  %v4320_v62 = vld [vmem:[#allocation3 + $0xc1] ss:$2 sm:$0xff]  ;;  %v4442_v46 = vld [vmem:[#allocation3 + $0xc2] ss:$2 sm:$0xff] }
 0x308   : > { %6058 = vmatprep.subr.bf16.mxu1 %v6565_v55  ;;  %v4330_v21 = vpack.c.bf16 %v4320_v62, %v4318_v52  ;;  %v4452_v26 = vpack.c.bf16 %v4442_v46, %v4440_v17  ;;  %v6574_v17 = vld [vmem:[%s8151_s10] sm:$0xff]  }
 0x30b   : > { %6059 = vmatpush3.bf16.msra.mxu1 %v6565_v55  ;;  %v4451_v55 = vpack.c.bf16 %v4438_v29, %v4436_v39 }
 0x30c   : > { %6068 = vmatprep.subr.bf16.mxu1 %v6566_v9 }
 0x30e   : > { %6053 = vmatmul.mubr.msk.bf16.gmra.mrb[36].mxu1 %vm535_vm0, %v3844_v8 }
 0x30f   : > { %6060 = vmatprep.mubr.msk.bf16.mxu1 %vm535_vm0, %v3963_v23  ;;  %v4448_v23 = vld [vmem:[#allocation3 + $0x152] ss:$2 sm:$0xff] }
 0x310   : > { %v4454_v34 = vpack.c.bf16 %v4450_v27, %v4448_v23  ;;  %v5463_v23 = vld [vmem:[%s6997_s21 + $0x40] ss:$2 sm:$0xff] }
 0x316   : > { %6061 = vmatmul.mubr.msk.bf16.vlgmr.msra.gmra.mrb[32].mxu1 %vm535_vm0, %v3964_v10  ;;  %v6143_v10 = vpack.c.bf16 %v4611_v60, %v4610_v58 }
 0x317   : > { %6069 = vmatpush3.bf16.msra.mxu1 %v6566_v9  ;;  %6064 = vmatprep.mubr.msk.bf16.mxu1 %vm535_vm0, %v3965_v12  ;;  %v4446_v9 = vld [vmem:[#allocation3 + $0x122] ss:$2 sm:$0xff] }
 0x318   : > { %6070 = vmatprep.subr.bf16.mxu1 %v6567_v11  ;;  %v4453_v8 = vpack.c.bf16 %v4446_v9, %v4444_v14  ;;  %v4613_v12 = vld [vmem:[%s8149_s8 + $0x18] sm:$0xff]  ;;  %v4688_v9 = vld [vmem:[%s8150_s9] sm:$0x3] }
 0x319   : > { %v5462_v14 = vld [vmem:[%s6997_s21 + $0x20] ss:$2 sm:$0xff] }
 0x31b   : > { %6071 = vmatpush3.bf16.msra.mxu1 %v6567_v11  ;;  %v4612_v11 = vld [vmem:[%s8149_s8 + $0x10] sm:$0xff] }
 0x31c   : > { %6080 = vmatprep.subr.bf16.mxu1 %v6568_v13 }
 0x31e   : > { %6065 = vmatmul.mubr.msk.bf16.gmra.mrb[36].mxu1 %vm535_vm0, %v3966_v19 }
 0x31f   : > { %6072 = vmatprep.mubr.msk.bf16.mxu1 %vm535_vm0, %v4085_v6 }
 0x326   : > { %6073 = vmatmul.mubr.msk.bf16.vlgmr.msra.gmra.mrb[32].mxu1 %vm535_vm0, %v4086_v38 }
 0x327   : > { %6081 = vmatpush3.bf16.msra.mxu1 %v6568_v13  ;;  %6076 = vmatprep.mubr.msk.bf16.mxu1 %vm535_vm0, %v4087_v4  ;;  %v6146_v13 = vpack.c.bf16 %v4613_v12, %v4612_v11  ;;  %v5467_v12 = vld [vmem:[%s6997_s21 + $0xc0] ss:$2 sm:$0xff] }
 0x328   : > { %6082 = vmatprep.subr.bf16.mxu1 %v6569_v30 }
 0x32b   : > { %6083 = vmatpush3.bf16.msra.mxu1 %v6569_v30 }
 0x32c   : > { %6092 = vmatprep.subr.bf16.mxu1 %v6570_v44 }
 0x32e   : > { %6077 = vmatmul.mubr.msk.bf16.gmra.mrb[36].mxu1 %vm535_vm0, %v4088_v54 }
 0x32f   : > { %6084 = vmatprep.mubr.msk.bf16.mxu1 %vm535_vm0, %v4207_v47 }
 0x336   : > { %6085 = vmatmul.mubr.msk.bf16.vlgmr.msra.gmra.mrb[32].mxu1 %vm535_vm0, %v4208_v63 }
 0x337   : > { %6093 = vmatpush3.bf16.msra.mxu1 %v6570_v44  ;;  %6088 = vmatprep.mubr.msk.bf16.mxu1 %vm535_vm0, %v4209_v41 }
 0x338   : > { %6094 = vmatprep.subr.bf16.mxu1 %v6571_v3 }
 0x33b   : > { %6095 = vmatpush3.bf16.msra.mxu1 %v6571_v3 }
 0x33c   : > { %6104 = vmatprep.subr.bf16.mxu1 %v6572_v50 }
 0x33e   : > { %6089 = vmatmul.mubr.msk.bf16.gmra.mrb[36].mxu1 %vm535_vm0, %v4210_v57 }
 0x33f   : > { %6096 = vmatprep.mubr.msk.bf16.mxu1 %vm535_vm0, %v4329_v51 }
 0x346   : > { %6097 = vmatmul.mubr.msk.bf16.vlgmr.msra.gmra.mrb[32].mxu1 %vm535_vm0, %v4330_v21 }
 0x347   : > { %6105 = vmatpush3.bf16.msra.mxu1 %v6572_v50  ;;  %6100 = vmatprep.mubr.msk.bf16.mxu1 %vm535_vm0, %v4331_v28 }
 0x348   : > { %6106 = vmatprep.subr.bf16.mxu1 %v6573_v22 }
 0x34b   : > { %6107 = vmatpush3.bf16.msra.mxu1 %v6573_v22 }
 0x34c   : > { %6142 = vmatprep.subr.bf16.mxu1 %v6745_v24 }
 0x34e   : > { %6101 = vmatmul.mubr.msk.bf16.gmra.mrb[36].mxu1 %vm535_vm0, %v4332_v33 }
 0x34f   : > { %6108 = vmatprep.mubr.msk.bf16.mxu1 %vm535_vm0, %v4451_v55 }
 0x356   : > { %6109 = vmatmul.mubr.msk.bf16.vlgmr.msra.gmra.mrb[32].mxu1 %vm535_vm0, %v4452_v26  ;;  %v4785_v26 = vld [vmem:[%s6997_s21] ss:$2 sm:$0xff] }
 0x357   : > { %6112 = vmatprep.mubr.msk.bf16.mxu1 %vm535_vm0, %v4453_v8  ;;  %6144 = vmatpush3.bf16.msra.mxu1 %v6143_v10  ;;  %v4800_v27 = vpack.c.bf16 %v5462_v14, %v4785_v26  ;;  %v5465_v10 = vld [vmem:[%s6997_s21 + $0x80] ss:$2 sm:$0xff] }
 0x358   : > { %6145 = vmatprep.subr.bf16.mxu1 %v6745_v24  ;;  %v5466_v24 = vld [vmem:[%s6997_s21 + $0xa0] ss:$2 sm:$0xff] }
 0x359   : > { %v4802_v11 = vpack.c.bf16 %v5466_v24, %v5465_v10 }
 0x35b   : > { %6147 = vmatpush3.bf16.msra.mxu1 %v6146_v13  ;;  %v5468_v13 = vld [vmem:[%s6997_s21 + $0xe0] ss:$2 sm:$0xff] }
 0x35c   : > { %6127 = vmatprep.subr.mxu1 %v6744_v0 }
 0x35e   : > { %6113 = vmatmul.mubr.msk.bf16.gmra.mrb[36].mxu1 %vm535_vm0, %v4454_v34  ;;  %v5464_v34 = vld [vmem:[%s6997_s21 + $0x60] ss:$2 sm:$0xff]  ;;  %s5482_s21 = sshll.u32 %s6842_s29, 8  ;;  %s6750_s29 = smov [#allocation10]  }
 0x35f   : > { %6124 = vmatprep.mubr.msk.f32.mxu1 %vm6746_vm10, %v6744_v0  ;;  %s8097_s11 = scalar_lea.hbm %s8178_s20, %s5482_s21 }
 0x429   : > { %v6110_v53 = vpop.f32.mrb[32].mxu1 }
 0x42a   : > { %v4518_v19 = vpop.f32.mrb[33].mxu1  ;;  %v4566_v31 = vmul.f32 %v6110_v53, %v5457_v35 }
 0x42b   : > { %v4564_v6 = vmul.f32 %v5457_v35, %v4518_v19  ;;  %v6111_v15 = vpop.f32.mrb[34].mxu1 }
 0x42c   : > { %v4521_v56 = vpop.f32.mrb[35].mxu1  ;;  %v4567_v38 = vmul.f32 %v6111_v15, %v5457_v35  ;;  %v7887_v30 = vadd.f32 %v5458_v37, %v4566_v31 }
 0x42d   : > { %v7885_v42 = vadd.f32 %v5458_v37, %v4564_v6  ;;  %v4565_v36 = vmul.f32 %v5457_v35, %v4521_v56 }
 0x42e   : > { %v7893_v7 = vadd.f32 %v5458_v37, %v4567_v38  ;;  %v4590_v47 = vsel %vm535_vm0, %v7887_v30, 0.0 }
 0x42f   : > { %v7889_v4 = vadd.f32 %v5458_v37, %v4565_v36  ;;  %v4587_v44 = vsel %vm535_vm0, %v7885_v42, 0.0 }
 0x430   : > { %v4592_v3 = vsel %vm535_vm0, %v7893_v7, 0.0 }
 0x431   : > { %v4588_v40 = vsel %vm535_vm0, %v7889_v4, 0.0  ;;  %v6114_v43 = vpop.f32.mrb[36].mxu1 }
 0x432   : > { %v4589_v54 = vadd.f32 %v4588_v40, %v4587_v44  ;;  %v4534_v45 = vpop.f32.mrb[37].mxu1  ;;  %v4570_v48 = vmul.f32 %v6114_v43, %v5457_v35 }
 0x433   : > { %v4568_v49 = vmul.f32 %v5457_v35, %v4534_v45  ;;  %v6115_v59 = vpop.f32.mrb[38].mxu1 }
 0x434   : > { %v4591_v63 = vadd.f32 %v4590_v47, %v4589_v54  ;;  %v4537_v2 = vpop.f32.mrb[39].mxu1  ;;  %v4571_v50 = vmul.f32 %v6115_v59, %v5457_v35  ;;  %v7903_v25 = vadd.f32 %v5458_v37, %v4570_v48  ;;  %v4773_v47 = vlaneseq }
 0x435   : > { %v7901_v41 = vadd.f32 %v5458_v37, %v4568_v49  ;;  %v4569_v5 = vmul.f32 %v5457_v35, %v4537_v2  ;;  %v4803_v35 = vpack.c.bf16 %v5468_v13, %v5467_v12  ;;  %v5474_v49 = vld [vmem:[%s8176_s16] ss:$0 sm:$0xff] }
 0x436   : > { %v4593_v18 = vadd.f32 %v4592_v3, %v4591_v63  ;;  %v7909_v62 = vadd.f32 %v5458_v37, %v4571_v50  ;;  %v4598_v21 = vsel %vm535_vm0, %v7903_v25, 0.0  ;;  %v4774_v48 = vshrl.u32 %v4773_v47, 7  ;;  %v5475_v2 = vld [vmem:[%s8177_s12] ss:$0 sm:$0xff]  ;;  %s5085_s12 = scalar_lea.sflag [#allocation6], %s6993_s18 }
 0x437   : > { %v4594_v57 = vsel %vm535_vm0, %v7901_v41, 0.0  ;;  %v7907_v61 = vadd.f32 %v5458_v37, %v4569_v5 }
 0x438   : > { %v4595_v51 = vadd.f32 %v4594_v57, %v4593_v18  ;;  %v4600_v22 = vsel %vm535_vm0, %v7909_v62, 0.0  ;;  %v4775_v63 = vsub.s32 0, %v4774_v48 }
 0x439   : > { %v4596_v20 = vsel %vm535_vm0, %v7907_v61, 0.0 }
 0x43a   : > { %v4597_v52 = vadd.f32 %v4596_v20, %v4595_v51 }
 0x43c   : > { %v4599_v16 = vadd.f32 %v4598_v21, %v4597_v52 }
 0x43e   : > { %v4601_v28 = vadd.f32 %v4600_v22, %v4599_v16 }
 0x440   : > { %v4602_v1 = vrot.slane %v4601_v28, 4 }
 0x442   : > { %v4603_v29 = vadd.f32 %v4602_v1, %v4601_v28 }
 0x444   : > { %v4604_v32 = vrot.slane %v4603_v29, 2 }
 0x446   : > { %v4605_v33 = vadd.f32 %v4604_v32, %v4603_v29 }
 0x448   : > { %v4606_v39 = vrot.slane %v4605_v33, 1 }
 0x44a   : > { %v4607_v55 = vadd.f32 %v4606_v39, %v4605_v33 }
 0x44c   : > { %v4609_v46 = vmul.f32 0.015625, %v4607_v55 }
 0x44e   : > { %6125 = vmatmul.mubr.msk.f32.vlgmr.msra.gmra.mrb[40].mxu1 %vm535_vm0, %v4609_v46 }
 0x44f   : > { %6128 = vmatpush3.msk.msra.mxu1 %vm4693_vm11, %v4688_v9  ;;  %6129 = vmatprep.mubr.msk.f32.mxu1 %vm6746_vm10, %v6744_v0  ;;  %v4801_v0 = vpack.c.bf16 %v5464_v34, %v5463_v23 }
 0x450   : > { %6132 = vmatprep.subr.bf16.mxu1 %v6574_v17 }
 0x521   : > { %v4683_v8 = vpop.f32.mrb[40].mxu1 }
 0x522   : > { %v4687_v58 = vmax.f32 %v4683_v8, 0.0  ;;  %v6126_v60 = vpop.f32.mrb[41].mxu1 }
 0x524   : > { %6130 = vmatmul.mubr.msk.f32.vlgmr.msra.gmra.mrb[42].mxu1 %vm4689_vm12, %v4687_v58 }
 0x525   : > { %6133 = vmatpush3.bf16.msra.mxu1 %v6574_v17  ;;  %6134 = vmatprep.mubr.msk.bf16.mxu1 %vm489_vm1, %v4800_v27 }
 0x528   : > { %6135 = vmatmul.mubr.msk.bf16.vlgmr.msra.gmra.mrb[44].mxu1 %vm489_vm1, %v4801_v0 }
 0x529   : > { %6138 = vmatprep.mubr.msk.bf16.mxu1 %vm489_vm1, %v4802_v11 }
 0x530   : > { %6139 = vmatmul.mubr.msk.bf16.gmra.mrb[48].mxu1 %vm489_vm1, %v4803_v35  ;;  %vm4936_vm1 = vcmask 1041409  }
 0x5f7   : > { %v4763_v53 = vpop.f32.mrb[42].mxu1 }
 0x5f8   : > { %v4767_v37 = vsub.f32 0.0, %v4763_v53  ;;  %v6131_v19 = vpop.f32.mrb[43].mxu1 }
 0x5fa   : > { %v4768_v31 = vmul.f32 1.442695, %v4767_v37 }
 0x5fb   : > { %v6136_v6 = vpop.f32.mrb[44].mxu1 }
 0x5fc   : > { %6575 = vpow2.f32 %v4768_v31  ;;  %v4858_v15 = vpop.f32.mrb[45].mxu1  ;;  %v4898_v59 = vmul.f32 %v6136_v6, %v5474_v49 }
 0x5fd   : > { %v6137_v56 = vpop.f32.mrb[46].mxu1  ;;  %v4896_v3 = vmul.f32 %v5474_v49, %v4858_v15 }
 0x5fe   : > { %v4861_v38 = vpop.f32.mrb[47].mxu1  ;;  %v4899_v50 = vmul.f32 %v6137_v56, %v5474_v49  ;;  %v4913_v21 = vadd.f32 %v5475_v2, %v4898_v59 }
 0x5ff   : > { %v4897_v5 = vmul.f32 %v5474_v49, %v4861_v38  ;;  %v4911_v22 = vadd.f32 %v5475_v2, %v4896_v3 }
 0x600   : > { %v4914_v28 = vadd.f32 %v5475_v2, %v4899_v50 }
 0x601   : > { %v4912_v1 = vadd.f32 %v5475_v2, %v4897_v5 }
 0x603   : > { %v6140_v36 = vpop.f32.mrb[48].mxu1 }
 0x604   : > { %v4874_v44 = vpop.f32.mrb[49].mxu1  ;;  %v4902_v18 = vmul.f32 %v6140_v36, %v5474_v49 }
 0x605   : > { %v6141_v40 = vpop.f32.mrb[50].mxu1  ;;  %v4900_v57 = vmul.f32 %v5474_v49, %v4874_v44 }
 0x606   : > { %v6576_v43 = vpop.eup %6575  ;;  %v4877_v54 = vpop.f32.mrb[51].mxu1  ;;  %v4903_v51 = vmul.f32 %v6141_v40, %v5474_v49  ;;  %v4917_v29 = vadd.f32 %v5475_v2, %v4902_v18 }
 0x607   : > { %v4770_v45 = vadd.f32 1.0, %v6576_v43  ;;  %v4901_v20 = vmul.f32 %v5474_v49, %v4877_v54  ;;  %v4915_v32 = vadd.f32 %v5475_v2, %v4900_v57 }
 0x608   : > { %v4918_v33 = vadd.f32 %v5475_v2, %v4903_v51 }
 0x609   : > { %6577 = vrcp.f32 %v4770_v45  ;;  %v4916_v39 = vadd.f32 %v5475_v2, %v4901_v20 }
 0x613   : > { %v6578_v52 = vpop.eup %6577 }
 0x614   : > { %v4776_v16 = vrot.slane %v6578_v52, %v4775_v63 }
 0x616   : > { %v4779_v55 = vmul.f32 %v4776_v16, %v7887_v30  ;;  %v4777_v46 = vmul.f32 %v4776_v16, %v7885_v42  ;;  %v4780_v9 = vmul.f32 %v4776_v16, %v7893_v7  ;;  %v4778_v17 = vmul.f32 %v4776_v16, %v7889_v4 }
 0x617   : > { %v4783_v26 = vmul.f32 %v4776_v16, %v7903_v25  ;;  %v4781_v14 = vmul.f32 %v4776_v16, %v7901_v41  ;;  %v4784_v8 = vmul.f32 %v4776_v16, %v7909_v62  ;;  %v4782_v27 = vmul.f32 %v4776_v16, %v7907_v61 }
 0x618   : > { %v7952_v23 = vadd.f32 %v4913_v21, %v4779_v55  ;;  %v7954_v34 = vadd.f32 %v4911_v22, %v4777_v46  ;;  %v7956_v30 = vadd.f32 %v4914_v28, %v4780_v9  ;;  %v7958_v42 = vadd.f32 %v4912_v1, %v4778_v17 }
 0x619   : > { %v7960_v7 = vadd.f32 %v4917_v29, %v4783_v26  ;;  %v7962_v4 = vadd.f32 %v4915_v32, %v4781_v14  ;;  %v7964_v58 = vadd.f32 %v4918_v33, %v4784_v8  ;;  %v7966_v25 = vadd.f32 %v4916_v39, %v4782_v27 }
 0x61a   : > { %v4974_v41 = vrot.slane %v7954_v34, 2  ;;  %v4975_v61 = vrot.slane %v7958_v42, 1  ;;  %v4957_v62 = vrot.slane %v7954_v34, 1  ;;  %v4978_v60 = vrot.slane %v7956_v30, 7 }
 0x61b   : > { %v4980_v10 = vrot.slane %v7962_v4, 6  ;;  %v4982_v24 = vrot.slane %v7966_v25, 5  ;;  %v4984_v0 = vrot.slane %v7960_v7, 4  ;;  %v4986_v12 = vrot.slane %v7964_v58, 3 }
 0x61c   : > { %v4976_v11 = vsel %vm4936_vm1, %v4975_v61, %v4974_v41  ;;  %v4958_v13 = vsel %vm4936_vm1, %v7958_v42, %v4957_v62  ;;  %v4959_v35 = vrot.slane %v7952_v23, 7  ;;  %v4961_v37 = vrot.slane %v7956_v30, 6 }
 0x61d   : > { %v4977_v53 = vsel %vm4939_vm13, %v7952_v23, %v4976_v11  ;;  %v4963_v19 = vrot.slane %v7962_v4, 5  ;;  %v4965_v31 = vrot.slane %v7966_v25, 4  ;;  %v4967_v56 = vrot.slane %v7960_v7, 3 }
 0x61e   : > { %v4979_v6 = vsel %vm4942_vm14, %v4978_v60, %v4977_v53  ;;  %v4960_v15 = vsel %vm4939_vm13, %v4959_v35, %v4958_v13  ;;  %v5040_v38 = vrot.slane %v7954_v34, 6  ;;  %v5041_v40 = vrot.slane %v7958_v42, 5 }
 0x61f   : > { %v4981_v36 = vsel %vm4945_vm15, %v4980_v10, %v4979_v6  ;;  %v4962_v44 = vsel %vm4942_vm14, %v4961_v37, %v4960_v15  ;;  %v5043_v43 = vrot.slane %v7952_v23, 4  ;;  %v4969_v47 = vrot.slane %v7964_v58, 2 }
 0x620   : > { %v4983_v54 = vsel %vm4948_vm2, %v4982_v24, %v4981_v36  ;;  %v4964_v45 = vsel %vm4945_vm15, %v4963_v19, %v4962_v44  ;;  %v5045_v48 = vrot.slane %v7956_v30, 3  ;;  %v5042_v63 = vsel %vm4936_vm1, %v5041_v40, %v5040_v38 }
 0x621   : > { %v4985_v49 = vsel %vm4951_vm3, %v4984_v0, %v4983_v54  ;;  %v4966_v59 = vsel %vm4948_vm2, %v4965_v31, %v4964_v45  ;;  %v5047_v2 = vrot.slane %v7962_v4, 2  ;;  %v5044_v5 = vsel %vm4939_vm13, %v5043_v43, %v5042_v63 }
 0x622   : > { %v4987_v3 = vsel %vm4954_vm4, %v4986_v12, %v4985_v49  ;;  %v4968_v50 = vsel %vm4951_vm3, %v4967_v56, %v4966_v59  ;;  %v5049_v18 = vrot.slane %v7966_v25, 1  ;;  %v5046_v51 = vsel %vm4942_vm14, %v5045_v48, %v5044_v5 }
 0x623   : > { %4988 = vrot.lane.b32.xlu1 %v4987_v3, %s6747_s19  ;;  %v4970_v57 = vsel %vm4954_vm4, %v4969_v47, %v4968_v50  ;;  %v5023_v20 = vrot.slane %v7954_v34, 5  ;;  %v5024_v52 = vrot.slane %v7958_v42, 4  ;;  %v5048_v21 = vsel %vm4945_vm15, %v5047_v2, %v5046_v51 }
 0x624   : > { %4971 = vrot.lane.b32.xlu0 %v4970_v57, %s6748_s15  ;;  %v5052_v16 = vrot.slane %v7964_v58, 7  ;;  %v5026_v22 = vrot.slane %v7952_v23, 3  ;;  %v5028_v28 = vrot.slane %v7956_v30, 2  ;;  %v5050_v1 = vsel %vm4948_vm2, %v5049_v18, %v5048_v21 }
 0x625   : > { %v5025_v29 = vsel %vm4936_vm1, %v5024_v52, %v5023_v20  ;;  %v5030_v32 = vrot.slane %v7962_v4, 1  ;;  %v5033_v33 = vrot.slane %v7960_v7, 7  ;;  %v5051_v39 = vsel %vm4951_vm3, %v7960_v7, %v5050_v1 }
 0x626   : > { %v5027_v55 = vsel %vm4939_vm13, %v5026_v22, %v5025_v29  ;;  %v5057_v46 = vrot.slane %v7954_v34, 7  ;;  %v5058_v9 = vrot.slane %v7958_v42, 6  ;;  %v5053_v17 = vsel %vm4954_vm4, %v5052_v16, %v5051_v39 }
 0x627   : > { %v5029_v26 = vsel %vm4942_vm14, %v5028_v28, %v5027_v55  ;;  %v5035_v14 = vrot.slane %v7964_v58, 6  ;;  %v5060_v8 = vrot.slane %v7952_v23, 5  ;;  %5054 = vrot.lane.b32.xlu1 %v5053_v17, %s6747_s19  ;;  %v5062_v61 = vrot.slane %v7956_v30, 4  ;;  %s6665_s19 = scalar_lea.vmem %s8099_s17, 256 }
 0x628   : > { %v5031_v27 = vsel %vm4945_vm15, %v5030_v32, %v5029_v26  ;;  %v5059_v41 = vsel %vm4936_vm1, %v5058_v9, %v5057_v46  ;;  %v5064_v62 = vrot.slane %v7962_v4, 3  ;;  %v5066_v24 = vrot.slane %v7966_v25, 2  ;;  %p6666_p11 = scmp.ne.s32.totalorder %s8099_s17, %s6665_s19 }
 0x629   : > { %v5032_v60 = vsel %vm4948_vm2, %v7966_v25, %v5031_v27  ;;  %v5061_v10 = vsel %vm4939_vm13, %v5060_v8, %v5059_v41  ;;  %v4991_v0 = vrot.slane %v7954_v34, 3  ;;  %v4992_v13 = vrot.slane %v7958_v42, 2 }
 0x62a   : > { %v5034_v11 = vsel %vm4951_vm3, %v5033_v33, %v5032_v60  ;;  %v5063_v12 = vsel %vm4942_vm14, %v5062_v61, %v5061_v10  ;;  %v4994_v35 = vrot.slane %v7952_v23, 1  ;;  %v5068_v19 = vrot.slane %v7960_v7, 1  ;;  %p6667_p1 = pnand %p6666_p11, %p8179_p0 }
 0x62b   : > { %v5036_v53 = vsel %vm4954_vm4, %v5035_v14, %v5034_v11  ;;  %v5065_v37 = vsel %vm4945_vm15, %v5064_v62, %v5063_v12  ;;  %v4993_v6 = vsel %vm4936_vm1, %v4992_v13, %v4991_v0  ;;  %v4997_v15 = vrot.slane %v7962_v4, 7 }
 0x62c   : > { %5037 = vrot.lane.b32.xlu0 %v5036_v53, %s6748_s15  ;;  %v5067_v31 = vsel %vm4948_vm2, %v5066_v24, %v5065_v37  ;;  %v4999_v56 = vrot.slane %v7966_v25, 6  ;;  %v4995_v36 = vsel %vm4939_vm13, %v4994_v35, %v4993_v6  ;;  %v4935_v44 = vrot.slane %v7958_v42, 7  ;;  %p6668_p3 = pneg %p6667_p1  ;;  %s6669_s15 = sshll.u32 %s6750_s29, 4  ;;  %s6670_s15 = int_to_ptr.vmem [resolvable:$false] %s6669_s15 }
 0x62d   : > { %v5069_v38 = vsel %vm4951_vm3, %v5068_v19, %v5067_v31  ;;  %v4938_v40 = vrot.slane %v7952_v23, 6  ;;  %v4996_v54 = vsel %vm4942_vm14, %v7956_v30, %v4995_v36  ;;  %v5001_v45 = vrot.slane %v7960_v7, 5  ;;  %p6672_p7 = scmp.lt.s32.totalorder %s8099_s17, %s6670_s15 }
 0x62e   : > { %v5070_v43 = vsel %vm4954_vm4, %v7964_v58, %v5069_v38  ;;  %v5003_v47 = vrot.slane %v7964_v58, 4  ;;  %v4998_v48 = vsel %vm4945_vm15, %v4997_v15, %v4996_v54  ;;  %v4937_v49 = vsel %vm4936_vm1, %v4935_v44, %v7954_v34 }
 0x62f   : > { %5071 = vrot.lane.b32.xlu1 %v5070_v43, %s6749_s22  ;;  %v4941_v59 = vrot.slane %v7956_v30, 5  ;;  %v4944_v63 = vrot.slane %v7962_v4, 4  ;;  %v5000_v2 = vsel %vm4948_vm2, %v4999_v56, %v4998_v48  ;;  %v4940_v3 = vsel %vm4939_vm13, %v4938_v40, %v4937_v49 }
 0x630   : > { %v4947_v50 = vrot.slane %v7966_v25, 3  ;;  %v5008_v5 = vrot.slane %v7954_v34, 4  ;;  %v5002_v18 = vsel %vm4951_vm3, %v5001_v45, %v5000_v2  ;;  %v5009_v51 = vrot.slane %v7958_v42, 3 }
 0x631   : > { %v4943_v57 = vsel %vm4942_vm14, %v4941_v59, %v4940_v3  ;;  %v5011_v20 = vrot.slane %v7952_v23, 2  ;;  %v5004_v52 = vsel %vm4954_vm4, %v5003_v47, %v5002_v18  ;;  %v4950_v16 = vrot.slane %v7960_v7, 2 }
 0x632   : > { %v4946_v21 = vsel %vm4945_vm15, %v4944_v63, %v4943_v57  ;;  %5005 = vrot.lane.b32.xlu0 %v5004_v52, %s6749_s22  ;;  %v4953_v22 = vrot.slane %v7964_v58, 1  ;;  %v5010_v34 = vsel %vm4936_vm1, %v5009_v51, %v5008_v5  ;;  %v5013_v1 = vrot.slane %v7956_v30, 1  ;;  %s6671_s22 = scalar_lea.vmem %s6670_s15, 512 }
 0x633   : > { %v4949_v28 = vsel %vm4948_vm2, %v4947_v50, %v4946_v21  ;;  %v5012_v23 = vsel %vm4939_vm13, %v5011_v20, %v5010_v34  ;;  %v5016_v33 = vrot.slane %v7966_v25, 7  ;;  %v5018_v55 = vrot.slane %v7960_v7, 6  ;;  %p6673_p9 = scmp.lt.s32.totalorder %s6671_s22, %s6665_s19 }
 0x634   : > { %v4952_v42 = vsel %vm4951_vm3, %v4950_v16, %v4949_v28  ;;  %v5014_v32 = vsel %vm4942_vm14, %v5013_v1, %v5012_v23  ;;  %v5020_v9 = vrot.slane %v7964_v58, 5 }
 0x635   : > { %v4955_v29 = vsel %vm4954_vm4, %v4953_v22, %v4952_v42  ;;  %v5015_v39 = vsel %vm4945_vm15, %v7962_v4, %v5014_v32  ;;  %p6674_p12 = por %p6673_p9, %p6672_p7 }
 0x636   : > { %v5017_v46 = vsel %vm4948_vm2, %v5016_v33, %v5015_v39 }
 0x637   : > { %v5019_v30 = vsel %vm4951_vm3, %v5018_v55, %v5017_v46  ;;  %p6675_p2 = pnand %p6674_p12, %p6668_p3 }
 0x638   : > { %v5021_v17 = vsel %vm4954_vm4, %v5020_v9, %v5019_v30 }
 0x695   : > { %v4989_v26 = vpop.permute.xlu1 %4988 }
 0x696   : > { %v4972_v14 = vpop.permute.xlu0 %4971 }
 0x697   : > { %v5074_v58 = vsel %vm535_vm0, %v4955_v29, %v4972_v14 }
 0x698   : > { %v5076_v62 = vsel %vm5075_vm6, %v5074_v58, %v4989_v26 }
 0x699   : > { %v5055_v8 = vpop.permute.xlu1 %5054 }
 0x69e   : > { %v5038_v27 = vpop.permute.xlu0 %5037 }
 0x69f   : > { %v5079_v25 = vsel %vm535_vm0, %v5021_v17, %v5038_v27 }
 0x6a0   : > { %v5080_v4 = vsel %vm5075_vm6, %v5079_v25, %v5055_v8 }
 0x6a1   : > { %v5072_v7 = vpop.permute.xlu1 %5071 }
 0x6a2   : > { %v5081_v41 = vsel %vm5077_vm5, %v5080_v4, %v5072_v7 }
 0x6a3   : > { %5083 = vst [vmem:[%s487_s30 + $0x8] sm:$0xff] %v5081_v41 }
 0x6a4   : > { %v5006_v61 = vpop.permute.xlu0 %5005 }
 0x6a5   : > { %v5078_v60 = vsel %vm5077_vm5, %v5076_v62, %v5006_v61 }
 0x6a6   : > { %5082 = vst [vmem:[%s487_s30] sm:$0xff] %v5078_v60 }
 0x6a7   : > { %6678 = shalt.err (!%p6675_p2)
}
 0x6a8   : > { %s6679_s18 = scalar_lea.hbm %s8097_s11, 256  ;;  %s6683_s21 = scalar_lea.hbm %s8178_s20, 512 }
 0x6a9   : > { %p6680_p13 = scmp.ne.s32.totalorder %s8097_s11, %s6679_s18  ;;  %p6684_p4 = scmp.lt.u32.totalorder %s8097_s11, %s8178_s20 }
 0x6aa   : > { %p6685_p5 = scmp.lt.u32.totalorder %s6683_s21, %s6679_s18  ;;  %p6687_p11 = scmp.lt.u32.totalorder %s6679_s18, %s8097_s11 }
 0x6ab   : > { %p6681_p6 = pnand %p6680_p13, %p8179_p0 }
 0x6ac   : > { %p6686_p8 = por %p6685_p5, %p6684_p4 }
 0x6ad   : > { %p6682_p10 = pneg %p6681_p6 }
 0x6ae   : > { %p6688_p1 = por %p6687_p11, %p6686_p8 }
 0x6b0   : > { %p6689_p3 = pnand %p6688_p1, %p6682_p10 }
 0x6b2   : > { %6692 = shalt.err (!%p6689_p3)
}
 0x6b3   : > { %6480 = dma.vmem_to_hbm [thread:$0]  (%p8179_p0), %s8099_s17, 256, %s8097_s11, %s5085_s12  }
 0x6b4 PF: > { %s8180_s19 = sld [smem:[#allocation14_spill]]  ;;  %s8181_s29 = sld [smem:[#allocation15_spill]] }
 0x6b5   : > { %p8183_p9 = scmp.ge.s32.totalorder %s6735_s28, 2 }
 0x6ba   : > { %s5111_s15 = sand.u32 1, %s8180_s19   ;;  %p8182_p7 = scmp.ne.s32.totalorder %s8181_s29, 0 }
 0x6bb   : > { %s5112_s22 = scalar_lea.sflag [#allocation6], %s5111_s15 }
 0x6bc   : > { %p6494_p12 = pnand %p8183_p9, %p8182_p7 }
 0x6be   : > { %6718 = dma.done.wait (!%p6494_p12), %s5112_s22, 256  }
 0x6bf   : > { %6720 = vsyncadd (!%p6494_p12), %s5112_s22, 4294967040  ;;  %p27_p2 = scmp.ge.s32.totalorder %s6931_s13, 4   ;;  %s8184_s25 = smov %s6727_s26 }
 0x6c0   : > { %s8185_s26 = smov %s6731_s27  ;;  %s8186_s27 = smov %s6947_s24 }
 0x6c1   : > { %s8187_s28 = smov %s6931_s13  ;;  %29 = sbr.rel (!%p27_p2) target bundleno = 10 (0xa), region = 223 }
 0x6c8   :  { %5117 = vsyncpa [#allocation5], 1 }
 0x6c9   :  { %5119 = vsyncpa [#allocation5 + $0x1], 1 }
 0x6ca   :  { %5120 = vsyncpa [#allocation8], 1 }
 0x6cb   :  { %5121 = vsyncpa [#allocation6], 1 }
 0x6cc   :  { %5123 = vsyncpa [#allocation6 + $0x1], 1 }

</bundles_post_ra>
